<compile_context>
chip_gen: v7x
topology: tpu7x:2x2x1
jax: 0.10.0
libtpu: 0.0.40
codegen_flags: <defaults>
</compile_context>

<pallas_src>
import jax
import jax.numpy as jnp
from jax import lax
from jax.experimental import pallas as pl
from jax.experimental.pallas import tpu as pltpu


# ----------------------------- kernel -------------------------------------- #

def _make_block_kernel(N, H, W, Cin, F, eps):
    WF = W * F
    inv_count = 1.0 / float(N * H * W)

    def kernel(x_ref, wband1_ref, wband2_ref, wband3_ref,
               bias_ref, gamma_ref, beta_ref,
               out_ref,
               ybuf_ref, xpad1_ref, xpad2_ref, lsum_ref, lsq_ref):
        # x_ref      : (N, H, W*Cin)          lane-dense input
        # wbandK_ref : (3, (W+2p)*Cin_k, W*F) banded per-dy weights (dx folded in)
        # bias/gamma/beta_ref : (3, W*F)      per-stage, pre-tiled to 128 lanes
        # out_ref    : (N, H, W*F)            final block output
        # ybuf_ref   : (N, H, W*F)            resident activations (reused per stage)
        # xpad1_ref  : (H+2, (W+2)*Cin)       zero-padded scratch for dil=1
        # xpad2_ref  : (H+4, (W+4)*F)         zero-padded scratch for dil=2 (stages 2&3)
        # lsum/lsq   : (1, W*F)               lane-dense batch-stat accumulators

        # Zero the padded scratch once; only interiors are rewritten per sample,
        # so the zero border is preserved across samples and stages.
        xpad1_ref[...] = jnp.zeros_like(xpad1_ref)
        xpad2_ref[...] = jnp.zeros_like(xpad2_ref)

        def conv_taps(xpad_ref, wband_ref, dil):
            # One MXU dot per dy tap over the full-width padded row slab.
            acc = jnp.dot(xpad_ref[0:H, :], wband_ref[0],
                          preferred_element_type=jnp.float32)
            for dy in range(1, 3):
                acc = acc + jnp.dot(xpad_ref[dy * dil:dy * dil + H, :],
                                    wband_ref[dy],
                                    preferred_element_type=jnp.float32)
            return acc

        def conv_stage(dil, cin, xpad_ref, wband_ref, bias_row, read_fn):
            """conv(3x3, dilation=dil) + bias + ReLU over the whole batch.

            Writes each sample to ybuf_ref and accumulates lane-dense stats.
            BN of the previous stage is fused into read_fn; only the interior
            receives it, the padded border stays zero (PyTorch pad-after-BN).
            """
            pad = dil
            wcin = W * cin
            lsum_ref[...] = jnp.zeros_like(lsum_ref)
            lsq_ref[...] = jnp.zeros_like(lsq_ref)

            def per_sample(n, carry):
                xpad_ref[pad:pad + H, pad * cin:pad * cin + wcin] = read_fn(n)
                acc = conv_taps(xpad_ref, wband_ref, dil)
                acc = jnp.maximum(acc + bias_row, 0.0)          # bias + ReLU
                lsum_ref[...] += jnp.sum(acc, axis=0, keepdims=True)
                lsq_ref[...] += jnp.sum(acc * acc, axis=0, keepdims=True)
                ybuf_ref[n] = acc
                return carry

            lax.fori_loop(0, N, per_sample, 0, unroll=True)

        def finish_bn(gamma_row, beta_row):
            """Fold batch stats + gamma/beta into lane-dense (1, W*F) scale/shift."""
            lsum = lsum_ref[...]
            lsq = lsq_ref[...]
            ch_sum = jnp.zeros((1, F), jnp.float32)
            ch_sq = jnp.zeros((1, F), jnp.float32)
            for w in range(W):       # exact f32 reduction over the W lane groups
                ch_sum = ch_sum + lsum[:, w * F:(w + 1) * F]
                ch_sq = ch_sq + lsq[:, w * F:(w + 1) * F]
            mean_c = ch_sum * inv_count
            var_c = jnp.maximum(ch_sq * inv_count - mean_c * mean_c, 0.0)  # biased
            inv_std_c = lax.rsqrt(var_c + eps)
            # Re-tile the per-channel vectors to lane-dense (1, W*F) by reusing
            # the stat scratch (static strided stores, exact).
            for w in range(W):
                lsum_ref[:, w * F:(w + 1) * F] = mean_c
                lsq_ref[:, w * F:(w + 1) * F] = inv_std_c
            scale = gamma_row * lsq_ref[...]
            shift = beta_row - lsum_ref[...] * scale
            return scale, shift

        # ---- Stage 1: conv(dil=1) + ReLU, BN1 stats ----
        def read_x(n):
            return x_ref[n]
        conv_stage(1, Cin, xpad1_ref, wband1_ref, bias_ref[0:1, :], read_x)
        scale1, shift1 = finish_bn(gamma_ref[0:1, :], beta_ref[0:1, :])

        # ---- Stage 2: BN1 fused into the load, conv(dil=2) + ReLU, BN2 stats ----
        def read_y_bn1(n):
            return ybuf_ref[n] * scale1 + shift1
        conv_stage(2, F, xpad2_ref, wband2_ref, bias_ref[1:2, :], read_y_bn1)
        scale2, shift2 = finish_bn(gamma_ref[1:2, :], beta_ref[1:2, :])

        # ---- Stage 3: BN2 fused into the load, conv(dil=2) + ReLU, BN3 stats ----
        def read_y_bn2(n):
            return ybuf_ref[n] * scale2 + shift2
        conv_stage(2, F, xpad2_ref, wband3_ref, bias_ref[2:3, :], read_y_bn2)
        scale3, shift3 = finish_bn(gamma_ref[2:3, :], beta_ref[2:3, :])

        # ---- Final BN3 apply, single dense 128-lane store of the whole batch ----
        out_ref[...] = ybuf_ref[...] * scale3 + shift3

    return kernel


# ----------------------------- wrapper -------------------------------------- #

def _banded_weights(w_hwio, W_spatial, dil):
    """(3,3,Cin,Cout) HWIO filter -> (3, (W+2*dil)*Cin, W*Cout) banded weights.

    band[dy, wp*Cin+ci, w2*Cout+co] = w[dy, dx, ci, co] iff wp == w2 + dx*dil,
    so a single dot of the full-width padded row slab computes all dx taps.
    """
    kh, kw, cin, cout = w_hwio.shape
    pad = dil
    Wp = W_spatial + 2 * pad
    wp_idx = jnp.arange(Wp)[None, :, None]
    w2_idx = jnp.arange(W_spatial)[None, None, :]
    dx_idx = jnp.arange(kw)[:, None, None]
    sel = (wp_idx == w2_idx + dx_idx * dil).astype(w_hwio.dtype)     # (3, Wp, W)
    band = jnp.einsum('xpw,yxio->ypiwo', sel, w_hwio)                # (3,Wp,Cin,W,Cout)
    return band.reshape(kh, Wp * cin, W_spatial * cout)


@jax.jit
def eleven_conv_block(x_nchw, params):
    """Forward pass of ElevenConv2DBlock. Input/output layout: NCHW."""
    eps = 1e-5
    N, Cin, H, W = x_nchw.shape
    F = params["w1"].shape[-1]
    WF = W * F

    # NCHW -> lane-dense (N, H, W*Cin)
    x = jnp.transpose(x_nchw, (0, 2, 3, 1)).astype(jnp.float32).reshape(N, H, W * Cin)

    # Banded per-dy weights for the lane-dense row-slab MXU dots.
    wband1 = _banded_weights(params["w1"].astype(jnp.float32), W, 1)
    wband2 = _banded_weights(params["w2"].astype(jnp.float32), W, 2)
    wband3 = _banded_weights(params["w3"].astype(jnp.float32), W, 2)

    # Per-channel vectors pre-tiled to lane-dense (W*F) rows, stacked per stage.
    bias = jnp.stack([jnp.tile(params["b%d" % i].astype(jnp.float32), W)
                      for i in (1, 2, 3)])
    gamma = jnp.stack([jnp.tile(params["gamma%d" % i].astype(jnp.float32), W)
                       for i in (1, 2, 3)])
    beta = jnp.stack([jnp.tile(params["beta%d" % i].astype(jnp.float32), W)
                      for i in (1, 2, 3)])

    kernel = _make_block_kernel(N, H, W, Cin, F, eps)
    out = pl.pallas_call(
        kernel,
        out_shape=jax.ShapeDtypeStruct((N, H, WF), jnp.float32),
        grid=(1,),
        in_specs=[
            pl.BlockSpec((N, H, W * Cin), lambda i: (0, 0, 0)),
            pl.BlockSpec((3, (W + 2) * Cin, WF), lambda i: (0, 0, 0)),
            pl.BlockSpec((3, (W + 4) * F, WF), lambda i: (0, 0, 0)),
            pl.BlockSpec((3, (W + 4) * F, WF), lambda i: (0, 0, 0)),
            pl.BlockSpec((3, WF), lambda i: (0, 0)),
            pl.BlockSpec((3, WF), lambda i: (0, 0)),
            pl.BlockSpec((3, WF), lambda i: (0, 0)),
        ],
        out_specs=pl.BlockSpec((N, H, WF), lambda i: (0, 0, 0)),
        scratch_shapes=[
            pltpu.VMEM((N, H, WF), jnp.float32),                 # resident activations
            pltpu.VMEM((H + 2, (W + 2) * Cin), jnp.float32),     # zero-padded, dil=1
            pltpu.VMEM((H + 4, (W + 4) * F), jnp.float32),       # zero-padded, dil=2
            pltpu.VMEM((1, WF), jnp.float32),                    # lane-dense sum
            pltpu.VMEM((1, WF), jnp.float32),                    # lane-dense sum-of-squares
        ],
        compiler_params=pltpu.CompilerParams(
            dimension_semantics=("arbitrary",)),
    )(x, wband1, wband2, wband3, bias, gamma, beta)

    return jnp.transpose(out.reshape(N, H, W, F), (0, 3, 1, 2))   # -> NCHW


# ----------------------------- reference (pure JAX) ------------------------ #

def ref_forward(x_nchw, params, eps=1e-5):
    def conv(x, w, b, dil):
        return jax.lax.conv_general_dilated(
            x, w, window_strides=(1, 1),
            padding=((dil, dil), (dil, dil)),
            rhs_dilation=(dil, dil),
            dimension_numbers=("NHWC", "HWIO", "NHWC")) + b

    def bn(y, g, bt):
        mean = jnp.mean(y, axis=(0, 1, 2))
        var = jnp.mean((y - mean) ** 2, axis=(0, 1, 2))
        return (y - mean) / jnp.sqrt(var + eps) * g + bt

    x = jnp.transpose(x_nchw, (0, 2, 3, 1)).astype(jnp.float32)
    y = bn(jax.nn.relu(conv(x, params["w1"], params["b1"], 1)),
           params["gamma1"], params["beta1"])
    y = bn(jax.nn.relu(conv(y, params["w2"], params["b2"], 2)),
           params["gamma2"], params["beta2"])
    y = bn(jax.nn.relu(conv(y, params["w3"], params["b3"], 2)),
           params["gamma3"], params["beta3"])
    return jnp.transpose(y, (0, 3, 1, 2))


# ----------------------------- main ---------------------------------------- #

if __name__ == "__main__":
    # Small shapes consistent with the module (in_channels = 8).
    N, Cin, H, W = 2, 8, 16, 16
    filters = 8

    key = jax.random.PRNGKey(0)
    keys = jax.random.split(key, 13)
    (kx, kw1, kb1, kg1, kt1, kw2, kb2, kg2, kt2, kw3, kb3, kg3, kt3) = keys

    x = jax.random.normal(kx, (N, Cin, H, W), jnp.float32)

    # Weights in HWIO layout (kernel and reference both consume HWIO).
    params = {
        "w1": 0.1 * jax.random.normal(kw1, (3, 3, Cin, filters), jnp.float32),
        "b1": 0.1 * jax.random.normal(kb1, (filters,), jnp.float32),
        "gamma1": 1.0 + 0.1 * jax.random.normal(kg1, (filters,), jnp.float32),
        "beta1": 0.1 * jax.random.normal(kt1, (filters,), jnp.float32),
        "w2": 0.1 * jax.random.normal(kw2, (3, 3, filters, filters), jnp.float32),
        "b2": 0.1 * jax.random.normal(kb2, (filters,), jnp.float32),
        "gamma2": 1.0 + 0.1 * jax.random.normal(kg2, (filters,), jnp.float32),
        "beta2": 0.1 * jax.random.normal(kt2, (filters,), jnp.float32),
        "w3": 0.1 * jax.random.normal(kw3, (3, 3, filters, filters), jnp.float32),
        "b3": 0.1 * jax.random.normal(kb3, (filters,), jnp.float32),
        "gamma3": 1.0 + 0.1 * jax.random.normal(kg3, (filters,), jnp.float32),
        "beta3": 0.1 * jax.random.normal(kt3, (filters,), jnp.float32),
    }

    out = jax.block_until_ready(eleven_conv_block(x, params))
    ref = jax.block_until_ready(ref_forward(x, params))

    assert out.shape == (N, filters, H, W), out.shape
    max_err = float(jnp.max(jnp.abs(out - ref)))
    assert jnp.allclose(out, ref, atol=1e-3, rtol=1e-3), max_err

    print("KERNEL_OK")
</pallas_src>

<mosaic_0001>
module attributes {stable_mosaic.version = 11 : i64} {
  func.func @kernel(%arg0: i32, %arg1: memref<2x16x128xf32, #tpu.memory_space<vmem>>, %arg2: memref<3x144x128xf32, #tpu.memory_space<vmem>>, %arg3: memref<3x160x128xf32, #tpu.memory_space<vmem>>, %arg4: memref<3x160x128xf32, #tpu.memory_space<vmem>>, %arg5: memref<3x128xf32, #tpu.memory_space<vmem>>, %arg6: memref<3x128xf32, #tpu.memory_space<vmem>>, %arg7: memref<3x128xf32, #tpu.memory_space<vmem>>, %arg8: memref<2x16x128xf32, #tpu.memory_space<vmem>>, %arg9: memref<2x16x128xf32, #tpu.memory_space<vmem>>, %arg10: memref<18x144xf32, #tpu.memory_space<vmem>>, %arg11: memref<20x160xf32, #tpu.memory_space<vmem>>, %arg12: memref<1x128xf32, #tpu.memory_space<vmem>>, %arg13: memref<1x128xf32, #tpu.memory_space<vmem>>) attributes {dimension_semantics = [#tpu.dimension_semantics<arbitrary>], iteration_bounds = array<i64: 1>, scalar_prefetch = 0 : i64, scratch_operands = 5 : i64, tpu.core_type = #tpu.core_type<tc>, window_params = [{pipeline_mode = #tpu.pipeline_mode<synchronous>, transform_indices = @transform_0, window_bounds = array<i64: 2, 16, 128>}, {pipeline_mode = #tpu.pipeline_mode<synchronous>, transform_indices = @transform_1, window_bounds = array<i64: 3, 144, 128>}, {pipeline_mode = #tpu.pipeline_mode<synchronous>, transform_indices = @transform_2, window_bounds = array<i64: 3, 160, 128>}, {pipeline_mode = #tpu.pipeline_mode<synchronous>, transform_indices = @transform_3, window_bounds = array<i64: 3, 160, 128>}, {pipeline_mode = #tpu.pipeline_mode<synchronous>, transform_indices = @transform_4, window_bounds = array<i64: 3, 128>}, {pipeline_mode = #tpu.pipeline_mode<synchronous>, transform_indices = @transform_5, window_bounds = array<i64: 3, 128>}, {pipeline_mode = #tpu.pipeline_mode<synchronous>, transform_indices = @transform_6, window_bounds = array<i64: 3, 128>}, {pipeline_mode = #tpu.pipeline_mode<synchronous>, transform_indices = @transform_7, window_bounds = array<i64: 2, 16, 128>}]} {
    %cst = arith.constant 0.000000e+00 : f32
    %0 = vector.broadcast %cst : f32 to vector<18x144xf32>
    %c0 = arith.constant 0 : index
    %c0_0 = arith.constant 0 : index
    %1 = vector.load %arg10[%c0, %c0_0] : memref<18x144xf32, #tpu.memory_space<vmem>>, vector<18x144xf32>
    tpu.vector_store %arg10[%c0, %c0_0], %0 {strides = array<i32>} : memref<18x144xf32, #tpu.memory_space<vmem>>, vector<18x144xf32>,
    %cst_1 = arith.constant 0.000000e+00 : f32
    %2 = vector.broadcast %cst_1 : f32 to vector<20x160xf32>
    %c0_2 = arith.constant 0 : index
    %c0_3 = arith.constant 0 : index
    %3 = vector.load %arg11[%c0_2, %c0_3] : memref<20x160xf32, #tpu.memory_space<vmem>>, vector<20x160xf32>
    tpu.vector_store %arg11[%c0_2, %c0_3], %2 {strides = array<i32>} : memref<20x160xf32, #tpu.memory_space<vmem>>, vector<20x160xf32>,
    %c0_4 = arith.constant 0 : index
    %c0_5 = arith.constant 0 : index
    %4 = vector.load %arg5[%c0_4, %c0_5] : memref<3x128xf32, #tpu.memory_space<vmem>>, vector<1x128xf32>
    %cst_6 = arith.constant 0.000000e+00 : f32
    %5 = vector.broadcast %cst_6 : f32 to vector<1x128xf32>
    %c0_7 = arith.constant 0 : index
    %c0_8 = arith.constant 0 : index
    %6 = vector.load %arg12[%c0_7, %c0_8] : memref<1x128xf32, #tpu.memory_space<vmem>>, vector<1x128xf32>
    tpu.vector_store %arg12[%c0_7, %c0_8], %5 {strides = array<i32>} : memref<1x128xf32, #tpu.memory_space<vmem>>, vector<1x128xf32>,
    %cst_9 = arith.constant 0.000000e+00 : f32
    %7 = vector.broadcast %cst_9 : f32 to vector<1x128xf32>
    %c0_10 = arith.constant 0 : index
    %c0_11 = arith.constant 0 : index
    %8 = vector.load %arg13[%c0_10, %c0_11] : memref<1x128xf32, #tpu.memory_space<vmem>>, vector<1x128xf32>
    tpu.vector_store %arg13[%c0_10, %c0_11], %7 {strides = array<i32>} : memref<1x128xf32, #tpu.memory_space<vmem>>, vector<1x128xf32>,
    %c0_i32 = arith.constant 0 : i32
    %9 = arith.index_cast %c0_i32 : i32 to index
    %c0_12 = arith.constant 0 : index
    %c0_13 = arith.constant 0 : index
    %10 = vector.load %arg1[%9, %c0_12, %c0_13] : memref<2x16x128xf32, #tpu.memory_space<vmem>>, vector<1x16x128xf32>
    %11 = vector.shape_cast %10 : vector<1x16x128xf32> to vector<16x128xf32>
    %c1 = arith.constant 1 : index
    %c8 = arith.constant 8 : index
    %12 = vector.load %arg10[%c1, %c8] : memref<18x144xf32, #tpu.memory_space<vmem>>, vector<16x128xf32>
    tpu.vector_store %arg10[%c1, %c8], %11 {strides = array<i32>} : memref<18x144xf32, #tpu.memory_space<vmem>>, vector<16x128xf32>,
    %c0_14 = arith.constant 0 : index
    %c0_15 = arith.constant 0 : index
    %13 = vector.load %arg10[%c0_14, %c0_15] : memref<18x144xf32, #tpu.memory_space<vmem>>, vector<16x144xf32>
    %c0_16 = arith.constant 0 : index
    %c0_17 = arith.constant 0 : index
    %c0_18 = arith.constant 0 : index
    %14 = vector.load %arg2[%c0_16, %c0_17, %c0_18] : memref<3x144x128xf32, #tpu.memory_space<vmem>>, vector<1x144x128xf32>
    %15 = vector.shape_cast %14 : vector<1x144x128xf32> to vector<144x128xf32>
    %cst_19 = arith.constant dense<0.000000e+00> : vector<16x128xf32>
    %16 = tpu.matmul %13, %15, %cst_19 {dimension_numbers = #tpu.dot_dimension_numbers<[1], [0], [0], [1], [0, 0, 1, 1], [], []>} : vector<16x144xf32>, vector<144x128xf32>, vector<16x128xf32> -> vector<16x128xf32>
    %c1_20 = arith.constant 1 : index
    %c0_21 = arith.constant 0 : index
    %17 = vector.load %arg10[%c1_20, %c0_21] : memref<18x144xf32, #tpu.memory_space<vmem>>, vector<16x144xf32>
    %c1_22 = arith.constant 1 : index
    %c0_23 = arith.constant 0 : index
    %c0_24 = arith.constant 0 : index
    %18 = vector.load %arg2[%c1_22, %c0_23, %c0_24] : memref<3x144x128xf32, #tpu.memory_space<vmem>>, vector<1x144x128xf32>
    %19 = vector.shape_cast %18 : vector<1x144x128xf32> to vector<144x128xf32>
    %cst_25 = arith.constant dense<0.000000e+00> : vector<16x128xf32>
    %20 = tpu.matmul %17, %19, %cst_25 {dimension_numbers = #tpu.dot_dimension_numbers<[1], [0], [0], [1], [0, 0, 1, 1], [], []>} : vector<16x144xf32>, vector<144x128xf32>, vector<16x128xf32> -> vector<16x128xf32>
    %21 = arith.addf %16, %20 : vector<16x128xf32>
    %c2 = arith.constant 2 : index
    %c0_26 = arith.constant 0 : index
    %22 = vector.load %arg10[%c2, %c0_26] : memref<18x144xf32, #tpu.memory_space<vmem>>, vector<16x144xf32>
    %c2_27 = arith.constant 2 : index
    %c0_28 = arith.constant 0 : index
    %c0_29 = arith.constant 0 : index
    %23 = vector.load %arg2[%c2_27, %c0_28, %c0_29] : memref<3x144x128xf32, #tpu.memory_space<vmem>>, vector<1x144x128xf32>
    %24 = vector.shape_cast %23 : vector<1x144x128xf32> to vector<144x128xf32>
    %cst_30 = arith.constant dense<0.000000e+00> : vector<16x128xf32>
    %25 = tpu.matmul %22, %24, %cst_30 {dimension_numbers = #tpu.dot_dimension_numbers<[1], [0], [0], [1], [0, 0, 1, 1], [], []>} : vector<16x144xf32>, vector<144x128xf32>, vector<16x128xf32> -> vector<16x128xf32>
    %26 = arith.addf %21, %25 : vector<16x128xf32>
    %27 = vector.broadcast %4 : vector<1x128xf32> to vector<16x128xf32>
    %28 = arith.addf %26, %27 : vector<16x128xf32>
    %cst_31 = arith.constant 0.000000e+00 : f32
    %29 = vector.broadcast %cst_31 : f32 to vector<16x128xf32>
    %30 = arith.maximumf %28, %29 : vector<16x128xf32>
    %c0_32 = arith.constant 0 : index
    %c0_33 = arith.constant 0 : index
    %31 = vector.load %arg12[%c0_32, %c0_33] : memref<1x128xf32, #tpu.memory_space<vmem>>, vector<1x128xf32>
    %cst_34 = arith.constant dense<0.000000e+00> : vector<128xf32>
    %32 = vector.multi_reduction <add>, %30, %cst_34 [0] : vector<16x128xf32> to vector<128xf32>
    %33 = vector.shape_cast %32 : vector<128xf32> to vector<1x128xf32>
    %34 = arith.addf %31, %33 : vector<1x128xf32>
    %c0_35 = arith.constant 0 : index
    %c0_36 = arith.constant 0 : index
    %35 = vector.load %arg12[%c0_35, %c0_36] : memref<1x128xf32, #tpu.memory_space<vmem>>, vector<1x128xf32>
    tpu.vector_store %arg12[%c0_35, %c0_36], %34 {strides = array<i32>} : memref<1x128xf32, #tpu.memory_space<vmem>>, vector<1x128xf32>,
    %c0_37 = arith.constant 0 : index
    %c0_38 = arith.constant 0 : index
    %36 = vector.load %arg13[%c0_37, %c0_38] : memref<1x128xf32, #tpu.memory_space<vmem>>, vector<1x128xf32>
    %37 = arith.mulf %30, %30 : vector<16x128xf32>
    %cst_39 = arith.constant dense<0.000000e+00> : vector<128xf32>
    %38 = vector.multi_reduction <add>, %37, %cst_39 [0] : vector<16x128xf32> to vector<128xf32>
    %39 = vector.shape_cast %38 : vector<128xf32> to vector<1x128xf32>
    %40 = arith.addf %36, %39 : vector<1x128xf32>
    %c0_40 = arith.constant 0 : index
    %c0_41 = arith.constant 0 : index
    %41 = vector.load %arg13[%c0_40, %c0_41] : memref<1x128xf32, #tpu.memory_space<vmem>>, vector<1x128xf32>
    tpu.vector_store %arg13[%c0_40, %c0_41], %40 {strides = array<i32>} : memref<1x128xf32, #tpu.memory_space<vmem>>, vector<1x128xf32>,
    %42 = arith.index_cast %c0_i32 : i32 to index
    %c0_42 = arith.constant 0 : index
    %c0_43 = arith.constant 0 : index
    %43 = vector.load %arg9[%42, %c0_42, %c0_43] : memref<2x16x128xf32, #tpu.memory_space<vmem>>, vector<1x16x128xf32>
    %44 = vector.shape_cast %43 : vector<1x16x128xf32> to vector<16x128xf32>
    %45 = vector.shape_cast %30 : vector<16x128xf32> to vector<1x16x128xf32>
    tpu.vector_store %arg9[%42, %c0_42, %c0_43], %45 {strides = array<i32>} : memref<2x16x128xf32, #tpu.memory_space<vmem>>, vector<1x16x128xf32>,
    %c1_i32 = arith.constant 1 : i32
    %46 = arith.index_cast %c1_i32 : i32 to index
    %c0_44 = arith.constant 0 : index
    %c0_45 = arith.constant 0 : index
    %47 = vector.load %arg1[%46, %c0_44, %c0_45] : memref<2x16x128xf32, #tpu.memory_space<vmem>>, vector<1x16x128xf32>
    %48 = vector.shape_cast %47 : vector<1x16x128xf32> to vector<16x128xf32>
    %c1_46 = arith.constant 1 : index
    %c8_47 = arith.constant 8 : index
    %49 = vector.load %arg10[%c1_46, %c8_47] : memref<18x144xf32, #tpu.memory_space<vmem>>, vector<16x128xf32>
    tpu.vector_store %arg10[%c1_46, %c8_47], %48 {strides = array<i32>} : memref<18x144xf32, #tpu.memory_space<vmem>>, vector<16x128xf32>,
    %c0_48 = arith.constant 0 : index
    %c0_49 = arith.constant 0 : index
    %50 = vector.load %arg10[%c0_48, %c0_49] : memref<18x144xf32, #tpu.memory_space<vmem>>, vector<16x144xf32>
    %c0_50 = arith.constant 0 : index
    %c0_51 = arith.constant 0 : index
    %c0_52 = arith.constant 0 : index
    %51 = vector.load %arg2[%c0_50, %c0_51, %c0_52] : memref<3x144x128xf32, #tpu.memory_space<vmem>>, vector<1x144x128xf32>
    %52 = vector.shape_cast %51 : vector<1x144x128xf32> to vector<144x128xf32>
    %cst_53 = arith.constant dense<0.000000e+00> : vector<16x128xf32>
    %53 = tpu.matmul %50, %52, %cst_53 {dimension_numbers = #tpu.dot_dimension_numbers<[1], [0], [0], [1], [0, 0, 1, 1], [], []>} : vector<16x144xf32>, vector<144x128xf32>, vector<16x128xf32> -> vector<16x128xf32>
    %c1_54 = arith.constant 1 : index
    %c0_55 = arith.constant 0 : index
    %54 = vector.load %arg10[%c1_54, %c0_55] : memref<18x144xf32, #tpu.memory_space<vmem>>, vector<16x144xf32>
    %c1_56 = arith.constant 1 : index
    %c0_57 = arith.constant 0 : index
    %c0_58 = arith.constant 0 : index
    %55 = vector.load %arg2[%c1_56, %c0_57, %c0_58] : memref<3x144x128xf32, #tpu.memory_space<vmem>>, vector<1x144x128xf32>
    %56 = vector.shape_cast %55 : vector<1x144x128xf32> to vector<144x128xf32>
    %cst_59 = arith.constant dense<0.000000e+00> : vector<16x128xf32>
    %57 = tpu.matmul %54, %56, %cst_59 {dimension_numbers = #tpu.dot_dimension_numbers<[1], [0], [0], [1], [0, 0, 1, 1], [], []>} : vector<16x144xf32>, vector<144x128xf32>, vector<16x128xf32> -> vector<16x128xf32>
    %58 = arith.addf %53, %57 : vector<16x128xf32>
    %c2_60 = arith.constant 2 : index
    %c0_61 = arith.constant 0 : index
    %59 = vector.load %arg10[%c2_60, %c0_61] : memref<18x144xf32, #tpu.memory_space<vmem>>, vector<16x144xf32>
    %c2_62 = arith.constant 2 : index
    %c0_63 = arith.constant 0 : index
    %c0_64 = arith.constant 0 : index
    %60 = vector.load %arg2[%c2_62, %c0_63, %c0_64] : memref<3x144x128xf32, #tpu.memory_space<vmem>>, vector<1x144x128xf32>
    %61 = vector.shape_cast %60 : vector<1x144x128xf32> to vector<144x128xf32>
    %cst_65 = arith.constant dense<0.000000e+00> : vector<16x128xf32>
    %62 = tpu.matmul %59, %61, %cst_65 {dimension_numbers = #tpu.dot_dimension_numbers<[1], [0], [0], [1], [0, 0, 1, 1], [], []>} : vector<16x144xf32>, vector<144x128xf32>, vector<16x128xf32> -> vector<16x128xf32>
    %63 = arith.addf %58, %62 : vector<16x128xf32>
    %64 = vector.broadcast %4 : vector<1x128xf32> to vector<16x128xf32>
    %65 = arith.addf %63, %64 : vector<16x128xf32>
    %cst_66 = arith.constant 0.000000e+00 : f32
    %66 = vector.broadcast %cst_66 : f32 to vector<16x128xf32>
    %67 = arith.maximumf %65, %66 : vector<16x128xf32>
    %c0_67 = arith.constant 0 : index
    %c0_68 = arith.constant 0 : index
    %68 = vector.load %arg12[%c0_67, %c0_68] : memref<1x128xf32, #tpu.memory_space<vmem>>, vector<1x128xf32>
    %cst_69 = arith.constant dense<0.000000e+00> : vector<128xf32>
    %69 = vector.multi_reduction <add>, %67, %cst_69 [0] : vector<16x128xf32> to vector<128xf32>
    %70 = vector.shape_cast %69 : vector<128xf32> to vector<1x128xf32>
    %71 = arith.addf %68, %70 : vector<1x128xf32>
    %c0_70 = arith.constant 0 : index
    %c0_71 = arith.constant 0 : index
    %72 = vector.load %arg12[%c0_70, %c0_71] : memref<1x128xf32, #tpu.memory_space<vmem>>, vector<1x128xf32>
    tpu.vector_store %arg12[%c0_70, %c0_71], %71 {strides = array<i32>} : memref<1x128xf32, #tpu.memory_space<vmem>>, vector<1x128xf32>,
    %c0_72 = arith.constant 0 : index
    %c0_73 = arith.constant 0 : index
    %73 = vector.load %arg13[%c0_72, %c0_73] : memref<1x128xf32, #tpu.memory_space<vmem>>, vector<1x128xf32>
    %74 = arith.mulf %67, %67 : vector<16x128xf32>
    %cst_74 = arith.constant dense<0.000000e+00> : vector<128xf32>
    %75 = vector.multi_reduction <add>, %74, %cst_74 [0] : vector<16x128xf32> to vector<128xf32>
    %76 = vector.shape_cast %75 : vector<128xf32> to vector<1x128xf32>
    %77 = arith.addf %73, %76 : vector<1x128xf32>
    %c0_75 = arith.constant 0 : index
    %c0_76 = arith.constant 0 : index
    %78 = vector.load %arg13[%c0_75, %c0_76] : memref<1x128xf32, #tpu.memory_space<vmem>>, vector<1x128xf32>
    tpu.vector_store %arg13[%c0_75, %c0_76], %77 {strides = array<i32>} : memref<1x128xf32, #tpu.memory_space<vmem>>, vector<1x128xf32>,
    %79 = arith.index_cast %c1_i32 : i32 to index
    %c0_77 = arith.constant 0 : index
    %c0_78 = arith.constant 0 : index
    %80 = vector.load %arg9[%79, %c0_77, %c0_78] : memref<2x16x128xf32, #tpu.memory_space<vmem>>, vector<1x16x128xf32>
    %81 = vector.shape_cast %80 : vector<1x16x128xf32> to vector<16x128xf32>
    %82 = vector.shape_cast %67 : vector<16x128xf32> to vector<1x16x128xf32>
    tpu.vector_store %arg9[%79, %c0_77, %c0_78], %82 {strides = array<i32>} : memref<2x16x128xf32, #tpu.memory_space<vmem>>, vector<1x16x128xf32>,
    %c2_i32 = arith.constant 2 : i32
    %c0_79 = arith.constant 0 : index
    %c0_80 = arith.constant 0 : index
    %83 = vector.load %arg6[%c0_79, %c0_80] : memref<3x128xf32, #tpu.memory_space<vmem>>, vector<1x128xf32>
    %c0_81 = arith.constant 0 : index
    %c0_82 = arith.constant 0 : index
    %84 = vector.load %arg7[%c0_81, %c0_82] : memref<3x128xf32, #tpu.memory_space<vmem>>, vector<1x128xf32>
    %c0_83 = arith.constant 0 : index
    %c0_84 = arith.constant 0 : index
    %85 = vector.load %arg12[%c0_83, %c0_84] : memref<1x128xf32, #tpu.memory_space<vmem>>, vector<1x128xf32>
    %c0_85 = arith.constant 0 : index
    %c0_86 = arith.constant 0 : index
    %86 = vector.load %arg13[%c0_85, %c0_86] : memref<1x128xf32, #tpu.memory_space<vmem>>, vector<1x128xf32>
    %cst_87 = arith.constant 0.000000e+00 : f32
    %87 = vector.broadcast %cst_87 : f32 to vector<1x8xf32>
    %cst_88 = arith.constant 0.000000e+00 : f32
    %88 = vector.broadcast %cst_88 : f32 to vector<1x8xf32>
    %89 = vector.extract_strided_slice %85 {offsets = [0, 0], sizes = [1, 8], strides = [1, 1]} : vector<1x128xf32> to vector<1x8xf32>
    %90 = arith.addf %87, %89 : vector<1x8xf32>
    %91 = vector.extract_strided_slice %86 {offsets = [0, 0], sizes = [1, 8], strides = [1, 1]} : vector<1x128xf32> to vector<1x8xf32>
    %92 = arith.addf %88, %91 : vector<1x8xf32>
    %93 = vector.extract_strided_slice %85 {offsets = [0, 8], sizes = [1, 8], strides = [1, 1]} : vector<1x128xf32> to vector<1x8xf32>
    %94 = arith.addf %90, %93 : vector<1x8xf32>
    %95 = vector.extract_strided_slice %86 {offsets = [0, 8], sizes = [1, 8], strides = [1, 1]} : vector<1x128xf32> to vector<1x8xf32>
    %96 = arith.addf %92, %95 : vector<1x8xf32>
    %97 = vector.extract_strided_slice %85 {offsets = [0, 16], sizes = [1, 8], strides = [1, 1]} : vector<1x128xf32> to vector<1x8xf32>
    %98 = arith.addf %94, %97 : vector<1x8xf32>
    %99 = vector.extract_strided_slice %86 {offsets = [0, 16], sizes = [1, 8], strides = [1, 1]} : vector<1x128xf32> to vector<1x8xf32>
    %100 = arith.addf %96, %99 : vector<1x8xf32>
    %101 = vector.extract_strided_slice %85 {offsets = [0, 24], sizes = [1, 8], strides = [1, 1]} : vector<1x128xf32> to vector<1x8xf32>
    %102 = arith.addf %98, %101 : vector<1x8xf32>
    %103 = vector.extract_strided_slice %86 {offsets = [0, 24], sizes = [1, 8], strides = [1, 1]} : vector<1x128xf32> to vector<1x8xf32>
    %104 = arith.addf %100, %103 : vector<1x8xf32>
    %105 = vector.extract_strided_slice %85 {offsets = [0, 32], sizes = [1, 8], strides = [1, 1]} : vector<1x128xf32> to vector<1x8xf32>
    %106 = arith.addf %102, %105 : vector<1x8xf32>
    %107 = vector.extract_strided_slice %86 {offsets = [0, 32], sizes = [1, 8], strides = [1, 1]} : vector<1x128xf32> to vector<1x8xf32>
    %108 = arith.addf %104, %107 : vector<1x8xf32>
    %109 = vector.extract_strided_slice %85 {offsets = [0, 40], sizes = [1, 8], strides = [1, 1]} : vector<1x128xf32> to vector<1x8xf32>
    %110 = arith.addf %106, %109 : vector<1x8xf32>
    %111 = vector.extract_strided_slice %86 {offsets = [0, 40], sizes = [1, 8], strides = [1, 1]} : vector<1x128xf32> to vector<1x8xf32>
    %112 = arith.addf %108, %111 : vector<1x8xf32>
    %113 = vector.extract_strided_slice %85 {offsets = [0, 48], sizes = [1, 8], strides = [1, 1]} : vector<1x128xf32> to vector<1x8xf32>
    %114 = arith.addf %110, %113 : vector<1x8xf32>
    %115 = vector.extract_strided_slice %86 {offsets = [0, 48], sizes = [1, 8], strides = [1, 1]} : vector<1x128xf32> to vector<1x8xf32>
    %116 = arith.addf %112, %115 : vector<1x8xf32>
    %117 = vector.extract_strided_slice %85 {offsets = [0, 56], sizes = [1, 8], strides = [1, 1]} : vector<1x128xf32> to vector<1x8xf32>
    %118 = arith.addf %114, %117 : vector<1x8xf32>
    %119 = vector.extract_strided_slice %86 {offsets = [0, 56], sizes = [1, 8], strides = [1, 1]} : vector<1x128xf32> to vector<1x8xf32>
    %120 = arith.addf %116, %119 : vector<1x8xf32>
    %121 = vector.extract_strided_slice %85 {offsets = [0, 64], sizes = [1, 8], strides = [1, 1]} : vector<1x128xf32> to vector<1x8xf32>
    %122 = arith.addf %118, %121 : vector<1x8xf32>
    %123 = vector.extract_strided_slice %86 {offsets = [0, 64], sizes = [1, 8], strides = [1, 1]} : vector<1x128xf32> to vector<1x8xf32>
    %124 = arith.addf %120, %123 : vector<1x8xf32>
    %125 = vector.extract_strided_slice %85 {offsets = [0, 72], sizes = [1, 8], strides = [1, 1]} : vector<1x128xf32> to vector<1x8xf32>
    %126 = arith.addf %122, %125 : vector<1x8xf32>
    %127 = vector.extract_strided_slice %86 {offsets = [0, 72], sizes = [1, 8], strides = [1, 1]} : vector<1x128xf32> to vector<1x8xf32>
    %128 = arith.addf %124, %127 : vector<1x8xf32>
    %129 = vector.extract_strided_slice %85 {offsets = [0, 80], sizes = [1, 8], strides = [1, 1]} : vector<1x128xf32> to vector<1x8xf32>
    %130 = arith.addf %126, %129 : vector<1x8xf32>
    %131 = vector.extract_strided_slice %86 {offsets = [0, 80], sizes = [1, 8], strides = [1, 1]} : vector<1x128xf32> to vector<1x8xf32>
    %132 = arith.addf %128, %131 : vector<1x8xf32>
    %133 = vector.extract_strided_slice %85 {offsets = [0, 88], sizes = [1, 8], strides = [1, 1]} : vector<1x128xf32> to vector<1x8xf32>
    %134 = arith.addf %130, %133 : vector<1x8xf32>
    %135 = vector.extract_strided_slice %86 {offsets = [0, 88], sizes = [1, 8], strides = [1, 1]} : vector<1x128xf32> to vector<1x8xf32>
    %136 = arith.addf %132, %135 : vector<1x8xf32>
    %137 = vector.extract_strided_slice %85 {offsets = [0, 96], sizes = [1, 8], strides = [1, 1]} : vector<1x128xf32> to vector<1x8xf32>
    %138 = arith.addf %134, %137 : vector<1x8xf32>
    %139 = vector.extract_strided_slice %86 {offsets = [0, 96], sizes = [1, 8], strides = [1, 1]} : vector<1x128xf32> to vector<1x8xf32>
    %140 = arith.addf %136, %139 : vector<1x8xf32>
    %141 = vector.extract_strided_slice %85 {offsets = [0, 104], sizes = [1, 8], strides = [1, 1]} : vector<1x128xf32> to vector<1x8xf32>
    %142 = arith.addf %138, %141 : vector<1x8xf32>
    %143 = vector.extract_strided_slice %86 {offsets = [0, 104], sizes = [1, 8], strides = [1, 1]} : vector<1x128xf32> to vector<1x8xf32>
    %144 = arith.addf %140, %143 : vector<1x8xf32>
    %145 = vector.extract_strided_slice %85 {offsets = [0, 112], sizes = [1, 8], strides = [1, 1]} : vector<1x128xf32> to vector<1x8xf32>
    %146 = arith.addf %142, %145 : vector<1x8xf32>
    %147 = vector.extract_strided_slice %86 {offsets = [0, 112], sizes = [1, 8], strides = [1, 1]} : vector<1x128xf32> to vector<1x8xf32>
    %148 = arith.addf %144, %147 : vector<1x8xf32>
    %149 = vector.extract_strided_slice %85 {offsets = [0, 120], sizes = [1, 8], strides = [1, 1]} : vector<1x128xf32> to vector<1x8xf32>
    %150 = arith.addf %146, %149 : vector<1x8xf32>
    %151 = vector.extract_strided_slice %86 {offsets = [0, 120], sizes = [1, 8], strides = [1, 1]} : vector<1x128xf32> to vector<1x8xf32>
    %152 = arith.addf %148, %151 : vector<1x8xf32>
    %cst_89 = arith.constant 0.001953125 : f32
    %153 = vector.broadcast %cst_89 : f32 to vector<1x8xf32>
    %154 = arith.mulf %150, %153 : vector<1x8xf32>
    %cst_90 = arith.constant 0.001953125 : f32
    %155 = vector.broadcast %cst_90 : f32 to vector<1x8xf32>
    %156 = arith.mulf %152, %155 : vector<1x8xf32>
    %157 = arith.mulf %154, %154 : vector<1x8xf32>
    %158 = arith.subf %156, %157 : vector<1x8xf32>
    %cst_91 = arith.constant 0.000000e+00 : f32
    %159 = vector.broadcast %cst_91 : f32 to vector<1x8xf32>
    %160 = arith.maximumf %158, %159 : vector<1x8xf32>
    %cst_92 = arith.constant 9.99999974E-6 : f32
    %161 = vector.broadcast %cst_92 : f32 to vector<1x8xf32>
    %162 = arith.addf %160, %161 : vector<1x8xf32>
    %163 = math.rsqrt %162 : vector<1x8xf32>
    %c0_93 = arith.constant 0 : index
    %c0_94 = arith.constant 0 : index
    %164 = vector.load %arg12[%c0_93, %c0_94] : memref<1x128xf32, #tpu.memory_space<vmem>>, vector<1x8xf32>
    tpu.vector_store %arg12[%c0_93, %c0_94], %154 {strides = array<i32>} : memref<1x128xf32, #tpu.memory_space<vmem>>, vector<1x8xf32>,
    %c0_95 = arith.constant 0 : index
    %c0_96 = arith.constant 0 : index
    %165 = vector.load %arg13[%c0_95, %c0_96] : memref<1x128xf32, #tpu.memory_space<vmem>>, vector<1x8xf32>
    tpu.vector_store %arg13[%c0_95, %c0_96], %163 {strides = array<i32>} : memref<1x128xf32, #tpu.memory_space<vmem>>, vector<1x8xf32>,
    %c0_97 = arith.constant 0 : index
    %c8_98 = arith.constant 8 : index
    %166 = vector.load %arg12[%c0_97, %c8_98] : memref<1x128xf32, #tpu.memory_space<vmem>>, vector<1x8xf32>
    tpu.vector_store %arg12[%c0_97, %c8_98], %154 {strides = array<i32>} : memref<1x128xf32, #tpu.memory_space<vmem>>, vector<1x8xf32>,
    %c0_99 = arith.constant 0 : index
    %c8_100 = arith.constant 8 : index
    %167 = vector.load %arg13[%c0_99, %c8_100] : memref<1x128xf32, #tpu.memory_space<vmem>>, vector<1x8xf32>
    tpu.vector_store %arg13[%c0_99, %c8_100], %163 {strides = array<i32>} : memref<1x128xf32, #tpu.memory_space<vmem>>, vector<1x8xf32>,
    %c0_101 = arith.constant 0 : index
    %c16 = arith.constant 16 : index
    %168 = vector.load %arg12[%c0_101, %c16] : memref<1x128xf32, #tpu.memory_space<vmem>>, vector<1x8xf32>
    tpu.vector_store %arg12[%c0_101, %c16], %154 {strides = array<i32>} : memref<1x128xf32, #tpu.memory_space<vmem>>, vector<1x8xf32>,
    %c0_102 = arith.constant 0 : index
    %c16_103 = arith.constant 16 : index
    %169 = vector.load %arg13[%c0_102, %c16_103] : memref<1x128xf32, #tpu.memory_space<vmem>>, vector<1x8xf32>
    tpu.vector_store %arg13[%c0_102, %c16_103], %163 {strides = array<i32>} : memref<1x128xf32, #tpu.memory_space<vmem>>, vector<1x8xf32>,
    %c0_104 = arith.constant 0 : index
    %c24 = arith.constant 24 : index
    %170 = vector.load %arg12[%c0_104, %c24] : memref<1x128xf32, #tpu.memory_space<vmem>>, vector<1x8xf32>
    tpu.vector_store %arg12[%c0_104, %c24], %154 {strides = array<i32>} : memref<1x128xf32, #tpu.memory_space<vmem>>, vector<1x8xf32>,
    %c0_105 = arith.constant 0 : index
    %c24_106 = arith.constant 24 : index
    %171 = vector.load %arg13[%c0_105, %c24_106] : memref<1x128xf32, #tpu.memory_space<vmem>>, vector<1x8xf32>
    tpu.vector_store %arg13[%c0_105, %c24_106], %163 {strides = array<i32>} : memref<1x128xf32, #tpu.memory_space<vmem>>, vector<1x8xf32>,
    %c0_107 = arith.constant 0 : index
    %c32 = arith.constant 32 : index
    %172 = vector.load %arg12[%c0_107, %c32] : memref<1x128xf32, #tpu.memory_space<vmem>>, vector<1x8xf32>
    tpu.vector_store %arg12[%c0_107, %c32], %154 {strides = array<i32>} : memref<1x128xf32, #tpu.memory_space<vmem>>, vector<1x8xf32>,
    %c0_108 = arith.constant 0 : index
    %c32_109 = arith.constant 32 : index
    %173 = vector.load %arg13[%c0_108, %c32_109] : memref<1x128xf32, #tpu.memory_space<vmem>>, vector<1x8xf32>
    tpu.vector_store %arg13[%c0_108, %c32_109], %163 {strides = array<i32>} : memref<1x128xf32, #tpu.memory_space<vmem>>, vector<1x8xf32>,
    %c0_110 = arith.constant 0 : index
    %c40 = arith.constant 40 : index
    %174 = vector.load %arg12[%c0_110, %c40] : memref<1x128xf32, #tpu.memory_space<vmem>>, vector<1x8xf32>
    tpu.vector_store %arg12[%c0_110, %c40], %154 {strides = array<i32>} : memref<1x128xf32, #tpu.memory_space<vmem>>, vector<1x8xf32>,
    %c0_111 = arith.constant 0 : index
    %c40_112 = arith.constant 40 : index
    %175 = vector.load %arg13[%c0_111, %c40_112] : memref<1x128xf32, #tpu.memory_space<vmem>>, vector<1x8xf32>
    tpu.vector_store %arg13[%c0_111, %c40_112], %163 {strides = array<i32>} : memref<1x128xf32, #tpu.memory_space<vmem>>, vector<1x8xf32>,
    %c0_113 = arith.constant 0 : index
    %c48 = arith.constant 48 : index
    %176 = vector.load %arg12[%c0_113, %c48] : memref<1x128xf32, #tpu.memory_space<vmem>>, vector<1x8xf32>
    tpu.vector_store %arg12[%c0_113, %c48], %154 {strides = array<i32>} : memref<1x128xf32, #tpu.memory_space<vmem>>, vector<1x8xf32>,
    %c0_114 = arith.constant 0 : index
    %c48_115 = arith.constant 48 : index
    %177 = vector.load %arg13[%c0_114, %c48_115] : memref<1x128xf32, #tpu.memory_space<vmem>>, vector<1x8xf32>
    tpu.vector_store %arg13[%c0_114, %c48_115], %163 {strides = array<i32>} : memref<1x128xf32, #tpu.memory_space<vmem>>, vector<1x8xf32>,
    %c0_116 = arith.constant 0 : index
    %c56 = arith.constant 56 : index
    %178 = vector.load %arg12[%c0_116, %c56] : memref<1x128xf32, #tpu.memory_space<vmem>>, vector<1x8xf32>
    tpu.vector_store %arg12[%c0_116, %c56], %154 {strides = array<i32>} : memref<1x128xf32, #tpu.memory_space<vmem>>, vector<1x8xf32>,
    %c0_117 = arith.constant 0 : index
    %c56_118 = arith.constant 56 : index
    %179 = vector.load %arg13[%c0_117, %c56_118] : memref<1x128xf32, #tpu.memory_space<vmem>>, vector<1x8xf32>
    tpu.vector_store %arg13[%c0_117, %c56_118], %163 {strides = array<i32>} : memref<1x128xf32, #tpu.memory_space<vmem>>, vector<1x8xf32>,
    %c0_119 = arith.constant 0 : index
    %c64 = arith.constant 64 : index
    %180 = vector.load %arg12[%c0_119, %c64] : memref<1x128xf32, #tpu.memory_space<vmem>>, vector<1x8xf32>
    tpu.vector_store %arg12[%c0_119, %c64], %154 {strides = array<i32>} : memref<1x128xf32, #tpu.memory_space<vmem>>, vector<1x8xf32>,
    %c0_120 = arith.constant 0 : index
    %c64_121 = arith.constant 64 : index
    %181 = vector.load %arg13[%c0_120, %c64_121] : memref<1x128xf32, #tpu.memory_space<vmem>>, vector<1x8xf32>
    tpu.vector_store %arg13[%c0_120, %c64_121], %163 {strides = array<i32>} : memref<1x128xf32, #tpu.memory_space<vmem>>, vector<1x8xf32>,
    %c0_122 = arith.constant 0 : index
    %c72 = arith.constant 72 : index
    %182 = vector.load %arg12[%c0_122, %c72] : memref<1x128xf32, #tpu.memory_space<vmem>>, vector<1x8xf32>
    tpu.vector_store %arg12[%c0_122, %c72], %154 {strides = array<i32>} : memref<1x128xf32, #tpu.memory_space<vmem>>, vector<1x8xf32>,
    %c0_123 = arith.constant 0 : index
    %c72_124 = arith.constant 72 : index
    %183 = vector.load %arg13[%c0_123, %c72_124] : memref<1x128xf32, #tpu.memory_space<vmem>>, vector<1x8xf32>
    tpu.vector_store %arg13[%c0_123, %c72_124], %163 {strides = array<i32>} : memref<1x128xf32, #tpu.memory_space<vmem>>, vector<1x8xf32>,
    %c0_125 = arith.constant 0 : index
    %c80 = arith.constant 80 : index
    %184 = vector.load %arg12[%c0_125, %c80] : memref<1x128xf32, #tpu.memory_space<vmem>>, vector<1x8xf32>
    tpu.vector_store %arg12[%c0_125, %c80], %154 {strides = array<i32>} : memref<1x128xf32, #tpu.memory_space<vmem>>, vector<1x8xf32>,
    %c0_126 = arith.constant 0 : index
    %c80_127 = arith.constant 80 : index
    %185 = vector.load %arg13[%c0_126, %c80_127] : memref<1x128xf32, #tpu.memory_space<vmem>>, vector<1x8xf32>
    tpu.vector_store %arg13[%c0_126, %c80_127], %163 {strides = array<i32>} : memref<1x128xf32, #tpu.memory_space<vmem>>, vector<1x8xf32>,
    %c0_128 = arith.constant 0 : index
    %c88 = arith.constant 88 : index
    %186 = vector.load %arg12[%c0_128, %c88] : memref<1x128xf32, #tpu.memory_space<vmem>>, vector<1x8xf32>
    tpu.vector_store %arg12[%c0_128, %c88], %154 {strides = array<i32>} : memref<1x128xf32, #tpu.memory_space<vmem>>, vector<1x8xf32>,
    %c0_129 = arith.constant 0 : index
    %c88_130 = arith.constant 88 : index
    %187 = vector.load %arg13[%c0_129, %c88_130] : memref<1x128xf32, #tpu.memory_space<vmem>>, vector<1x8xf32>
    tpu.vector_store %arg13[%c0_129, %c88_130], %163 {strides = array<i32>} : memref<1x128xf32, #tpu.memory_space<vmem>>, vector<1x8xf32>,
    %c0_131 = arith.constant 0 : index
    %c96 = arith.constant 96 : index
    %188 = vector.load %arg12[%c0_131, %c96] : memref<1x128xf32, #tpu.memory_space<vmem>>, vector<1x8xf32>
    tpu.vector_store %arg12[%c0_131, %c96], %154 {strides = array<i32>} : memref<1x128xf32, #tpu.memory_space<vmem>>, vector<1x8xf32>,
    %c0_132 = arith.constant 0 : index
    %c96_133 = arith.constant 96 : index
    %189 = vector.load %arg13[%c0_132, %c96_133] : memref<1x128xf32, #tpu.memory_space<vmem>>, vector<1x8xf32>
    tpu.vector_store %arg13[%c0_132, %c96_133], %163 {strides = array<i32>} : memref<1x128xf32, #tpu.memory_space<vmem>>, vector<1x8xf32>,
    %c0_134 = arith.constant 0 : index
    %c104 = arith.constant 104 : index
    %190 = vector.load %arg12[%c0_134, %c104] : memref<1x128xf32, #tpu.memory_space<vmem>>, vector<1x8xf32>
    tpu.vector_store %arg12[%c0_134, %c104], %154 {strides = array<i32>} : memref<1x128xf32, #tpu.memory_space<vmem>>, vector<1x8xf32>,
    %c0_135 = arith.constant 0 : index
    %c104_136 = arith.constant 104 : index
    %191 = vector.load %arg13[%c0_135, %c104_136] : memref<1x128xf32, #tpu.memory_space<vmem>>, vector<1x8xf32>
    tpu.vector_store %arg13[%c0_135, %c104_136], %163 {strides = array<i32>} : memref<1x128xf32, #tpu.memory_space<vmem>>, vector<1x8xf32>,
    %c0_137 = arith.constant 0 : index
    %c112 = arith.constant 112 : index
    %192 = vector.load %arg12[%c0_137, %c112] : memref<1x128xf32, #tpu.memory_space<vmem>>, vector<1x8xf32>
    tpu.vector_store %arg12[%c0_137, %c112], %154 {strides = array<i32>} : memref<1x128xf32, #tpu.memory_space<vmem>>, vector<1x8xf32>,
    %c0_138 = arith.constant 0 : index
    %c112_139 = arith.constant 112 : index
    %193 = vector.load %arg13[%c0_138, %c112_139] : memref<1x128xf32, #tpu.memory_space<vmem>>, vector<1x8xf32>
    tpu.vector_store %arg13[%c0_138, %c112_139], %163 {strides = array<i32>} : memref<1x128xf32, #tpu.memory_space<vmem>>, vector<1x8xf32>,
    %c0_140 = arith.constant 0 : index
    %c120 = arith.constant 120 : index
    %194 = vector.load %arg12[%c0_140, %c120] : memref<1x128xf32, #tpu.memory_space<vmem>>, vector<1x8xf32>
    tpu.vector_store %arg12[%c0_140, %c120], %154 {strides = array<i32>} : memref<1x128xf32, #tpu.memory_space<vmem>>, vector<1x8xf32>,
    %c0_141 = arith.constant 0 : index
    %c120_142 = arith.constant 120 : index
    %195 = vector.load %arg13[%c0_141, %c120_142] : memref<1x128xf32, #tpu.memory_space<vmem>>, vector<1x8xf32>
    tpu.vector_store %arg13[%c0_141, %c120_142], %163 {strides = array<i32>} : memref<1x128xf32, #tpu.memory_space<vmem>>, vector<1x8xf32>,
    %c0_143 = arith.constant 0 : index
    %c0_144 = arith.constant 0 : index
    %196 = vector.load %arg13[%c0_143, %c0_144] : memref<1x128xf32, #tpu.memory_space<vmem>>, vector<1x128xf32>
    %197 = arith.mulf %83, %196 : vector<1x128xf32>
    %c0_145 = arith.constant 0 : index
    %c0_146 = arith.constant 0 : index
    %198 = vector.load %arg12[%c0_145, %c0_146] : memref<1x128xf32, #tpu.memory_space<vmem>>, vector<1x128xf32>
    %199 = arith.mulf %198, %197 : vector<1x128xf32>
    %200 = arith.subf %84, %199 : vector<1x128xf32>
    %c1_147 = arith.constant 1 : index
    %c0_148 = arith.constant 0 : index
    %201 = vector.load %arg5[%c1_147, %c0_148] : memref<3x128xf32, #tpu.memory_space<vmem>>, vector<1x128xf32>
    %cst_149 = arith.constant 0.000000e+00 : f32
    %202 = vector.broadcast %cst_149 : f32 to vector<1x128xf32>
    %c0_150 = arith.constant 0 : index
    %c0_151 = arith.constant 0 : index
    %203 = vector.load %arg12[%c0_150, %c0_151] : memref<1x128xf32, #tpu.memory_space<vmem>>, vector<1x128xf32>
    tpu.vector_store %arg12[%c0_150, %c0_151], %202 {strides = array<i32>} : memref<1x128xf32, #tpu.memory_space<vmem>>, vector<1x128xf32>,
    %cst_152 = arith.constant 0.000000e+00 : f32
    %204 = vector.broadcast %cst_152 : f32 to vector<1x128xf32>
    %c0_153 = arith.constant 0 : index
    %c0_154 = arith.constant 0 : index
    %205 = vector.load %arg13[%c0_153, %c0_154] : memref<1x128xf32, #tpu.memory_space<vmem>>, vector<1x128xf32>
    tpu.vector_store %arg13[%c0_153, %c0_154], %204 {strides = array<i32>} : memref<1x128xf32, #tpu.memory_space<vmem>>, vector<1x128xf32>,
    %c0_i32_155 = arith.constant 0 : i32
    %206 = arith.index_cast %c0_i32_155 : i32 to index
    %c0_156 = arith.constant 0 : index
    %c0_157 = arith.constant 0 : index
    %207 = vector.load %arg9[%206, %c0_156, %c0_157] : memref<2x16x128xf32, #tpu.memory_space<vmem>>, vector<1x16x128xf32>
    %208 = vector.shape_cast %207 : vector<1x16x128xf32> to vector<16x128xf32>
    %209 = vector.broadcast %197 : vector<1x128xf32> to vector<16x128xf32>
    %210 = arith.mulf %208, %209 : vector<16x128xf32>
    %211 = vector.broadcast %200 : vector<1x128xf32> to vector<16x128xf32>
    %212 = arith.addf %210, %211 : vector<16x128xf32>
    %c2_158 = arith.constant 2 : index
    %c16_159 = arith.constant 16 : index
    %213 = vector.load %arg11[%c2_158, %c16_159] : memref<20x160xf32, #tpu.memory_space<vmem>>, vector<16x128xf32>
    tpu.vector_store %arg11[%c2_158, %c16_159], %212 {strides = array<i32>} : memref<20x160xf32, #tpu.memory_space<vmem>>, vector<16x128xf32>,
    %c0_160 = arith.constant 0 : index
    %c0_161 = arith.constant 0 : index
    %214 = vector.load %arg11[%c0_160, %c0_161] : memref<20x160xf32, #tpu.memory_space<vmem>>, vector<16x160xf32>
    %c0_162 = arith.constant 0 : index
    %c0_163 = arith.constant 0 : index
    %c0_164 = arith.constant 0 : index
    %215 = vector.load %arg3[%c0_162, %c0_163, %c0_164] : memref<3x160x128xf32, #tpu.memory_space<vmem>>, vector<1x160x128xf32>
    %216 = vector.shape_cast %215 : vector<1x160x128xf32> to vector<160x128xf32>
    %cst_165 = arith.constant dense<0.000000e+00> : vector<16x128xf32>
    %217 = tpu.matmul %214, %216, %cst_165 {dimension_numbers = #tpu.dot_dimension_numbers<[1], [0], [0], [1], [0, 0, 1, 1], [], []>} : vector<16x160xf32>, vector<160x128xf32>, vector<16x128xf32> -> vector<16x128xf32>
    %c2_166 = arith.constant 2 : index
    %c0_167 = arith.constant 0 : index
    %218 = vector.load %arg11[%c2_166, %c0_167] : memref<20x160xf32, #tpu.memory_space<vmem>>, vector<16x160xf32>
    %c1_168 = arith.constant 1 : index
    %c0_169 = arith.constant 0 : index
    %c0_170 = arith.constant 0 : index
    %219 = vector.load %arg3[%c1_168, %c0_169, %c0_170] : memref<3x160x128xf32, #tpu.memory_space<vmem>>, vector<1x160x128xf32>
    %220 = vector.shape_cast %219 : vector<1x160x128xf32> to vector<160x128xf32>
    %cst_171 = arith.constant dense<0.000000e+00> : vector<16x128xf32>
    %221 = tpu.matmul %218, %220, %cst_171 {dimension_numbers = #tpu.dot_dimension_numbers<[1], [0], [0], [1], [0, 0, 1, 1], [], []>} : vector<16x160xf32>, vector<160x128xf32>, vector<16x128xf32> -> vector<16x128xf32>
    %222 = arith.addf %217, %221 : vector<16x128xf32>
    %c4 = arith.constant 4 : index
    %c0_172 = arith.constant 0 : index
    %223 = vector.load %arg11[%c4, %c0_172] : memref<20x160xf32, #tpu.memory_space<vmem>>, vector<16x160xf32>
    %c2_173 = arith.constant 2 : index
    %c0_174 = arith.constant 0 : index
    %c0_175 = arith.constant 0 : index
    %224 = vector.load %arg3[%c2_173, %c0_174, %c0_175] : memref<3x160x128xf32, #tpu.memory_space<vmem>>, vector<1x160x128xf32>
    %225 = vector.shape_cast %224 : vector<1x160x128xf32> to vector<160x128xf32>
    %cst_176 = arith.constant dense<0.000000e+00> : vector<16x128xf32>
    %226 = tpu.matmul %223, %225, %cst_176 {dimension_numbers = #tpu.dot_dimension_numbers<[1], [0], [0], [1], [0, 0, 1, 1], [], []>} : vector<16x160xf32>, vector<160x128xf32>, vector<16x128xf32> -> vector<16x128xf32>
    %227 = arith.addf %222, %226 : vector<16x128xf32>
    %228 = vector.broadcast %201 : vector<1x128xf32> to vector<16x128xf32>
    %229 = arith.addf %227, %228 : vector<16x128xf32>
    %cst_177 = arith.constant 0.000000e+00 : f32
    %230 = vector.broadcast %cst_177 : f32 to vector<16x128xf32>
    %231 = arith.maximumf %229, %230 : vector<16x128xf32>
    %c0_178 = arith.constant 0 : index
    %c0_179 = arith.constant 0 : index
    %232 = vector.load %arg12[%c0_178, %c0_179] : memref<1x128xf32, #tpu.memory_space<vmem>>, vector<1x128xf32>
    %cst_180 = arith.constant dense<0.000000e+00> : vector<128xf32>
    %233 = vector.multi_reduction <add>, %231, %cst_180 [0] : vector<16x128xf32> to vector<128xf32>
    %234 = vector.shape_cast %233 : vector<128xf32> to vector<1x128xf32>
    %235 = arith.addf %232, %234 : vector<1x128xf32>
    %c0_181 = arith.constant 0 : index
    %c0_182 = arith.constant 0 : index
    %236 = vector.load %arg12[%c0_181, %c0_182] : memref<1x128xf32, #tpu.memory_space<vmem>>, vector<1x128xf32>
    tpu.vector_store %arg12[%c0_181, %c0_182], %235 {strides = array<i32>} : memref<1x128xf32, #tpu.memory_space<vmem>>, vector<1x128xf32>,
    %c0_183 = arith.constant 0 : index
    %c0_184 = arith.constant 0 : index
    %237 = vector.load %arg13[%c0_183, %c0_184] : memref<1x128xf32, #tpu.memory_space<vmem>>, vector<1x128xf32>
    %238 = arith.mulf %231, %231 : vector<16x128xf32>
    %cst_185 = arith.constant dense<0.000000e+00> : vector<128xf32>
    %239 = vector.multi_reduction <add>, %238, %cst_185 [0] : vector<16x128xf32> to vector<128xf32>
    %240 = vector.shape_cast %239 : vector<128xf32> to vector<1x128xf32>
    %241 = arith.addf %237, %240 : vector<1x128xf32>
    %c0_186 = arith.constant 0 : index
    %c0_187 = arith.constant 0 : index
    %242 = vector.load %arg13[%c0_186, %c0_187] : memref<1x128xf32, #tpu.memory_space<vmem>>, vector<1x128xf32>
    tpu.vector_store %arg13[%c0_186, %c0_187], %241 {strides = array<i32>} : memref<1x128xf32, #tpu.memory_space<vmem>>, vector<1x128xf32>,
    %243 = arith.index_cast %c0_i32_155 : i32 to index
    %c0_188 = arith.constant 0 : index
    %c0_189 = arith.constant 0 : index
    %244 = vector.load %arg9[%243, %c0_188, %c0_189] : memref<2x16x128xf32, #tpu.memory_space<vmem>>, vector<1x16x128xf32>
    %245 = vector.shape_cast %244 : vector<1x16x128xf32> to vector<16x128xf32>
    %246 = vector.shape_cast %231 : vector<16x128xf32> to vector<1x16x128xf32>
    tpu.vector_store %arg9[%243, %c0_188, %c0_189], %246 {strides = array<i32>} : memref<2x16x128xf32, #tpu.memory_space<vmem>>, vector<1x16x128xf32>,
    %c1_i32_190 = arith.constant 1 : i32
    %247 = arith.index_cast %c1_i32_190 : i32 to index
    %c0_191 = arith.constant 0 : index
    %c0_192 = arith.constant 0 : index
    %248 = vector.load %arg9[%247, %c0_191, %c0_192] : memref<2x16x128xf32, #tpu.memory_space<vmem>>, vector<1x16x128xf32>
    %249 = vector.shape_cast %248 : vector<1x16x128xf32> to vector<16x128xf32>
    %250 = vector.broadcast %197 : vector<1x128xf32> to vector<16x128xf32>
    %251 = arith.mulf %249, %250 : vector<16x128xf32>
    %252 = vector.broadcast %200 : vector<1x128xf32> to vector<16x128xf32>
    %253 = arith.addf %251, %252 : vector<16x128xf32>
    %c2_193 = arith.constant 2 : index
    %c16_194 = arith.constant 16 : index
    %254 = vector.load %arg11[%c2_193, %c16_194] : memref<20x160xf32, #tpu.memory_space<vmem>>, vector<16x128xf32>
    tpu.vector_store %arg11[%c2_193, %c16_194], %253 {strides = array<i32>} : memref<20x160xf32, #tpu.memory_space<vmem>>, vector<16x128xf32>,
    %c0_195 = arith.constant 0 : index
    %c0_196 = arith.constant 0 : index
    %255 = vector.load %arg11[%c0_195, %c0_196] : memref<20x160xf32, #tpu.memory_space<vmem>>, vector<16x160xf32>
    %c0_197 = arith.constant 0 : index
    %c0_198 = arith.constant 0 : index
    %c0_199 = arith.constant 0 : index
    %256 = vector.load %arg3[%c0_197, %c0_198, %c0_199] : memref<3x160x128xf32, #tpu.memory_space<vmem>>, vector<1x160x128xf32>
    %257 = vector.shape_cast %256 : vector<1x160x128xf32> to vector<160x128xf32>
    %cst_200 = arith.constant dense<0.000000e+00> : vector<16x128xf32>
    %258 = tpu.matmul %255, %257, %cst_200 {dimension_numbers = #tpu.dot_dimension_numbers<[1], [0], [0], [1], [0, 0, 1, 1], [], []>} : vector<16x160xf32>, vector<160x128xf32>, vector<16x128xf32> -> vector<16x128xf32>
    %c2_201 = arith.constant 2 : index
    %c0_202 = arith.constant 0 : index
    %259 = vector.load %arg11[%c2_201, %c0_202] : memref<20x160xf32, #tpu.memory_space<vmem>>, vector<16x160xf32>
    %c1_203 = arith.constant 1 : index
    %c0_204 = arith.constant 0 : index
    %c0_205 = arith.constant 0 : index
    %260 = vector.load %arg3[%c1_203, %c0_204, %c0_205] : memref<3x160x128xf32, #tpu.memory_space<vmem>>, vector<1x160x128xf32>
    %261 = vector.shape_cast %260 : vector<1x160x128xf32> to vector<160x128xf32>
    %cst_206 = arith.constant dense<0.000000e+00> : vector<16x128xf32>
    %262 = tpu.matmul %259, %261, %cst_206 {dimension_numbers = #tpu.dot_dimension_numbers<[1], [0], [0], [1], [0, 0, 1, 1], [], []>} : vector<16x160xf32>, vector<160x128xf32>, vector<16x128xf32> -> vector<16x128xf32>
    %263 = arith.addf %258, %262 : vector<16x128xf32>
    %c4_207 = arith.constant 4 : index
    %c0_208 = arith.constant 0 : index
    %264 = vector.load %arg11[%c4_207, %c0_208] : memref<20x160xf32, #tpu.memory_space<vmem>>, vector<16x160xf32>
    %c2_209 = arith.constant 2 : index
    %c0_210 = arith.constant 0 : index
    %c0_211 = arith.constant 0 : index
    %265 = vector.load %arg3[%c2_209, %c0_210, %c0_211] : memref<3x160x128xf32, #tpu.memory_space<vmem>>, vector<1x160x128xf32>
    %266 = vector.shape_cast %265 : vector<1x160x128xf32> to vector<160x128xf32>
    %cst_212 = arith.constant dense<0.000000e+00> : vector<16x128xf32>
    %267 = tpu.matmul %264, %266, %cst_212 {dimension_numbers = #tpu.dot_dimension_numbers<[1], [0], [0], [1], [0, 0, 1, 1], [], []>} : vector<16x160xf32>, vector<160x128xf32>, vector<16x128xf32> -> vector<16x128xf32>
    %268 = arith.addf %263, %267 : vector<16x128xf32>
    %269 = vector.broadcast %201 : vector<1x128xf32> to vector<16x128xf32>
    %270 = arith.addf %268, %269 : vector<16x128xf32>
    %cst_213 = arith.constant 0.000000e+00 : f32
    %271 = vector.broadcast %cst_213 : f32 to vector<16x128xf32>
    %272 = arith.maximumf %270, %271 : vector<16x128xf32>
    %c0_214 = arith.constant 0 : index
    %c0_215 = arith.constant 0 : index
    %273 = vector.load %arg12[%c0_214, %c0_215] : memref<1x128xf32, #tpu.memory_space<vmem>>, vector<1x128xf32>
    %cst_216 = arith.constant dense<0.000000e+00> : vector<128xf32>
    %274 = vector.multi_reduction <add>, %272, %cst_216 [0] : vector<16x128xf32> to vector<128xf32>
    %275 = vector.shape_cast %274 : vector<128xf32> to vector<1x128xf32>
    %276 = arith.addf %273, %275 : vector<1x128xf32>
    %c0_217 = arith.constant 0 : index
    %c0_218 = arith.constant 0 : index
    %277 = vector.load %arg12[%c0_217, %c0_218] : memref<1x128xf32, #tpu.memory_space<vmem>>, vector<1x128xf32>
    tpu.vector_store %arg12[%c0_217, %c0_218], %276 {strides = array<i32>} : memref<1x128xf32, #tpu.memory_space<vmem>>, vector<1x128xf32>,
    %c0_219 = arith.constant 0 : index
    %c0_220 = arith.constant 0 : index
    %278 = vector.load %arg13[%c0_219, %c0_220] : memref<1x128xf32, #tpu.memory_space<vmem>>, vector<1x128xf32>
    %279 = arith.mulf %272, %272 : vector<16x128xf32>
    %cst_221 = arith.constant dense<0.000000e+00> : vector<128xf32>
    %280 = vector.multi_reduction <add>, %279, %cst_221 [0] : vector<16x128xf32> to vector<128xf32>
    %281 = vector.shape_cast %280 : vector<128xf32> to vector<1x128xf32>
    %282 = arith.addf %278, %281 : vector<1x128xf32>
    %c0_222 = arith.constant 0 : index
    %c0_223 = arith.constant 0 : index
    %283 = vector.load %arg13[%c0_222, %c0_223] : memref<1x128xf32, #tpu.memory_space<vmem>>, vector<1x128xf32>
    tpu.vector_store %arg13[%c0_222, %c0_223], %282 {strides = array<i32>} : memref<1x128xf32, #tpu.memory_space<vmem>>, vector<1x128xf32>,
    %284 = arith.index_cast %c1_i32_190 : i32 to index
    %c0_224 = arith.constant 0 : index
    %c0_225 = arith.constant 0 : index
    %285 = vector.load %arg9[%284, %c0_224, %c0_225] : memref<2x16x128xf32, #tpu.memory_space<vmem>>, vector<1x16x128xf32>
    %286 = vector.shape_cast %285 : vector<1x16x128xf32> to vector<16x128xf32>
    %287 = vector.shape_cast %272 : vector<16x128xf32> to vector<1x16x128xf32>
    tpu.vector_store %arg9[%284, %c0_224, %c0_225], %287 {strides = array<i32>} : memref<2x16x128xf32, #tpu.memory_space<vmem>>, vector<1x16x128xf32>,
    %c2_i32_226 = arith.constant 2 : i32
    %c1_227 = arith.constant 1 : index
    %c0_228 = arith.constant 0 : index
    %288 = vector.load %arg6[%c1_227, %c0_228] : memref<3x128xf32, #tpu.memory_space<vmem>>, vector<1x128xf32>
    %c1_229 = arith.constant 1 : index
    %c0_230 = arith.constant 0 : index
    %289 = vector.load %arg7[%c1_229, %c0_230] : memref<3x128xf32, #tpu.memory_space<vmem>>, vector<1x128xf32>
    %c0_231 = arith.constant 0 : index
    %c0_232 = arith.constant 0 : index
    %290 = vector.load %arg12[%c0_231, %c0_232] : memref<1x128xf32, #tpu.memory_space<vmem>>, vector<1x128xf32>
    %c0_233 = arith.constant 0 : index
    %c0_234 = arith.constant 0 : index
    %291 = vector.load %arg13[%c0_233, %c0_234] : memref<1x128xf32, #tpu.memory_space<vmem>>, vector<1x128xf32>
    %cst_235 = arith.constant 0.000000e+00 : f32
    %292 = vector.broadcast %cst_235 : f32 to vector<1x8xf32>
    %cst_236 = arith.constant 0.000000e+00 : f32
    %293 = vector.broadcast %cst_236 : f32 to vector<1x8xf32>
    %294 = vector.extract_strided_slice %290 {offsets = [0, 0], sizes = [1, 8], strides = [1, 1]} : vector<1x128xf32> to vector<1x8xf32>
    %295 = arith.addf %292, %294 : vector<1x8xf32>
    %296 = vector.extract_strided_slice %291 {offsets = [0, 0], sizes = [1, 8], strides = [1, 1]} : vector<1x128xf32> to vector<1x8xf32>
    %297 = arith.addf %293, %296 : vector<1x8xf32>
    %298 = vector.extract_strided_slice %290 {offsets = [0, 8], sizes = [1, 8], strides = [1, 1]} : vector<1x128xf32> to vector<1x8xf32>
    %299 = arith.addf %295, %298 : vector<1x8xf32>
    %300 = vector.extract_strided_slice %291 {offsets = [0, 8], sizes = [1, 8], strides = [1, 1]} : vector<1x128xf32> to vector<1x8xf32>
    %301 = arith.addf %297, %300 : vector<1x8xf32>
    %302 = vector.extract_strided_slice %290 {offsets = [0, 16], sizes = [1, 8], strides = [1, 1]} : vector<1x128xf32> to vector<1x8xf32>
    %303 = arith.addf %299, %302 : vector<1x8xf32>
    %304 = vector.extract_strided_slice %291 {offsets = [0, 16], sizes = [1, 8], strides = [1, 1]} : vector<1x128xf32> to vector<1x8xf32>
    %305 = arith.addf %301, %304 : vector<1x8xf32>
    %306 = vector.extract_strided_slice %290 {offsets = [0, 24], sizes = [1, 8], strides = [1, 1]} : vector<1x128xf32> to vector<1x8xf32>
    %307 = arith.addf %303, %306 : vector<1x8xf32>
    %308 = vector.extract_strided_slice %291 {offsets = [0, 24], sizes = [1, 8], strides = [1, 1]} : vector<1x128xf32> to vector<1x8xf32>
    %309 = arith.addf %305, %308 : vector<1x8xf32>
    %310 = vector.extract_strided_slice %290 {offsets = [0, 32], sizes = [1, 8], strides = [1, 1]} : vector<1x128xf32> to vector<1x8xf32>
    %311 = arith.addf %307, %310 : vector<1x8xf32>
    %312 = vector.extract_strided_slice %291 {offsets = [0, 32], sizes = [1, 8], strides = [1, 1]} : vector<1x128xf32> to vector<1x8xf32>
    %313 = arith.addf %309, %312 : vector<1x8xf32>
    %314 = vector.extract_strided_slice %290 {offsets = [0, 40], sizes = [1, 8], strides = [1, 1]} : vector<1x128xf32> to vector<1x8xf32>
    %315 = arith.addf %311, %314 : vector<1x8xf32>
    %316 = vector.extract_strided_slice %291 {offsets = [0, 40], sizes = [1, 8], strides = [1, 1]} : vector<1x128xf32> to vector<1x8xf32>
    %317 = arith.addf %313, %316 : vector<1x8xf32>
    %318 = vector.extract_strided_slice %290 {offsets = [0, 48], sizes = [1, 8], strides = [1, 1]} : vector<1x128xf32> to vector<1x8xf32>
    %319 = arith.addf %315, %318 : vector<1x8xf32>
    %320 = vector.extract_strided_slice %291 {offsets = [0, 48], sizes = [1, 8], strides = [1, 1]} : vector<1x128xf32> to vector<1x8xf32>
    %321 = arith.addf %317, %320 : vector<1x8xf32>
    %322 = vector.extract_strided_slice %290 {offsets = [0, 56], sizes = [1, 8], strides = [1, 1]} : vector<1x128xf32> to vector<1x8xf32>
    %323 = arith.addf %319, %322 : vector<1x8xf32>
    %324 = vector.extract_strided_slice %291 {offsets = [0, 56], sizes = [1, 8], strides = [1, 1]} : vector<1x128xf32> to vector<1x8xf32>
    %325 = arith.addf %321, %324 : vector<1x8xf32>
    %326 = vector.extract_strided_slice %290 {offsets = [0, 64], sizes = [1, 8], strides = [1, 1]} : vector<1x128xf32> to vector<1x8xf32>
    %327 = arith.addf %323, %326 : vector<1x8xf32>
    %328 = vector.extract_strided_slice %291 {offsets = [0, 64], sizes = [1, 8], strides = [1, 1]} : vector<1x128xf32> to vector<1x8xf32>
    %329 = arith.addf %325, %328 : vector<1x8xf32>
    %330 = vector.extract_strided_slice %290 {offsets = [0, 72], sizes = [1, 8], strides = [1, 1]} : vector<1x128xf32> to vector<1x8xf32>
    %331 = arith.addf %327, %330 : vector<1x8xf32>
    %332 = vector.extract_strided_slice %291 {offsets = [0, 72], sizes = [1, 8], strides = [1, 1]} : vector<1x128xf32> to vector<1x8xf32>
    %333 = arith.addf %329, %332 : vector<1x8xf32>
    %334 = vector.extract_strided_slice %290 {offsets = [0, 80], sizes = [1, 8], strides = [1, 1]} : vector<1x128xf32> to vector<1x8xf32>
    %335 = arith.addf %331, %334 : vector<1x8xf32>
    %336 = vector.extract_strided_slice %291 {offsets = [0, 80], sizes = [1, 8], strides = [1, 1]} : vector<1x128xf32> to vector<1x8xf32>
    %337 = arith.addf %333, %336 : vector<1x8xf32>
    %338 = vector.extract_strided_slice %290 {offsets = [0, 88], sizes = [1, 8], strides = [1, 1]} : vector<1x128xf32> to vector<1x8xf32>
    %339 = arith.addf %335, %338 : vector<1x8xf32>
    %340 = vector.extract_strided_slice %291 {offsets = [0, 88], sizes = [1, 8], strides = [1, 1]} : vector<1x128xf32> to vector<1x8xf32>
    %341 = arith.addf %337, %340 : vector<1x8xf32>
    %342 = vector.extract_strided_slice %290 {offsets = [0, 96], sizes = [1, 8], strides = [1, 1]} : vector<1x128xf32> to vector<1x8xf32>
    %343 = arith.addf %339, %342 : vector<1x8xf32>
    %344 = vector.extract_strided_slice %291 {offsets = [0, 96], sizes = [1, 8], strides = [1, 1]} : vector<1x128xf32> to vector<1x8xf32>
    %345 = arith.addf %341, %344 : vector<1x8xf32>
    %346 = vector.extract_strided_slice %290 {offsets = [0, 104], sizes = [1, 8], strides = [1, 1]} : vector<1x128xf32> to vector<1x8xf32>
    %347 = arith.addf %343, %346 : vector<1x8xf32>
    %348 = vector.extract_strided_slice %291 {offsets = [0, 104], sizes = [1, 8], strides = [1, 1]} : vector<1x128xf32> to vector<1x8xf32>
    %349 = arith.addf %345, %348 : vector<1x8xf32>
    %350 = vector.extract_strided_slice %290 {offsets = [0, 112], sizes = [1, 8], strides = [1, 1]} : vector<1x128xf32> to vector<1x8xf32>
    %351 = arith.addf %347, %350 : vector<1x8xf32>
    %352 = vector.extract_strided_slice %291 {offsets = [0, 112], sizes = [1, 8], strides = [1, 1]} : vector<1x128xf32> to vector<1x8xf32>
    %353 = arith.addf %349, %352 : vector<1x8xf32>
    %354 = vector.extract_strided_slice %290 {offsets = [0, 120], sizes = [1, 8], strides = [1, 1]} : vector<1x128xf32> to vector<1x8xf32>
    %355 = arith.addf %351, %354 : vector<1x8xf32>
    %356 = vector.extract_strided_slice %291 {offsets = [0, 120], sizes = [1, 8], strides = [1, 1]} : vector<1x128xf32> to vector<1x8xf32>
    %357 = arith.addf %353, %356 : vector<1x8xf32>
    %cst_237 = arith.constant 0.001953125 : f32
    %358 = vector.broadcast %cst_237 : f32 to vector<1x8xf32>
    %359 = arith.mulf %355, %358 : vector<1x8xf32>
    %cst_238 = arith.constant 0.001953125 : f32
    %360 = vector.broadcast %cst_238 : f32 to vector<1x8xf32>
    %361 = arith.mulf %357, %360 : vector<1x8xf32>
    %362 = arith.mulf %359, %359 : vector<1x8xf32>
    %363 = arith.subf %361, %362 : vector<1x8xf32>
    %cst_239 = arith.constant 0.000000e+00 : f32
    %364 = vector.broadcast %cst_239 : f32 to vector<1x8xf32>
    %365 = arith.maximumf %363, %364 : vector<1x8xf32>
    %cst_240 = arith.constant 9.99999974E-6 : f32
    %366 = vector.broadcast %cst_240 : f32 to vector<1x8xf32>
    %367 = arith.addf %365, %366 : vector<1x8xf32>
    %368 = math.rsqrt %367 : vector<1x8xf32>
    %c0_241 = arith.constant 0 : index
    %c0_242 = arith.constant 0 : index
    %369 = vector.load %arg12[%c0_241, %c0_242] : memref<1x128xf32, #tpu.memory_space<vmem>>, vector<1x8xf32>
    tpu.vector_store %arg12[%c0_241, %c0_242], %359 {strides = array<i32>} : memref<1x128xf32, #tpu.memory_space<vmem>>, vector<1x8xf32>,
    %c0_243 = arith.constant 0 : index
    %c0_244 = arith.constant 0 : index
    %370 = vector.load %arg13[%c0_243, %c0_244] : memref<1x128xf32, #tpu.memory_space<vmem>>, vector<1x8xf32>
    tpu.vector_store %arg13[%c0_243, %c0_244], %368 {strides = array<i32>} : memref<1x128xf32, #tpu.memory_space<vmem>>, vector<1x8xf32>,
    %c0_245 = arith.constant 0 : index
    %c8_246 = arith.constant 8 : index
    %371 = vector.load %arg12[%c0_245, %c8_246] : memref<1x128xf32, #tpu.memory_space<vmem>>, vector<1x8xf32>
    tpu.vector_store %arg12[%c0_245, %c8_246], %359 {strides = array<i32>} : memref<1x128xf32, #tpu.memory_space<vmem>>, vector<1x8xf32>,
    %c0_247 = arith.constant 0 : index
    %c8_248 = arith.constant 8 : index
    %372 = vector.load %arg13[%c0_247, %c8_248] : memref<1x128xf32, #tpu.memory_space<vmem>>, vector<1x8xf32>
    tpu.vector_store %arg13[%c0_247, %c8_248], %368 {strides = array<i32>} : memref<1x128xf32, #tpu.memory_space<vmem>>, vector<1x8xf32>,
    %c0_249 = arith.constant 0 : index
    %c16_250 = arith.constant 16 : index
    %373 = vector.load %arg12[%c0_249, %c16_250] : memref<1x128xf32, #tpu.memory_space<vmem>>, vector<1x8xf32>
    tpu.vector_store %arg12[%c0_249, %c16_250], %359 {strides = array<i32>} : memref<1x128xf32, #tpu.memory_space<vmem>>, vector<1x8xf32>,
    %c0_251 = arith.constant 0 : index
    %c16_252 = arith.constant 16 : index
    %374 = vector.load %arg13[%c0_251, %c16_252] : memref<1x128xf32, #tpu.memory_space<vmem>>, vector<1x8xf32>
    tpu.vector_store %arg13[%c0_251, %c16_252], %368 {strides = array<i32>} : memref<1x128xf32, #tpu.memory_space<vmem>>, vector<1x8xf32>,
    %c0_253 = arith.constant 0 : index
    %c24_254 = arith.constant 24 : index
    %375 = vector.load %arg12[%c0_253, %c24_254] : memref<1x128xf32, #tpu.memory_space<vmem>>, vector<1x8xf32>
    tpu.vector_store %arg12[%c0_253, %c24_254], %359 {strides = array<i32>} : memref<1x128xf32, #tpu.memory_space<vmem>>, vector<1x8xf32>,
    %c0_255 = arith.constant 0 : index
    %c24_256 = arith.constant 24 : index
    %376 = vector.load %arg13[%c0_255, %c24_256] : memref<1x128xf32, #tpu.memory_space<vmem>>, vector<1x8xf32>
    tpu.vector_store %arg13[%c0_255, %c24_256], %368 {strides = array<i32>} : memref<1x128xf32, #tpu.memory_space<vmem>>, vector<1x8xf32>,
    %c0_257 = arith.constant 0 : index
    %c32_258 = arith.constant 32 : index
    %377 = vector.load %arg12[%c0_257, %c32_258] : memref<1x128xf32, #tpu.memory_space<vmem>>, vector<1x8xf32>
    tpu.vector_store %arg12[%c0_257, %c32_258], %359 {strides = array<i32>} : memref<1x128xf32, #tpu.memory_space<vmem>>, vector<1x8xf32>,
    %c0_259 = arith.constant 0 : index
    %c32_260 = arith.constant 32 : index
    %378 = vector.load %arg13[%c0_259, %c32_260] : memref<1x128xf32, #tpu.memory_space<vmem>>, vector<1x8xf32>
    tpu.vector_store %arg13[%c0_259, %c32_260], %368 {strides = array<i32>} : memref<1x128xf32, #tpu.memory_space<vmem>>, vector<1x8xf32>,
    %c0_261 = arith.constant 0 : index
    %c40_262 = arith.constant 40 : index
    %379 = vector.load %arg12[%c0_261, %c40_262] : memref<1x128xf32, #tpu.memory_space<vmem>>, vector<1x8xf32>
    tpu.vector_store %arg12[%c0_261, %c40_262], %359 {strides = array<i32>} : memref<1x128xf32, #tpu.memory_space<vmem>>, vector<1x8xf32>,
    %c0_263 = arith.constant 0 : index
    %c40_264 = arith.constant 40 : index
    %380 = vector.load %arg13[%c0_263, %c40_264] : memref<1x128xf32, #tpu.memory_space<vmem>>, vector<1x8xf32>
    tpu.vector_store %arg13[%c0_263, %c40_264], %368 {strides = array<i32>} : memref<1x128xf32, #tpu.memory_space<vmem>>, vector<1x8xf32>,
    %c0_265 = arith.constant 0 : index
    %c48_266 = arith.constant 48 : index
    %381 = vector.load %arg12[%c0_265, %c48_266] : memref<1x128xf32, #tpu.memory_space<vmem>>, vector<1x8xf32>
    tpu.vector_store %arg12[%c0_265, %c48_266], %359 {strides = array<i32>} : memref<1x128xf32, #tpu.memory_space<vmem>>, vector<1x8xf32>,
    %c0_267 = arith.constant 0 : index
    %c48_268 = arith.constant 48 : index
    %382 = vector.load %arg13[%c0_267, %c48_268] : memref<1x128xf32, #tpu.memory_space<vmem>>, vector<1x8xf32>
    tpu.vector_store %arg13[%c0_267, %c48_268], %368 {strides = array<i32>} : memref<1x128xf32, #tpu.memory_space<vmem>>, vector<1x8xf32>,
    %c0_269 = arith.constant 0 : index
    %c56_270 = arith.constant 56 : index
    %383 = vector.load %arg12[%c0_269, %c56_270] : memref<1x128xf32, #tpu.memory_space<vmem>>, vector<1x8xf32>
    tpu.vector_store %arg12[%c0_269, %c56_270], %359 {strides = array<i32>} : memref<1x128xf32, #tpu.memory_space<vmem>>, vector<1x8xf32>,
    %c0_271 = arith.constant 0 : index
    %c56_272 = arith.constant 56 : index
    %384 = vector.load %arg13[%c0_271, %c56_272] : memref<1x128xf32, #tpu.memory_space<vmem>>, vector<1x8xf32>
    tpu.vector_store %arg13[%c0_271, %c56_272], %368 {strides = array<i32>} : memref<1x128xf32, #tpu.memory_space<vmem>>, vector<1x8xf32>,
    %c0_273 = arith.constant 0 : index
    %c64_274 = arith.constant 64 : index
    %385 = vector.load %arg12[%c0_273, %c64_274] : memref<1x128xf32, #tpu.memory_space<vmem>>, vector<1x8xf32>
    tpu.vector_store %arg12[%c0_273, %c64_274], %359 {strides = array<i32>} : memref<1x128xf32, #tpu.memory_space<vmem>>, vector<1x8xf32>,
    %c0_275 = arith.constant 0 : index
    %c64_276 = arith.constant 64 : index
    %386 = vector.load %arg13[%c0_275, %c64_276] : memref<1x128xf32, #tpu.memory_space<vmem>>, vector<1x8xf32>
    tpu.vector_store %arg13[%c0_275, %c64_276], %368 {strides = array<i32>} : memref<1x128xf32, #tpu.memory_space<vmem>>, vector<1x8xf32>,
    %c0_277 = arith.constant 0 : index
    %c72_278 = arith.constant 72 : index
    %387 = vector.load %arg12[%c0_277, %c72_278] : memref<1x128xf32, #tpu.memory_space<vmem>>, vector<1x8xf32>
    tpu.vector_store %arg12[%c0_277, %c72_278], %359 {strides = array<i32>} : memref<1x128xf32, #tpu.memory_space<vmem>>, vector<1x8xf32>,
    %c0_279 = arith.constant 0 : index
    %c72_280 = arith.constant 72 : index
    %388 = vector.load %arg13[%c0_279, %c72_280] : memref<1x128xf32, #tpu.memory_space<vmem>>, vector<1x8xf32>
    tpu.vector_store %arg13[%c0_279, %c72_280], %368 {strides = array<i32>} : memref<1x128xf32, #tpu.memory_space<vmem>>, vector<1x8xf32>,
    %c0_281 = arith.constant 0 : index
    %c80_282 = arith.constant 80 : index
    %389 = vector.load %arg12[%c0_281, %c80_282] : memref<1x128xf32, #tpu.memory_space<vmem>>, vector<1x8xf32>
    tpu.vector_store %arg12[%c0_281, %c80_282], %359 {strides = array<i32>} : memref<1x128xf32, #tpu.memory_space<vmem>>, vector<1x8xf32>,
    %c0_283 = arith.constant 0 : index
    %c80_284 = arith.constant 80 : index
    %390 = vector.load %arg13[%c0_283, %c80_284] : memref<1x128xf32, #tpu.memory_space<vmem>>, vector<1x8xf32>
    tpu.vector_store %arg13[%c0_283, %c80_284], %368 {strides = array<i32>} : memref<1x128xf32, #tpu.memory_space<vmem>>, vector<1x8xf32>,
    %c0_285 = arith.constant 0 : index
    %c88_286 = arith.constant 88 : index
    %391 = vector.load %arg12[%c0_285, %c88_286] : memref<1x128xf32, #tpu.memory_space<vmem>>, vector<1x8xf32>
    tpu.vector_store %arg12[%c0_285, %c88_286], %359 {strides = array<i32>} : memref<1x128xf32, #tpu.memory_space<vmem>>, vector<1x8xf32>,
    %c0_287 = arith.constant 0 : index
    %c88_288 = arith.constant 88 : index
    %392 = vector.load %arg13[%c0_287, %c88_288] : memref<1x128xf32, #tpu.memory_space<vmem>>, vector<1x8xf32>
    tpu.vector_store %arg13[%c0_287, %c88_288], %368 {strides = array<i32>} : memref<1x128xf32, #tpu.memory_space<vmem>>, vector<1x8xf32>,
    %c0_289 = arith.constant 0 : index
    %c96_290 = arith.constant 96 : index
    %393 = vector.load %arg12[%c0_289, %c96_290] : memref<1x128xf32, #tpu.memory_space<vmem>>, vector<1x8xf32>
    tpu.vector_store %arg12[%c0_289, %c96_290], %359 {strides = array<i32>} : memref<1x128xf32, #tpu.memory_space<vmem>>, vector<1x8xf32>,
    %c0_291 = arith.constant 0 : index
    %c96_292 = arith.constant 96 : index
    %394 = vector.load %arg13[%c0_291, %c96_292] : memref<1x128xf32, #tpu.memory_space<vmem>>, vector<1x8xf32>
    tpu.vector_store %arg13[%c0_291, %c96_292], %368 {strides = array<i32>} : memref<1x128xf32, #tpu.memory_space<vmem>>, vector<1x8xf32>,
    %c0_293 = arith.constant 0 : index
    %c104_294 = arith.constant 104 : index
    %395 = vector.load %arg12[%c0_293, %c104_294] : memref<1x128xf32, #tpu.memory_space<vmem>>, vector<1x8xf32>
    tpu.vector_store %arg12[%c0_293, %c104_294], %359 {strides = array<i32>} : memref<1x128xf32, #tpu.memory_space<vmem>>, vector<1x8xf32>,
    %c0_295 = arith.constant 0 : index
    %c104_296 = arith.constant 104 : index
    %396 = vector.load %arg13[%c0_295, %c104_296] : memref<1x128xf32, #tpu.memory_space<vmem>>, vector<1x8xf32>
    tpu.vector_store %arg13[%c0_295, %c104_296], %368 {strides = array<i32>} : memref<1x128xf32, #tpu.memory_space<vmem>>, vector<1x8xf32>,
    %c0_297 = arith.constant 0 : index
    %c112_298 = arith.constant 112 : index
    %397 = vector.load %arg12[%c0_297, %c112_298] : memref<1x128xf32, #tpu.memory_space<vmem>>, vector<1x8xf32>
    tpu.vector_store %arg12[%c0_297, %c112_298], %359 {strides = array<i32>} : memref<1x128xf32, #tpu.memory_space<vmem>>, vector<1x8xf32>,
    %c0_299 = arith.constant 0 : index
    %c112_300 = arith.constant 112 : index
    %398 = vector.load %arg13[%c0_299, %c112_300] : memref<1x128xf32, #tpu.memory_space<vmem>>, vector<1x8xf32>
    tpu.vector_store %arg13[%c0_299, %c112_300], %368 {strides = array<i32>} : memref<1x128xf32, #tpu.memory_space<vmem>>, vector<1x8xf32>,
    %c0_301 = arith.constant 0 : index
    %c120_302 = arith.constant 120 : index
    %399 = vector.load %arg12[%c0_301, %c120_302] : memref<1x128xf32, #tpu.memory_space<vmem>>, vector<1x8xf32>
    tpu.vector_store %arg12[%c0_301, %c120_302], %359 {strides = array<i32>} : memref<1x128xf32, #tpu.memory_space<vmem>>, vector<1x8xf32>,
    %c0_303 = arith.constant 0 : index
    %c120_304 = arith.constant 120 : index
    %400 = vector.load %arg13[%c0_303, %c120_304] : memref<1x128xf32, #tpu.memory_space<vmem>>, vector<1x8xf32>
    tpu.vector_store %arg13[%c0_303, %c120_304], %368 {strides = array<i32>} : memref<1x128xf32, #tpu.memory_space<vmem>>, vector<1x8xf32>,
    %c0_305 = arith.constant 0 : index
    %c0_306 = arith.constant 0 : index
    %401 = vector.load %arg13[%c0_305, %c0_306] : memref<1x128xf32, #tpu.memory_space<vmem>>, vector<1x128xf32>
    %402 = arith.mulf %288, %401 : vector<1x128xf32>
    %c0_307 = arith.constant 0 : index
    %c0_308 = arith.constant 0 : index
    %403 = vector.load %arg12[%c0_307, %c0_308] : memref<1x128xf32, #tpu.memory_space<vmem>>, vector<1x128xf32>
    %404 = arith.mulf %403, %402 : vector<1x128xf32>
    %405 = arith.subf %289, %404 : vector<1x128xf32>
    %c2_309 = arith.constant 2 : index
    %c0_310 = arith.constant 0 : index
    %406 = vector.load %arg5[%c2_309, %c0_310] : memref<3x128xf32, #tpu.memory_space<vmem>>, vector<1x128xf32>
    %cst_311 = arith.constant 0.000000e+00 : f32
    %407 = vector.broadcast %cst_311 : f32 to vector<1x128xf32>
    %c0_312 = arith.constant 0 : index
    %c0_313 = arith.constant 0 : index
    %408 = vector.load %arg12[%c0_312, %c0_313] : memref<1x128xf32, #tpu.memory_space<vmem>>, vector<1x128xf32>
    tpu.vector_store %arg12[%c0_312, %c0_313], %407 {strides = array<i32>} : memref<1x128xf32, #tpu.memory_space<vmem>>, vector<1x128xf32>,
    %cst_314 = arith.constant 0.000000e+00 : f32
    %409 = vector.broadcast %cst_314 : f32 to vector<1x128xf32>
    %c0_315 = arith.constant 0 : index
    %c0_316 = arith.constant 0 : index
    %410 = vector.load %arg13[%c0_315, %c0_316] : memref<1x128xf32, #tpu.memory_space<vmem>>, vector<1x128xf32>
    tpu.vector_store %arg13[%c0_315, %c0_316], %409 {strides = array<i32>} : memref<1x128xf32, #tpu.memory_space<vmem>>, vector<1x128xf32>,
    %c0_i32_317 = arith.constant 0 : i32
    %411 = arith.index_cast %c0_i32_317 : i32 to index
    %c0_318 = arith.constant 0 : index
    %c0_319 = arith.constant 0 : index
    %412 = vector.load %arg9[%411, %c0_318, %c0_319] : memref<2x16x128xf32, #tpu.memory_space<vmem>>, vector<1x16x128xf32>
    %413 = vector.shape_cast %412 : vector<1x16x128xf32> to vector<16x128xf32>
    %414 = vector.broadcast %402 : vector<1x128xf32> to vector<16x128xf32>
    %415 = arith.mulf %413, %414 : vector<16x128xf32>
    %416 = vector.broadcast %405 : vector<1x128xf32> to vector<16x128xf32>
    %417 = arith.addf %415, %416 : vector<16x128xf32>
    %c2_320 = arith.constant 2 : index
    %c16_321 = arith.constant 16 : index
    %418 = vector.load %arg11[%c2_320, %c16_321] : memref<20x160xf32, #tpu.memory_space<vmem>>, vector<16x128xf32>
    tpu.vector_store %arg11[%c2_320, %c16_321], %417 {strides = array<i32>} : memref<20x160xf32, #tpu.memory_space<vmem>>, vector<16x128xf32>,
    %c0_322 = arith.constant 0 : index
    %c0_323 = arith.constant 0 : index
    %419 = vector.load %arg11[%c0_322, %c0_323] : memref<20x160xf32, #tpu.memory_space<vmem>>, vector<16x160xf32>
    %c0_324 = arith.constant 0 : index
    %c0_325 = arith.constant 0 : index
    %c0_326 = arith.constant 0 : index
    %420 = vector.load %arg4[%c0_324, %c0_325, %c0_326] : memref<3x160x128xf32, #tpu.memory_space<vmem>>, vector<1x160x128xf32>
    %421 = vector.shape_cast %420 : vector<1x160x128xf32> to vector<160x128xf32>
    %cst_327 = arith.constant dense<0.000000e+00> : vector<16x128xf32>
    %422 = tpu.matmul %419, %421, %cst_327 {dimension_numbers = #tpu.dot_dimension_numbers<[1], [0], [0], [1], [0, 0, 1, 1], [], []>} : vector<16x160xf32>, vector<160x128xf32>, vector<16x128xf32> -> vector<16x128xf32>
    %c2_328 = arith.constant 2 : index
    %c0_329 = arith.constant 0 : index
    %423 = vector.load %arg11[%c2_328, %c0_329] : memref<20x160xf32, #tpu.memory_space<vmem>>, vector<16x160xf32>
    %c1_330 = arith.constant 1 : index
    %c0_331 = arith.constant 0 : index
    %c0_332 = arith.constant 0 : index
    %424 = vector.load %arg4[%c1_330, %c0_331, %c0_332] : memref<3x160x128xf32, #tpu.memory_space<vmem>>, vector<1x160x128xf32>
    %425 = vector.shape_cast %424 : vector<1x160x128xf32> to vector<160x128xf32>
    %cst_333 = arith.constant dense<0.000000e+00> : vector<16x128xf32>
    %426 = tpu.matmul %423, %425, %cst_333 {dimension_numbers = #tpu.dot_dimension_numbers<[1], [0], [0], [1], [0, 0, 1, 1], [], []>} : vector<16x160xf32>, vector<160x128xf32>, vector<16x128xf32> -> vector<16x128xf32>
    %427 = arith.addf %422, %426 : vector<16x128xf32>
    %c4_334 = arith.constant 4 : index
    %c0_335 = arith.constant 0 : index
    %428 = vector.load %arg11[%c4_334, %c0_335] : memref<20x160xf32, #tpu.memory_space<vmem>>, vector<16x160xf32>
    %c2_336 = arith.constant 2 : index
    %c0_337 = arith.constant 0 : index
    %c0_338 = arith.constant 0 : index
    %429 = vector.load %arg4[%c2_336, %c0_337, %c0_338] : memref<3x160x128xf32, #tpu.memory_space<vmem>>, vector<1x160x128xf32>
    %430 = vector.shape_cast %429 : vector<1x160x128xf32> to vector<160x128xf32>
    %cst_339 = arith.constant dense<0.000000e+00> : vector<16x128xf32>
    %431 = tpu.matmul %428, %430, %cst_339 {dimension_numbers = #tpu.dot_dimension_numbers<[1], [0], [0], [1], [0, 0, 1, 1], [], []>} : vector<16x160xf32>, vector<160x128xf32>, vector<16x128xf32> -> vector<16x128xf32>
    %432 = arith.addf %427, %431 : vector<16x128xf32>
    %433 = vector.broadcast %406 : vector<1x128xf32> to vector<16x128xf32>
    %434 = arith.addf %432, %433 : vector<16x128xf32>
    %cst_340 = arith.constant 0.000000e+00 : f32
    %435 = vector.broadcast %cst_340 : f32 to vector<16x128xf32>
    %436 = arith.maximumf %434, %435 : vector<16x128xf32>
    %c0_341 = arith.constant 0 : index
    %c0_342 = arith.constant 0 : index
    %437 = vector.load %arg12[%c0_341, %c0_342] : memref<1x128xf32, #tpu.memory_space<vmem>>, vector<1x128xf32>
    %cst_343 = arith.constant dense<0.000000e+00> : vector<128xf32>
    %438 = vector.multi_reduction <add>, %436, %cst_343 [0] : vector<16x128xf32> to vector<128xf32>
    %439 = vector.shape_cast %438 : vector<128xf32> to vector<1x128xf32>
    %440 = arith.addf %437, %439 : vector<1x128xf32>
    %c0_344 = arith.constant 0 : index
    %c0_345 = arith.constant 0 : index
    %441 = vector.load %arg12[%c0_344, %c0_345] : memref<1x128xf32, #tpu.memory_space<vmem>>, vector<1x128xf32>
    tpu.vector_store %arg12[%c0_344, %c0_345], %440 {strides = array<i32>} : memref<1x128xf32, #tpu.memory_space<vmem>>, vector<1x128xf32>,
    %c0_346 = arith.constant 0 : index
    %c0_347 = arith.constant 0 : index
    %442 = vector.load %arg13[%c0_346, %c0_347] : memref<1x128xf32, #tpu.memory_space<vmem>>, vector<1x128xf32>
    %443 = arith.mulf %436, %436 : vector<16x128xf32>
    %cst_348 = arith.constant dense<0.000000e+00> : vector<128xf32>
    %444 = vector.multi_reduction <add>, %443, %cst_348 [0] : vector<16x128xf32> to vector<128xf32>
    %445 = vector.shape_cast %444 : vector<128xf32> to vector<1x128xf32>
    %446 = arith.addf %442, %445 : vector<1x128xf32>
    %c0_349 = arith.constant 0 : index
    %c0_350 = arith.constant 0 : index
    %447 = vector.load %arg13[%c0_349, %c0_350] : memref<1x128xf32, #tpu.memory_space<vmem>>, vector<1x128xf32>
    tpu.vector_store %arg13[%c0_349, %c0_350], %446 {strides = array<i32>} : memref<1x128xf32, #tpu.memory_space<vmem>>, vector<1x128xf32>,
    %448 = arith.index_cast %c0_i32_317 : i32 to index
    %c0_351 = arith.constant 0 : index
    %c0_352 = arith.constant 0 : index
    %449 = vector.load %arg9[%448, %c0_351, %c0_352] : memref<2x16x128xf32, #tpu.memory_space<vmem>>, vector<1x16x128xf32>
    %450 = vector.shape_cast %449 : vector<1x16x128xf32> to vector<16x128xf32>
    %451 = vector.shape_cast %436 : vector<16x128xf32> to vector<1x16x128xf32>
    tpu.vector_store %arg9[%448, %c0_351, %c0_352], %451 {strides = array<i32>} : memref<2x16x128xf32, #tpu.memory_space<vmem>>, vector<1x16x128xf32>,
    %c1_i32_353 = arith.constant 1 : i32
    %452 = arith.index_cast %c1_i32_353 : i32 to index
    %c0_354 = arith.constant 0 : index
    %c0_355 = arith.constant 0 : index
    %453 = vector.load %arg9[%452, %c0_354, %c0_355] : memref<2x16x128xf32, #tpu.memory_space<vmem>>, vector<1x16x128xf32>
    %454 = vector.shape_cast %453 : vector<1x16x128xf32> to vector<16x128xf32>
    %455 = vector.broadcast %402 : vector<1x128xf32> to vector<16x128xf32>
    %456 = arith.mulf %454, %455 : vector<16x128xf32>
    %457 = vector.broadcast %405 : vector<1x128xf32> to vector<16x128xf32>
    %458 = arith.addf %456, %457 : vector<16x128xf32>
    %c2_356 = arith.constant 2 : index
    %c16_357 = arith.constant 16 : index
    %459 = vector.load %arg11[%c2_356, %c16_357] : memref<20x160xf32, #tpu.memory_space<vmem>>, vector<16x128xf32>
    tpu.vector_store %arg11[%c2_356, %c16_357], %458 {strides = array<i32>} : memref<20x160xf32, #tpu.memory_space<vmem>>, vector<16x128xf32>,
    %c0_358 = arith.constant 0 : index
    %c0_359 = arith.constant 0 : index
    %460 = vector.load %arg11[%c0_358, %c0_359] : memref<20x160xf32, #tpu.memory_space<vmem>>, vector<16x160xf32>
    %c0_360 = arith.constant 0 : index
    %c0_361 = arith.constant 0 : index
    %c0_362 = arith.constant 0 : index
    %461 = vector.load %arg4[%c0_360, %c0_361, %c0_362] : memref<3x160x128xf32, #tpu.memory_space<vmem>>, vector<1x160x128xf32>
    %462 = vector.shape_cast %461 : vector<1x160x128xf32> to vector<160x128xf32>
    %cst_363 = arith.constant dense<0.000000e+00> : vector<16x128xf32>
    %463 = tpu.matmul %460, %462, %cst_363 {dimension_numbers = #tpu.dot_dimension_numbers<[1], [0], [0], [1], [0, 0, 1, 1], [], []>} : vector<16x160xf32>, vector<160x128xf32>, vector<16x128xf32> -> vector<16x128xf32>
    %c2_364 = arith.constant 2 : index
    %c0_365 = arith.constant 0 : index
    %464 = vector.load %arg11[%c2_364, %c0_365] : memref<20x160xf32, #tpu.memory_space<vmem>>, vector<16x160xf32>
    %c1_366 = arith.constant 1 : index
    %c0_367 = arith.constant 0 : index
    %c0_368 = arith.constant 0 : index
    %465 = vector.load %arg4[%c1_366, %c0_367, %c0_368] : memref<3x160x128xf32, #tpu.memory_space<vmem>>, vector<1x160x128xf32>
    %466 = vector.shape_cast %465 : vector<1x160x128xf32> to vector<160x128xf32>
    %cst_369 = arith.constant dense<0.000000e+00> : vector<16x128xf32>
    %467 = tpu.matmul %464, %466, %cst_369 {dimension_numbers = #tpu.dot_dimension_numbers<[1], [0], [0], [1], [0, 0, 1, 1], [], []>} : vector<16x160xf32>, vector<160x128xf32>, vector<16x128xf32> -> vector<16x128xf32>
    %468 = arith.addf %463, %467 : vector<16x128xf32>
    %c4_370 = arith.constant 4 : index
    %c0_371 = arith.constant 0 : index
    %469 = vector.load %arg11[%c4_370, %c0_371] : memref<20x160xf32, #tpu.memory_space<vmem>>, vector<16x160xf32>
    %c2_372 = arith.constant 2 : index
    %c0_373 = arith.constant 0 : index
    %c0_374 = arith.constant 0 : index
    %470 = vector.load %arg4[%c2_372, %c0_373, %c0_374] : memref<3x160x128xf32, #tpu.memory_space<vmem>>, vector<1x160x128xf32>
    %471 = vector.shape_cast %470 : vector<1x160x128xf32> to vector<160x128xf32>
    %cst_375 = arith.constant dense<0.000000e+00> : vector<16x128xf32>
    %472 = tpu.matmul %469, %471, %cst_375 {dimension_numbers = #tpu.dot_dimension_numbers<[1], [0], [0], [1], [0, 0, 1, 1], [], []>} : vector<16x160xf32>, vector<160x128xf32>, vector<16x128xf32> -> vector<16x128xf32>
    %473 = arith.addf %468, %472 : vector<16x128xf32>
    %474 = vector.broadcast %406 : vector<1x128xf32> to vector<16x128xf32>
    %475 = arith.addf %473, %474 : vector<16x128xf32>
    %cst_376 = arith.constant 0.000000e+00 : f32
    %476 = vector.broadcast %cst_376 : f32 to vector<16x128xf32>
    %477 = arith.maximumf %475, %476 : vector<16x128xf32>
    %c0_377 = arith.constant 0 : index
    %c0_378 = arith.constant 0 : index
    %478 = vector.load %arg12[%c0_377, %c0_378] : memref<1x128xf32, #tpu.memory_space<vmem>>, vector<1x128xf32>
    %cst_379 = arith.constant dense<0.000000e+00> : vector<128xf32>
    %479 = vector.multi_reduction <add>, %477, %cst_379 [0] : vector<16x128xf32> to vector<128xf32>
    %480 = vector.shape_cast %479 : vector<128xf32> to vector<1x128xf32>
    %481 = arith.addf %478, %480 : vector<1x128xf32>
    %c0_380 = arith.constant 0 : index
    %c0_381 = arith.constant 0 : index
    %482 = vector.load %arg12[%c0_380, %c0_381] : memref<1x128xf32, #tpu.memory_space<vmem>>, vector<1x128xf32>
    tpu.vector_store %arg12[%c0_380, %c0_381], %481 {strides = array<i32>} : memref<1x128xf32, #tpu.memory_space<vmem>>, vector<1x128xf32>,
    %c0_382 = arith.constant 0 : index
    %c0_383 = arith.constant 0 : index
    %483 = vector.load %arg13[%c0_382, %c0_383] : memref<1x128xf32, #tpu.memory_space<vmem>>, vector<1x128xf32>
    %484 = arith.mulf %477, %477 : vector<16x128xf32>
    %cst_384 = arith.constant dense<0.000000e+00> : vector<128xf32>
    %485 = vector.multi_reduction <add>, %484, %cst_384 [0] : vector<16x128xf32> to vector<128xf32>
    %486 = vector.shape_cast %485 : vector<128xf32> to vector<1x128xf32>
    %487 = arith.addf %483, %486 : vector<1x128xf32>
    %c0_385 = arith.constant 0 : index
    %c0_386 = arith.constant 0 : index
    %488 = vector.load %arg13[%c0_385, %c0_386] : memref<1x128xf32, #tpu.memory_space<vmem>>, vector<1x128xf32>
    tpu.vector_store %arg13[%c0_385, %c0_386], %487 {strides = array<i32>} : memref<1x128xf32, #tpu.memory_space<vmem>>, vector<1x128xf32>,
    %489 = arith.index_cast %c1_i32_353 : i32 to index
    %c0_387 = arith.constant 0 : index
    %c0_388 = arith.constant 0 : index
    %490 = vector.load %arg9[%489, %c0_387, %c0_388] : memref<2x16x128xf32, #tpu.memory_space<vmem>>, vector<1x16x128xf32>
    %491 = vector.shape_cast %490 : vector<1x16x128xf32> to vector<16x128xf32>
    %492 = vector.shape_cast %477 : vector<16x128xf32> to vector<1x16x128xf32>
    tpu.vector_store %arg9[%489, %c0_387, %c0_388], %492 {strides = array<i32>} : memref<2x16x128xf32, #tpu.memory_space<vmem>>, vector<1x16x128xf32>,
    %c2_i32_389 = arith.constant 2 : i32
    %c2_390 = arith.constant 2 : index
    %c0_391 = arith.constant 0 : index
    %493 = vector.load %arg6[%c2_390, %c0_391] : memref<3x128xf32, #tpu.memory_space<vmem>>, vector<1x128xf32>
    %c2_392 = arith.constant 2 : index
    %c0_393 = arith.constant 0 : index
    %494 = vector.load %arg7[%c2_392, %c0_393] : memref<3x128xf32, #tpu.memory_space<vmem>>, vector<1x128xf32>
    %c0_394 = arith.constant 0 : index
    %c0_395 = arith.constant 0 : index
    %495 = vector.load %arg12[%c0_394, %c0_395] : memref<1x128xf32, #tpu.memory_space<vmem>>, vector<1x128xf32>
    %c0_396 = arith.constant 0 : index
    %c0_397 = arith.constant 0 : index
    %496 = vector.load %arg13[%c0_396, %c0_397] : memref<1x128xf32, #tpu.memory_space<vmem>>, vector<1x128xf32>
    %cst_398 = arith.constant 0.000000e+00 : f32
    %497 = vector.broadcast %cst_398 : f32 to vector<1x8xf32>
    %cst_399 = arith.constant 0.000000e+00 : f32
    %498 = vector.broadcast %cst_399 : f32 to vector<1x8xf32>
    %499 = vector.extract_strided_slice %495 {offsets = [0, 0], sizes = [1, 8], strides = [1, 1]} : vector<1x128xf32> to vector<1x8xf32>
    %500 = arith.addf %497, %499 : vector<1x8xf32>
    %501 = vector.extract_strided_slice %496 {offsets = [0, 0], sizes = [1, 8], strides = [1, 1]} : vector<1x128xf32> to vector<1x8xf32>
    %502 = arith.addf %498, %501 : vector<1x8xf32>
    %503 = vector.extract_strided_slice %495 {offsets = [0, 8], sizes = [1, 8], strides = [1, 1]} : vector<1x128xf32> to vector<1x8xf32>
    %504 = arith.addf %500, %503 : vector<1x8xf32>
    %505 = vector.extract_strided_slice %496 {offsets = [0, 8], sizes = [1, 8], strides = [1, 1]} : vector<1x128xf32> to vector<1x8xf32>
    %506 = arith.addf %502, %505 : vector<1x8xf32>
    %507 = vector.extract_strided_slice %495 {offsets = [0, 16], sizes = [1, 8], strides = [1, 1]} : vector<1x128xf32> to vector<1x8xf32>
    %508 = arith.addf %504, %507 : vector<1x8xf32>
    %509 = vector.extract_strided_slice %496 {offsets = [0, 16], sizes = [1, 8], strides = [1, 1]} : vector<1x128xf32> to vector<1x8xf32>
    %510 = arith.addf %506, %509 : vector<1x8xf32>
    %511 = vector.extract_strided_slice %495 {offsets = [0, 24], sizes = [1, 8], strides = [1, 1]} : vector<1x128xf32> to vector<1x8xf32>
    %512 = arith.addf %508, %511 : vector<1x8xf32>
    %513 = vector.extract_strided_slice %496 {offsets = [0, 24], sizes = [1, 8], strides = [1, 1]} : vector<1x128xf32> to vector<1x8xf32>
    %514 = arith.addf %510, %513 : vector<1x8xf32>
    %515 = vector.extract_strided_slice %495 {offsets = [0, 32], sizes = [1, 8], strides = [1, 1]} : vector<1x128xf32> to vector<1x8xf32>
    %516 = arith.addf %512, %515 : vector<1x8xf32>
    %517 = vector.extract_strided_slice %496 {offsets = [0, 32], sizes = [1, 8], strides = [1, 1]} : vector<1x128xf32> to vector<1x8xf32>
    %518 = arith.addf %514, %517 : vector<1x8xf32>
    %519 = vector.extract_strided_slice %495 {offsets = [0, 40], sizes = [1, 8], strides = [1, 1]} : vector<1x128xf32> to vector<1x8xf32>
    %520 = arith.addf %516, %519 : vector<1x8xf32>
    %521 = vector.extract_strided_slice %496 {offsets = [0, 40], sizes = [1, 8], strides = [1, 1]} : vector<1x128xf32> to vector<1x8xf32>
    %522 = arith.addf %518, %521 : vector<1x8xf32>
    %523 = vector.extract_strided_slice %495 {offsets = [0, 48], sizes = [1, 8], strides = [1, 1]} : vector<1x128xf32> to vector<1x8xf32>
    %524 = arith.addf %520, %523 : vector<1x8xf32>
    %525 = vector.extract_strided_slice %496 {offsets = [0, 48], sizes = [1, 8], strides = [1, 1]} : vector<1x128xf32> to vector<1x8xf32>
    %526 = arith.addf %522, %525 : vector<1x8xf32>
    %527 = vector.extract_strided_slice %495 {offsets = [0, 56], sizes = [1, 8], strides = [1, 1]} : vector<1x128xf32> to vector<1x8xf32>
    %528 = arith.addf %524, %527 : vector<1x8xf32>
    %529 = vector.extract_strided_slice %496 {offsets = [0, 56], sizes = [1, 8], strides = [1, 1]} : vector<1x128xf32> to vector<1x8xf32>
    %530 = arith.addf %526, %529 : vector<1x8xf32>
    %531 = vector.extract_strided_slice %495 {offsets = [0, 64], sizes = [1, 8], strides = [1, 1]} : vector<1x128xf32> to vector<1x8xf32>
    %532 = arith.addf %528, %531 : vector<1x8xf32>
    %533 = vector.extract_strided_slice %496 {offsets = [0, 64], sizes = [1, 8], strides = [1, 1]} : vector<1x128xf32> to vector<1x8xf32>
    %534 = arith.addf %530, %533 : vector<1x8xf32>
    %535 = vector.extract_strided_slice %495 {offsets = [0, 72], sizes = [1, 8], strides = [1, 1]} : vector<1x128xf32> to vector<1x8xf32>
    %536 = arith.addf %532, %535 : vector<1x8xf32>
    %537 = vector.extract_strided_slice %496 {offsets = [0, 72], sizes = [1, 8], strides = [1, 1]} : vector<1x128xf32> to vector<1x8xf32>
    %538 = arith.addf %534, %537 : vector<1x8xf32>
    %539 = vector.extract_strided_slice %495 {offsets = [0, 80], sizes = [1, 8], strides = [1, 1]} : vector<1x128xf32> to vector<1x8xf32>
    %540 = arith.addf %536, %539 : vector<1x8xf32>
    %541 = vector.extract_strided_slice %496 {offsets = [0, 80], sizes = [1, 8], strides = [1, 1]} : vector<1x128xf32> to vector<1x8xf32>
    %542 = arith.addf %538, %541 : vector<1x8xf32>
    %543 = vector.extract_strided_slice %495 {offsets = [0, 88], sizes = [1, 8], strides = [1, 1]} : vector<1x128xf32> to vector<1x8xf32>
    %544 = arith.addf %540, %543 : vector<1x8xf32>
    %545 = vector.extract_strided_slice %496 {offsets = [0, 88], sizes = [1, 8], strides = [1, 1]} : vector<1x128xf32> to vector<1x8xf32>
    %546 = arith.addf %542, %545 : vector<1x8xf32>
    %547 = vector.extract_strided_slice %495 {offsets = [0, 96], sizes = [1, 8], strides = [1, 1]} : vector<1x128xf32> to vector<1x8xf32>
    %548 = arith.addf %544, %547 : vector<1x8xf32>
    %549 = vector.extract_strided_slice %496 {offsets = [0, 96], sizes = [1, 8], strides = [1, 1]} : vector<1x128xf32> to vector<1x8xf32>
    %550 = arith.addf %546, %549 : vector<1x8xf32>
    %551 = vector.extract_strided_slice %495 {offsets = [0, 104], sizes = [1, 8], strides = [1, 1]} : vector<1x128xf32> to vector<1x8xf32>
    %552 = arith.addf %548, %551 : vector<1x8xf32>
    %553 = vector.extract_strided_slice %496 {offsets = [0, 104], sizes = [1, 8], strides = [1, 1]} : vector<1x128xf32> to vector<1x8xf32>
    %554 = arith.addf %550, %553 : vector<1x8xf32>
    %555 = vector.extract_strided_slice %495 {offsets = [0, 112], sizes = [1, 8], strides = [1, 1]} : vector<1x128xf32> to vector<1x8xf32>
    %556 = arith.addf %552, %555 : vector<1x8xf32>
    %557 = vector.extract_strided_slice %496 {offsets = [0, 112], sizes = [1, 8], strides = [1, 1]} : vector<1x128xf32> to vector<1x8xf32>
    %558 = arith.addf %554, %557 : vector<1x8xf32>
    %559 = vector.extract_strided_slice %495 {offsets = [0, 120], sizes = [1, 8], strides = [1, 1]} : vector<1x128xf32> to vector<1x8xf32>
    %560 = arith.addf %556, %559 : vector<1x8xf32>
    %561 = vector.extract_strided_slice %496 {offsets = [0, 120], sizes = [1, 8], strides = [1, 1]} : vector<1x128xf32> to vector<1x8xf32>
    %562 = arith.addf %558, %561 : vector<1x8xf32>
    %cst_400 = arith.constant 0.001953125 : f32
    %563 = vector.broadcast %cst_400 : f32 to vector<1x8xf32>
    %564 = arith.mulf %560, %563 : vector<1x8xf32>
    %cst_401 = arith.constant 0.001953125 : f32
    %565 = vector.broadcast %cst_401 : f32 to vector<1x8xf32>
    %566 = arith.mulf %562, %565 : vector<1x8xf32>
    %567 = arith.mulf %564, %564 : vector<1x8xf32>
    %568 = arith.subf %566, %567 : vector<1x8xf32>
    %cst_402 = arith.constant 0.000000e+00 : f32
    %569 = vector.broadcast %cst_402 : f32 to vector<1x8xf32>
    %570 = arith.maximumf %568, %569 : vector<1x8xf32>
    %cst_403 = arith.constant 9.99999974E-6 : f32
    %571 = vector.broadcast %cst_403 : f32 to vector<1x8xf32>
    %572 = arith.addf %570, %571 : vector<1x8xf32>
    %573 = math.rsqrt %572 : vector<1x8xf32>
    %c0_404 = arith.constant 0 : index
    %c0_405 = arith.constant 0 : index
    %574 = vector.load %arg12[%c0_404, %c0_405] : memref<1x128xf32, #tpu.memory_space<vmem>>, vector<1x8xf32>
    tpu.vector_store %arg12[%c0_404, %c0_405], %564 {strides = array<i32>} : memref<1x128xf32, #tpu.memory_space<vmem>>, vector<1x8xf32>,
    %c0_406 = arith.constant 0 : index
    %c0_407 = arith.constant 0 : index
    %575 = vector.load %arg13[%c0_406, %c0_407] : memref<1x128xf32, #tpu.memory_space<vmem>>, vector<1x8xf32>
    tpu.vector_store %arg13[%c0_406, %c0_407], %573 {strides = array<i32>} : memref<1x128xf32, #tpu.memory_space<vmem>>, vector<1x8xf32>,
    %c0_408 = arith.constant 0 : index
    %c8_409 = arith.constant 8 : index
    %576 = vector.load %arg12[%c0_408, %c8_409] : memref<1x128xf32, #tpu.memory_space<vmem>>, vector<1x8xf32>
    tpu.vector_store %arg12[%c0_408, %c8_409], %564 {strides = array<i32>} : memref<1x128xf32, #tpu.memory_space<vmem>>, vector<1x8xf32>,
    %c0_410 = arith.constant 0 : index
    %c8_411 = arith.constant 8 : index
    %577 = vector.load %arg13[%c0_410, %c8_411] : memref<1x128xf32, #tpu.memory_space<vmem>>, vector<1x8xf32>
    tpu.vector_store %arg13[%c0_410, %c8_411], %573 {strides = array<i32>} : memref<1x128xf32, #tpu.memory_space<vmem>>, vector<1x8xf32>,
    %c0_412 = arith.constant 0 : index
    %c16_413 = arith.constant 16 : index
    %578 = vector.load %arg12[%c0_412, %c16_413] : memref<1x128xf32, #tpu.memory_space<vmem>>, vector<1x8xf32>
    tpu.vector_store %arg12[%c0_412, %c16_413], %564 {strides = array<i32>} : memref<1x128xf32, #tpu.memory_space<vmem>>, vector<1x8xf32>,
    %c0_414 = arith.constant 0 : index
    %c16_415 = arith.constant 16 : index
    %579 = vector.load %arg13[%c0_414, %c16_415] : memref<1x128xf32, #tpu.memory_space<vmem>>, vector<1x8xf32>
    tpu.vector_store %arg13[%c0_414, %c16_415], %573 {strides = array<i32>} : memref<1x128xf32, #tpu.memory_space<vmem>>, vector<1x8xf32>,
    %c0_416 = arith.constant 0 : index
    %c24_417 = arith.constant 24 : index
    %580 = vector.load %arg12[%c0_416, %c24_417] : memref<1x128xf32, #tpu.memory_space<vmem>>, vector<1x8xf32>
    tpu.vector_store %arg12[%c0_416, %c24_417], %564 {strides = array<i32>} : memref<1x128xf32, #tpu.memory_space<vmem>>, vector<1x8xf32>,
    %c0_418 = arith.constant 0 : index
    %c24_419 = arith.constant 24 : index
    %581 = vector.load %arg13[%c0_418, %c24_419] : memref<1x128xf32, #tpu.memory_space<vmem>>, vector<1x8xf32>
    tpu.vector_store %arg13[%c0_418, %c24_419], %573 {strides = array<i32>} : memref<1x128xf32, #tpu.memory_space<vmem>>, vector<1x8xf32>,
    %c0_420 = arith.constant 0 : index
    %c32_421 = arith.constant 32 : index
    %582 = vector.load %arg12[%c0_420, %c32_421] : memref<1x128xf32, #tpu.memory_space<vmem>>, vector<1x8xf32>
    tpu.vector_store %arg12[%c0_420, %c32_421], %564 {strides = array<i32>} : memref<1x128xf32, #tpu.memory_space<vmem>>, vector<1x8xf32>,
    %c0_422 = arith.constant 0 : index
    %c32_423 = arith.constant 32 : index
    %583 = vector.load %arg13[%c0_422, %c32_423] : memref<1x128xf32, #tpu.memory_space<vmem>>, vector<1x8xf32>
    tpu.vector_store %arg13[%c0_422, %c32_423], %573 {strides = array<i32>} : memref<1x128xf32, #tpu.memory_space<vmem>>, vector<1x8xf32>,
    %c0_424 = arith.constant 0 : index
    %c40_425 = arith.constant 40 : index
    %584 = vector.load %arg12[%c0_424, %c40_425] : memref<1x128xf32, #tpu.memory_space<vmem>>, vector<1x8xf32>
    tpu.vector_store %arg12[%c0_424, %c40_425], %564 {strides = array<i32>} : memref<1x128xf32, #tpu.memory_space<vmem>>, vector<1x8xf32>,
    %c0_426 = arith.constant 0 : index
    %c40_427 = arith.constant 40 : index
    %585 = vector.load %arg13[%c0_426, %c40_427] : memref<1x128xf32, #tpu.memory_space<vmem>>, vector<1x8xf32>
    tpu.vector_store %arg13[%c0_426, %c40_427], %573 {strides = array<i32>} : memref<1x128xf32, #tpu.memory_space<vmem>>, vector<1x8xf32>,
    %c0_428 = arith.constant 0 : index
    %c48_429 = arith.constant 48 : index
    %586 = vector.load %arg12[%c0_428, %c48_429] : memref<1x128xf32, #tpu.memory_space<vmem>>, vector<1x8xf32>
    tpu.vector_store %arg12[%c0_428, %c48_429], %564 {strides = array<i32>} : memref<1x128xf32, #tpu.memory_space<vmem>>, vector<1x8xf32>,
    %c0_430 = arith.constant 0 : index
    %c48_431 = arith.constant 48 : index
    %587 = vector.load %arg13[%c0_430, %c48_431] : memref<1x128xf32, #tpu.memory_space<vmem>>, vector<1x8xf32>
    tpu.vector_store %arg13[%c0_430, %c48_431], %573 {strides = array<i32>} : memref<1x128xf32, #tpu.memory_space<vmem>>, vector<1x8xf32>,
    %c0_432 = arith.constant 0 : index
    %c56_433 = arith.constant 56 : index
    %588 = vector.load %arg12[%c0_432, %c56_433] : memref<1x128xf32, #tpu.memory_space<vmem>>, vector<1x8xf32>
    tpu.vector_store %arg12[%c0_432, %c56_433], %564 {strides = array<i32>} : memref<1x128xf32, #tpu.memory_space<vmem>>, vector<1x8xf32>,
    %c0_434 = arith.constant 0 : index
    %c56_435 = arith.constant 56 : index
    %589 = vector.load %arg13[%c0_434, %c56_435] : memref<1x128xf32, #tpu.memory_space<vmem>>, vector<1x8xf32>
    tpu.vector_store %arg13[%c0_434, %c56_435], %573 {strides = array<i32>} : memref<1x128xf32, #tpu.memory_space<vmem>>, vector<1x8xf32>,
    %c0_436 = arith.constant 0 : index
    %c64_437 = arith.constant 64 : index
    %590 = vector.load %arg12[%c0_436, %c64_437] : memref<1x128xf32, #tpu.memory_space<vmem>>, vector<1x8xf32>
    tpu.vector_store %arg12[%c0_436, %c64_437], %564 {strides = array<i32>} : memref<1x128xf32, #tpu.memory_space<vmem>>, vector<1x8xf32>,
    %c0_438 = arith.constant 0 : index
    %c64_439 = arith.constant 64 : index
    %591 = vector.load %arg13[%c0_438, %c64_439] : memref<1x128xf32, #tpu.memory_space<vmem>>, vector<1x8xf32>
    tpu.vector_store %arg13[%c0_438, %c64_439], %573 {strides = array<i32>} : memref<1x128xf32, #tpu.memory_space<vmem>>, vector<1x8xf32>,
    %c0_440 = arith.constant 0 : index
    %c72_441 = arith.constant 72 : index
    %592 = vector.load %arg12[%c0_440, %c72_441] : memref<1x128xf32, #tpu.memory_space<vmem>>, vector<1x8xf32>
    tpu.vector_store %arg12[%c0_440, %c72_441], %564 {strides = array<i32>} : memref<1x128xf32, #tpu.memory_space<vmem>>, vector<1x8xf32>,
    %c0_442 = arith.constant 0 : index
    %c72_443 = arith.constant 72 : index
    %593 = vector.load %arg13[%c0_442, %c72_443] : memref<1x128xf32, #tpu.memory_space<vmem>>, vector<1x8xf32>
    tpu.vector_store %arg13[%c0_442, %c72_443], %573 {strides = array<i32>} : memref<1x128xf32, #tpu.memory_space<vmem>>, vector<1x8xf32>,
    %c0_444 = arith.constant 0 : index
    %c80_445 = arith.constant 80 : index
    %594 = vector.load %arg12[%c0_444, %c80_445] : memref<1x128xf32, #tpu.memory_space<vmem>>, vector<1x8xf32>
    tpu.vector_store %arg12[%c0_444, %c80_445], %564 {strides = array<i32>} : memref<1x128xf32, #tpu.memory_space<vmem>>, vector<1x8xf32>,
    %c0_446 = arith.constant 0 : index
    %c80_447 = arith.constant 80 : index
    %595 = vector.load %arg13[%c0_446, %c80_447] : memref<1x128xf32, #tpu.memory_space<vmem>>, vector<1x8xf32>
    tpu.vector_store %arg13[%c0_446, %c80_447], %573 {strides = array<i32>} : memref<1x128xf32, #tpu.memory_space<vmem>>, vector<1x8xf32>,
    %c0_448 = arith.constant 0 : index
    %c88_449 = arith.constant 88 : index
    %596 = vector.load %arg12[%c0_448, %c88_449] : memref<1x128xf32, #tpu.memory_space<vmem>>, vector<1x8xf32>
    tpu.vector_store %arg12[%c0_448, %c88_449], %564 {strides = array<i32>} : memref<1x128xf32, #tpu.memory_space<vmem>>, vector<1x8xf32>,
    %c0_450 = arith.constant 0 : index
    %c88_451 = arith.constant 88 : index
    %597 = vector.load %arg13[%c0_450, %c88_451] : memref<1x128xf32, #tpu.memory_space<vmem>>, vector<1x8xf32>
    tpu.vector_store %arg13[%c0_450, %c88_451], %573 {strides = array<i32>} : memref<1x128xf32, #tpu.memory_space<vmem>>, vector<1x8xf32>,
    %c0_452 = arith.constant 0 : index
    %c96_453 = arith.constant 96 : index
    %598 = vector.load %arg12[%c0_452, %c96_453] : memref<1x128xf32, #tpu.memory_space<vmem>>, vector<1x8xf32>
    tpu.vector_store %arg12[%c0_452, %c96_453], %564 {strides = array<i32>} : memref<1x128xf32, #tpu.memory_space<vmem>>, vector<1x8xf32>,
    %c0_454 = arith.constant 0 : index
    %c96_455 = arith.constant 96 : index
    %599 = vector.load %arg13[%c0_454, %c96_455] : memref<1x128xf32, #tpu.memory_space<vmem>>, vector<1x8xf32>
    tpu.vector_store %arg13[%c0_454, %c96_455], %573 {strides = array<i32>} : memref<1x128xf32, #tpu.memory_space<vmem>>, vector<1x8xf32>,
    %c0_456 = arith.constant 0 : index
    %c104_457 = arith.constant 104 : index
    %600 = vector.load %arg12[%c0_456, %c104_457] : memref<1x128xf32, #tpu.memory_space<vmem>>, vector<1x8xf32>
    tpu.vector_store %arg12[%c0_456, %c104_457], %564 {strides = array<i32>} : memref<1x128xf32, #tpu.memory_space<vmem>>, vector<1x8xf32>,
    %c0_458 = arith.constant 0 : index
    %c104_459 = arith.constant 104 : index
    %601 = vector.load %arg13[%c0_458, %c104_459] : memref<1x128xf32, #tpu.memory_space<vmem>>, vector<1x8xf32>
    tpu.vector_store %arg13[%c0_458, %c104_459], %573 {strides = array<i32>} : memref<1x128xf32, #tpu.memory_space<vmem>>, vector<1x8xf32>,
    %c0_460 = arith.constant 0 : index
    %c112_461 = arith.constant 112 : index
    %602 = vector.load %arg12[%c0_460, %c112_461] : memref<1x128xf32, #tpu.memory_space<vmem>>, vector<1x8xf32>
    tpu.vector_store %arg12[%c0_460, %c112_461], %564 {strides = array<i32>} : memref<1x128xf32, #tpu.memory_space<vmem>>, vector<1x8xf32>,
    %c0_462 = arith.constant 0 : index
    %c112_463 = arith.constant 112 : index
    %603 = vector.load %arg13[%c0_462, %c112_463] : memref<1x128xf32, #tpu.memory_space<vmem>>, vector<1x8xf32>
    tpu.vector_store %arg13[%c0_462, %c112_463], %573 {strides = array<i32>} : memref<1x128xf32, #tpu.memory_space<vmem>>, vector<1x8xf32>,
    %c0_464 = arith.constant 0 : index
    %c120_465 = arith.constant 120 : index
    %604 = vector.load %arg12[%c0_464, %c120_465] : memref<1x128xf32, #tpu.memory_space<vmem>>, vector<1x8xf32>
    tpu.vector_store %arg12[%c0_464, %c120_465], %564 {strides = array<i32>} : memref<1x128xf32, #tpu.memory_space<vmem>>, vector<1x8xf32>,
    %c0_466 = arith.constant 0 : index
    %c120_467 = arith.constant 120 : index
    %605 = vector.load %arg13[%c0_466, %c120_467] : memref<1x128xf32, #tpu.memory_space<vmem>>, vector<1x8xf32>
    tpu.vector_store %arg13[%c0_466, %c120_467], %573 {strides = array<i32>} : memref<1x128xf32, #tpu.memory_space<vmem>>, vector<1x8xf32>,
    %c0_468 = arith.constant 0 : index
    %c0_469 = arith.constant 0 : index
    %606 = vector.load %arg13[%c0_468, %c0_469] : memref<1x128xf32, #tpu.memory_space<vmem>>, vector<1x128xf32>
    %607 = arith.mulf %493, %606 : vector<1x128xf32>
    %c0_470 = arith.constant 0 : index
    %c0_471 = arith.constant 0 : index
    %608 = vector.load %arg12[%c0_470, %c0_471] : memref<1x128xf32, #tpu.memory_space<vmem>>, vector<1x128xf32>
    %609 = arith.mulf %608, %607 : vector<1x128xf32>
    %610 = arith.subf %494, %609 : vector<1x128xf32>
    %c0_472 = arith.constant 0 : index
    %c0_473 = arith.constant 0 : index
    %c0_474 = arith.constant 0 : index
    %611 = vector.load %arg9[%c0_472, %c0_473, %c0_474] : memref<2x16x128xf32, #tpu.memory_space<vmem>>, vector<2x16x128xf32>
    %612 = vector.shape_cast %607 : vector<1x128xf32> to vector<1x1x128xf32>
    %613 = vector.broadcast %612 : vector<1x1x128xf32> to vector<2x16x128xf32>
    %614 = arith.mulf %611, %613 : vector<2x16x128xf32>
    %615 = vector.shape_cast %610 : vector<1x128xf32> to vector<1x1x128xf32>
    %616 = vector.broadcast %615 : vector<1x1x128xf32> to vector<2x16x128xf32>
    %617 = arith.addf %614, %616 : vector<2x16x128xf32>
    %c0_475 = arith.constant 0 : index
    %c0_476 = arith.constant 0 : index
    %c0_477 = arith.constant 0 : index
    %618 = vector.load %arg8[%c0_475, %c0_476, %c0_477] : memref<2x16x128xf32, #tpu.memory_space<vmem>>, vector<2x16x128xf32>
    tpu.vector_store %arg8[%c0_475, %c0_476, %c0_477], %617 {strides = array<i32>} : memref<2x16x128xf32, #tpu.memory_space<vmem>>, vector<2x16x128xf32>,
    return
  }
  func.func @transform_0(%arg0: i32) -> (i32, i32, i32) {
    %c0_i32 = arith.constant 0 : i32
    %c0_i32_0 = arith.constant 0 : i32
    %c0_i32_1 = arith.constant 0 : i32
    %c0_i32_2 = arith.constant 0 : i32
    return %c0_i32, %c0_i32_0, %c0_i32_1 : i32, i32, i32
  }
  func.func @transform_1(%arg0: i32) -> (i32, i32, i32) {
    %c0_i32 = arith.constant 0 : i32
    %c0_i32_0 = arith.constant 0 : i32
    %c0_i32_1 = arith.constant 0 : i32
    %c0_i32_2 = arith.constant 0 : i32
    return %c0_i32, %c0_i32_0, %c0_i32_1 : i32, i32, i32
  }
  func.func @transform_2(%arg0: i32) -> (i32, i32, i32) {
    %c0_i32 = arith.constant 0 : i32
    %c0_i32_0 = arith.constant 0 : i32
    %c0_i32_1 = arith.constant 0 : i32
    %c0_i32_2 = arith.constant 0 : i32
    return %c0_i32, %c0_i32_0, %c0_i32_1 : i32, i32, i32
  }
  func.func @transform_3(%arg0: i32) -> (i32, i32, i32) {
    %c0_i32 = arith.constant 0 : i32
    %c0_i32_0 = arith.constant 0 : i32
    %c0_i32_1 = arith.constant 0 : i32
    %c0_i32_2 = arith.constant 0 : i32
    return %c0_i32, %c0_i32_0, %c0_i32_1 : i32, i32, i32
  }
  func.func @transform_4(%arg0: i32) -> (i32, i32) {
    %c0_i32 = arith.constant 0 : i32
    %c0_i32_0 = arith.constant 0 : i32
    %c0_i32_1 = arith.constant 0 : i32
    return %c0_i32, %c0_i32_0 : i32, i32
  }
  func.func @transform_5(%arg0: i32) -> (i32, i32) {
    %c0_i32 = arith.constant 0 : i32
    %c0_i32_0 = arith.constant 0 : i32
    %c0_i32_1 = arith.constant 0 : i32
    return %c0_i32, %c0_i32_0 : i32, i32
  }
  func.func @transform_6(%arg0: i32) -> (i32, i32) {
    %c0_i32 = arith.constant 0 : i32
    %c0_i32_0 = arith.constant 0 : i32
    %c0_i32_1 = arith.constant 0 : i32
    return %c0_i32, %c0_i32_0 : i32, i32
  }
  func.func @transform_7(%arg0: i32) -> (i32, i32, i32) {
    %c0_i32 = arith.constant 0 : i32
    %c0_i32_0 = arith.constant 0 : i32
    %c0_i32_1 = arith.constant 0 : i32
    %c0_i32_2 = arith.constant 0 : i32
    return %c0_i32, %c0_i32_0, %c0_i32_1 : i32, i32, i32
  }
}

</mosaic_0001>

<bundles_post_ra>
// kernel: tile.48
= control target key start
LH: loop header
LB: loop body
LE: loop exit
PB: predicated region body
PF: predicated region fallthrough
CT: control target
= control target key end

     0   :  { %s28_s0 = inlined_call_operand.vmem [shape: f32[8], index: 0, kind: input, shape index: {}]   ;;  %s29_s1 = inlined_call_operand.vmem [shape: f32[16,8], index: 1, kind: output, shape index: {}]  }
   0x1   :  { %v4_v0 = vld [vmem:[%s28_s0] ss:$0 sm:$0xff] }
   0x2   :  { %5 = vst [vmem:[%s29_s1] sm:$0xff] %v4_v0  ;;  %8 = vst [vmem:[%s29_s1 + $0x8] sm:$0xff] %v4_v0 }

// kernel: tile.57
= control target key start
LH: loop header
LB: loop body
LE: loop exit
PB: predicated region body
PF: predicated region fallthrough
CT: control target
= control target key end

     0   :  { %s131_s10 = smov 120   ;;  %s132_s11 = smov 104   ;;  %vm3_vm0 = vcmask 64512   ;;  %vm9_vm1 = vcmask 1048512   ;;  %vm15_vm2 = vcmask 982912   ;;  %vm21_vm3 = vcmask 917312   ;;  %s207_s0 = inlined_call_operand.vmem [shape: f32[16,8], index: 0, kind: input, shape index: {}]   ;;  %s208_s1 = inlined_call_operand.vmem [shape: f32[1,128], index: 1, kind: output, shape index: {}]  }
   0x1   :  { %v101_v0 = vld [vmem:[%s207_s0 + $0xf] sm:$0x1]   ;;  %v103_v1 = vld [vmem:[%s207_s0 + $0xd] sm:$0x1]   ;;  %v102_v2 = vld [vmem:[%s207_s0 + $0xe] sm:$0x1]  }
   0x2   :  { %7 = vrot.lane.b32.xlu0 %v101_v0, %s131_s10  ;;  %19 = vrot.lane.b32.xlu1 %v103_v1, %s132_s11  ;;  %v104_v3 = vld [vmem:[%s207_s0 + $0xc] sm:$0x1]   ;;  %s133_s16 = smov 112   ;;  %s134_s17 = smov 96   ;;  %v105_v4 = vld [vmem:[%s207_s0 + $0xb] sm:$0x1]  }
   0x3   :  { %v106_v5 = vld [vmem:[%s207_s0 + $0xa] sm:$0x1]   ;;  %v2_v6 = vld [vmem:[%s207_s0] sm:$0x1]   ;;  %s135_s24 = smov 88   ;;  %s136_s25 = smov 80  }
   0x4   :  { %4 = vst.msk [vmem:[#allocation0] sm:$0x1] %vm3_vm0, %v2_v6   ;;  %v107_v7 = vld [vmem:[%s207_s0 + $0x9] sm:$0x1]   ;;  %v108_v8 = vld [vmem:[%s207_s0 + $0x8] sm:$0x1]  }
   0x5   :  { %s137_s30 = smov 72   ;;  %s138_s2 = smov 64   ;;  %v109_v9 = vld [vmem:[%s207_s0 + $0x7] sm:$0x1]   ;;  %v110_v10 = vld [vmem:[%s207_s0 + $0x6] sm:$0x1]  }
   0x6   :  { %13 = vrot.lane.b32.xlu0 %v102_v2, %s133_s16  ;;  %25 = vrot.lane.b32.xlu1 %v104_v3, %s134_s17  ;;  %s139_s7 = smov 56   ;;  %s140_s8 = smov 48   ;;  %v111_v11 = vld [vmem:[%s207_s0 + $0x5] sm:$0x1]   ;;  %v112_v12 = vld [vmem:[%s207_s0 + $0x4] sm:$0x1]  }
   0x7   :  { %s141_s13 = smov 40   ;;  %s142_s14 = smov 32   ;;  %v113_v13 = vld [vmem:[%s207_s0 + $0x3] sm:$0x1]   ;;  %v114_v14 = vld [vmem:[%s207_s0 + $0x2] sm:$0x1]  }
   0x8   :  { %s143_s19 = smov 24   ;;  %s144_s20 = smov 16   ;;  %v115_v15 = vld [vmem:[%s207_s0 + $0x1] sm:$0x1]   ;;  %vm27_vm4 = vcmask 851712   ;;  %vm33_vm5 = vcmask 786112  }
   0x9   :  { %s145_s0 = smov 8   ;;  %vm39_vm6 = vcmask 720512   ;;  %vm45_vm7 = vcmask 654912   ;;  %vm51_vm8 = vcmask 589312   ;;  %vm57_vm9 = vcmask 523712  }
   0xa   :  { %31 = vrot.lane.b32.xlu0 %v105_v4, %s135_s24  ;;  %37 = vrot.lane.b32.xlu1 %v106_v5, %s136_s25  ;;  %vm63_vm10 = vcmask 458112   ;;  %vm69_vm11 = vcmask 392512   ;;  %vm75_vm12 = vcmask 326912   ;;  %vm81_vm13 = vcmask 261312  }
   0xb   :  { %vm87_vm14 = vcmask 195712   ;;  %vm93_vm15 = vcmask 130112  }
   0xe   :  { %43 = vrot.lane.b32.xlu0 %v107_v7, %s137_s30  ;;  %49 = vrot.lane.b32.xlu1 %v108_v8, %s138_s2 }
  0x12   :  { %55 = vrot.lane.b32.xlu0 %v109_v9, %s139_s7  ;;  %61 = vrot.lane.b32.xlu1 %v110_v10, %s140_s8 }
  0x16   :  { %67 = vrot.lane.b32.xlu0 %v111_v11, %s141_s13  ;;  %73 = vrot.lane.b32.xlu1 %v112_v12, %s142_s14 }
  0x1a   :  { %79 = vrot.lane.b32.xlu0 %v113_v13, %s143_s19  ;;  %85 = vrot.lane.b32.xlu1 %v114_v14, %s144_s20 }
  0x1e   :  { %91 = vrot.lane.b32.xlu0 %v115_v15, %s145_s0 }
  0x74   :  { %v8_v16 = vpop.permute.xlu0 %7   ;;  %v20_v17 = vpop.permute.xlu1 %19  }
  0x75   :  { %10 = vst.msk [vmem:[#allocation0] sm:$0x1] %vm9_vm1, %v8_v16  }
  0x78   :  { %v14_v18 = vpop.permute.xlu0 %13   ;;  %v26_v19 = vpop.permute.xlu1 %25  }
  0x79   :  { %16 = vst.msk [vmem:[#allocation0] sm:$0x1] %vm15_vm2, %v14_v18  }
  0x7a   :  { %22 = vst.msk [vmem:[#allocation0] sm:$0x1] %vm21_vm3, %v20_v17  }
  0x7b   :  { %28 = vst.msk [vmem:[#allocation0] sm:$0x1] %vm27_vm4, %v26_v19  }
  0x7c   :  { %v32_v20 = vpop.permute.xlu0 %31   ;;  %v38_v21 = vpop.permute.xlu1 %37  }
  0x7d   :  { %34 = vst.msk [vmem:[#allocation0] sm:$0x1] %vm33_vm5, %v32_v20  }
  0x7e   :  { %40 = vst.msk [vmem:[#allocation0] sm:$0x1] %vm39_vm6, %v38_v21  }
  0x80   :  { %v44_v22 = vpop.permute.xlu0 %43   ;;  %v50_v23 = vpop.permute.xlu1 %49  }
  0x81   :  { %46 = vst.msk [vmem:[#allocation0] sm:$0x1] %vm45_vm7, %v44_v22  }
  0x82   :  { %52 = vst.msk [vmem:[#allocation0] sm:$0x1] %vm51_vm8, %v50_v23  }
  0x84   :  { %v56_v24 = vpop.permute.xlu0 %55   ;;  %v62_v25 = vpop.permute.xlu1 %61  }
  0x85   :  { %58 = vst.msk [vmem:[#allocation0] sm:$0x1] %vm57_vm9, %v56_v24  }
  0x86   :  { %64 = vst.msk [vmem:[#allocation0] sm:$0x1] %vm63_vm10, %v62_v25  }
  0x88   :  { %v68_v26 = vpop.permute.xlu0 %67   ;;  %v74_v27 = vpop.permute.xlu1 %73  }
  0x89   :  { %70 = vst.msk [vmem:[#allocation0] sm:$0x1] %vm69_vm11, %v68_v26  }
  0x8a   :  { %76 = vst.msk [vmem:[#allocation0] sm:$0x1] %vm75_vm12, %v74_v27  }
  0x8c   :  { %v80_v28 = vpop.permute.xlu0 %79   ;;  %v86_v29 = vpop.permute.xlu1 %85  }
  0x8d   :  { %82 = vst.msk [vmem:[#allocation0] sm:$0x1] %vm81_vm13, %v80_v28  }
  0x8e   :  { %88 = vst.msk [vmem:[#allocation0] sm:$0x1] %vm87_vm14, %v86_v29  }
  0x90   :  { %v92_v30 = vpop.permute.xlu0 %91  }
  0x91   :  { %94 = vst.msk [vmem:[#allocation0] sm:$0x1] %vm93_vm15, %v92_v30  }
  0x98   :  { %v98_v31 = vld [vmem:[#allocation0] sm:$0x1] }
  0x99   :  { %100 = vst [vmem:[%s208_s1] sm:$0x1] %v98_v31 }

// kernel: eleven_conv_block.1
= control target key start
LH: loop header
LB: loop body
LE: loop exit
PB: predicated region body
PF: predicated region fallthrough
CT: control target
= control target key end

     0   :  { %vm27_vm0 = vcmask 130048   ;;  %v4160_v3 = vmov 0.0|0.0   ;;  %v4161_v4 = vmov 0.0   ;;  %vm5960_vm1 = vcmask 123904   ;;  %s4162_s18 = smov 8   ;;  %s4163_s26 = smov 120   ;;  %s5939_s0 = inlined_call_operand.vmem [shape: f32[2,16,128], index: 0, kind: input, shape index: {}]   ;;  %s5940_s1 = inlined_call_operand.vmem [shape: f32[3,144,128], index: 1, kind: input, shape index: {}]   ;;  %s5941_s4 = inlined_call_operand.vmem [shape: f32[3,128], index: 4, kind: input, shape index: {}]   ;;  %s5942_s2 = inlined_call_operand.vmem [shape: f32[3,160,128], index: 2, kind: input, shape index: {}]   ;;  %s5943_s5 = inlined_call_operand.vmem [shape: f32[3,128], index: 5, kind: input, shape index: {}]   ;;  %s5944_s6 = inlined_call_operand.vmem [shape: f32[3,128], index: 6, kind: input, shape index: {}]   ;;  %s5945_s3 = inlined_call_operand.vmem [shape: f32[3,160,128], index: 3, kind: input, shape index: {}]   ;;  %s5946_s7 = inlined_call_operand.vmem [shape: f32[2,16,128], index: 7, kind: output, shape index: {}]  }
   0x1   :  { %v45_v0 = vld [vmem:[%s5939_s0] sm:$0xff]  ;;  %v46_v1 = vld [vmem:[%s5939_s0 + $0x8] sm:$0xff]  ;;  %v3384_v2 = vld [vmem:[%s5939_s0 + $0x10] sm:$0xff]  ;;  %3641 = vmatprep.subr.bf16.mxu1 %v4160_v3  ;;  %3614 = vmatprep.subr.bf16.mxu0 %v4160_v3  ;;  %26 = vst [vmem:[#allocation3] sm:$0xff] %v4161_v4  ;;  %vm49_vm2 = vcmask 1040384   ;;  %vm62_vm3 = vcmask 1047617  }
   0x2   :  { %28 = vst.msk [vmem:[#allocation3 + $0x8] sm:$0xff] %vm27_vm0, %v4161_v4  ;;  %29 = vst [vmem:[#allocation3 + $0x10] sm:$0xff] %v4161_v4  ;;  %v50_v5 = vrot.slane %v45_v0, 7  ;;  %v51_v6 = vrot.slane %v46_v1, 7  ;;  %v3385_v7 = vld [vmem:[%s5939_s0 + $0x18] sm:$0xff]  ;;  %v78_v8 = vld [vmem:[%s5940_s1] sm:$0xff] }
   0x3   :  { %30 = vst.msk [vmem:[#allocation3 + $0x18] sm:$0xff] %vm27_vm0, %v4161_v4  ;;  %31 = vst [vmem:[#allocation3 + $0x20] sm:$0x3] %v4161_v4  ;;  %v79_v9 = vld [vmem:[%s5940_s1 + $0x8] sm:$0xff]  ;;  %v80_v11 = vld [vmem:[%s5940_s1 + $0x10] sm:$0xff]  ;;  %v455_v14 = vrot.slane %v3384_v2, 7 }
   0x4   :  { %34 = vst [vmem:[#allocation4] sm:$0xff] %v4161_v4  ;;  %37 = vst [vmem:[#allocation4 + $0x10] sm:$0xff] %v4161_v4  ;;  %v4240_v10 = vpack.c.bf16 %v79_v9, %v78_v8  ;;  %v81_v12 = vld [vmem:[%s5940_s1 + $0x18] sm:$0xff]  ;;  %v3341_v13 = vld [vmem:[%s5940_s1 + $0x90] sm:$0xff]  ;;  %53 = vrot.lane.b32.xlu0 %v50_v5, %s4162_s18  ;;  %57 = vrot.lane.b32.xlu1 %v51_v6, %s4162_s18  ;;  %v52_v16 = vsel %vm49_vm2, %v50_v5, %v51_v6  ;;  %v456_v17 = vrot.slane %v3385_v7, 7  ;;  %vm64_vm4 = vcmask 64513  }
   0x5   :  { %39 = vst [vmem:[#allocation4 + $0x20] sm:$0xf] %v4161_v4  ;;  %43 = vst [vmem:[#allocation5] sm:$0x1] %v4161_v4  ;;  %v3342_v15 = vld [vmem:[%s5940_s1 + $0x98] sm:$0xff]  ;;  %v4258_v18 = vpack.c.bf16 %v81_v12, %v80_v11  ;;  %v3343_v20 = vld [vmem:[%s5940_s1 + $0xa0] sm:$0xff] }
   0x6   :  { %44 = vst [vmem:[#allocation6] sm:$0x1] %v4161_v4  ;;  %33 = vst.msk [vmem:[#allocation3 + $0x28] sm:$0x3] %vm5960_vm1, %v4161_v4  ;;  %3643 = vmatpush1.bf16.msra.mxu1 %v4240_v10  ;;  %v4260_v19 = vpack.c.bf16 %v3342_v15, %v3341_v13  ;;  %v3344_v21 = vld [vmem:[%s5940_s1 + $0xa8] sm:$0xff]  ;;  %v82_v22 = vld [vmem:[%s5940_s1 + $0x20] sm:$0xff]  ;;  %v457_v27 = vsel %vm49_vm2, %v455_v14, %v456_v17 }
   0x7   :  { %3644 = vmatprep.subr.bf16.mxu1 %v4160_v3  ;;  %v83_v23 = vld [vmem:[%s5940_s1 + $0x28] sm:$0xff]  ;;  %v4276_v24 = vpack.c.bf16 %v3344_v21, %v3343_v20  ;;  %v3345_v25 = vld [vmem:[%s5940_s1 + $0xb0] sm:$0xff]  ;;  %v3346_v26 = vld [vmem:[%s5940_s1 + $0xb8] sm:$0xff]  ;;  %vm70_vm5 = vcmask 1040448   ;;  %vm5947_vm6 = vcmask 57344   ;;  %vm66_vm7 = vcmask 1047616  }
   0x8   :  { %3616 = vmatpush1.bf16.msra.mxu0 %v4260_v19  ;;  %55 = vrot.lane.b32.xlu0 %v52_v16, %s4162_s18  ;;  %v4288_v28 = vpack.c.bf16 %v83_v23, %v82_v22  ;;  %v84_v29 = vld [vmem:[%s5940_s1 + $0x30] sm:$0xff]  ;;  %v85_v30 = vld [vmem:[%s5940_s1 + $0x38] sm:$0xff]  ;;  %v4299_v31 = vpack.c.bf16 %v3346_v26, %v3345_v25  ;;  %v3347_v32 = vld [vmem:[%s5940_s1 + $0xc0] sm:$0xff]  ;;  %vm68_vm8 = vcmask 64512   ;;  %vm125_vm9 = vcmask 1046528   ;;  %s4164_s27 = smov 112  }
   0x9   :  { %458 = vrot.lane.b32.xlu1 %v455_v14, %s4162_s18  ;;  %3617 = vmatprep.subr.bf16.mxu0 %v4160_v3  ;;  %v3348_v33 = vld [vmem:[%s5940_s1 + $0xc8] sm:$0xff]  ;;  %v4310_v34 = vpack.c.bf16 %v85_v30, %v84_v29  ;;  %v86_v35 = vld [vmem:[%s5940_s1 + $0x40] sm:$0xff]  ;;  %v3349_v38 = vld [vmem:[%s5940_s1 + $0xd0] sm:$0xff]  ;;  %vm5958_vm10 = vcmask 1045504   ;;  %s4165_s28 = smov 104   ;;  %s4166_s29 = smov 96  }
   0xa   :  { %3646 = vmatpush1.bf16.msra.mxu1 %v4258_v18  ;;  %v87_v36 = vld [vmem:[%s5940_s1 + $0x48] sm:$0xff]  ;;  %v4321_v37 = vpack.c.bf16 %v3348_v33, %v3347_v32  ;;  %v3350_v39 = vld [vmem:[%s5940_s1 + $0xd8] sm:$0xff]  ;;  %v88_v41 = vld [vmem:[%s5940_s1 + $0x50] sm:$0xff]  ;;  %s4167_s30 = smov 88   ;;  %s4168_s8 = smov 80   ;;  %vm5959_vm11 = vcmask 261120  }
   0xb   :  { %3647 = vmatprep.subr.bf16.mxu1 %v4160_v3  ;;  %v4331_v40 = vpack.c.bf16 %v87_v36, %v86_v35  ;;  %v89_v42 = vld [vmem:[%s5940_s1 + $0x58] sm:$0xff]  ;;  %v4341_v43 = vpack.c.bf16 %v3350_v39, %v3349_v38  ;;  %v3351_v44 = vld [vmem:[%s5940_s1 + $0xe0] sm:$0xff]  ;;  %v3352_v45 = vld [vmem:[%s5940_s1 + $0xe8] sm:$0xff]  ;;  %s4169_s9 = smov 72   ;;  %s4170_s10 = smov 64   ;;  %vm987_vm12 = vcmask 122944  }
   0xc   :  { %3619 = vmatpush1.bf16.msra.mxu0 %v4276_v24  ;;  %460 = vrot.lane.b32.xlu0 %v457_v27, %s4162_s18  ;;  %v4351_v46 = vpack.c.bf16 %v89_v42, %v88_v41  ;;  %v90_v47 = vld [vmem:[%s5940_s1 + $0x60] sm:$0xff]  ;;  %v91_v48 = vld [vmem:[%s5940_s1 + $0x68] sm:$0xff]  ;;  %v4361_v49 = vpack.c.bf16 %v3352_v45, %v3351_v44  ;;  %v3353_v50 = vld [vmem:[%s5940_s1 + $0xf0] sm:$0xff]  ;;  %s4171_s11 = smov 56   ;;  %s4172_s12 = smov 48   ;;  %vm1001_vm13 = vcmask 188544  }
   0xd   :  { %462 = vrot.lane.b32.xlu1 %v456_v17, %s4162_s18  ;;  %3620 = vmatprep.subr.bf16.mxu0 %v4160_v3  ;;  %v3354_v51 = vld [vmem:[%s5940_s1 + $0xf8] sm:$0xff]  ;;  %v4371_v52 = vpack.c.bf16 %v91_v48, %v90_v47  ;;  %v92_v53 = vld [vmem:[%s5940_s1 + $0x70] sm:$0xff]  ;;  %v3355_v56 = vld [vmem:[%s5940_s1 + $0x100] sm:$0xff]  ;;  %s4173_s13 = smov 40   ;;  %s4174_s14 = smov 32   ;;  %vm5948_vm14 = vcmask 254144  }
   0xe   :  { %3649 = vmatpush1.bf16.msra.mxu1 %v4288_v28  ;;  %v93_v54 = vld [vmem:[%s5940_s1 + $0x78] sm:$0xff]  ;;  %v4381_v55 = vpack.c.bf16 %v3354_v51, %v3353_v50  ;;  %v3356_v57 = vld [vmem:[%s5940_s1 + $0x108] sm:$0xff]  ;;  %v94_v59 = vld [vmem:[%s5940_s1 + $0x80] sm:$0xff]  ;;  %s4175_s15 = smov 24   ;;  %s4176_s16 = smov 16   ;;  %vm5961_vm15 = vcmask 319744  }
   0xf   :  { %3650 = vmatprep.subr.bf16.mxu1 %v4160_v3  ;;  %v4391_v58 = vpack.c.bf16 %v93_v54, %v92_v53  ;;  %v95_v60 = vld [vmem:[%s5940_s1 + $0x88] sm:$0xff]  ;;  %v4401_v61 = vpack.c.bf16 %v3356_v57, %v3355_v56  ;;  %v3357_v62 = vld [vmem:[%s5940_s1 + $0x110] sm:$0xff]  ;;  %v3358_v63 = vld [vmem:[%s5940_s1 + $0x118] sm:$0xff]  ;;  %vm5949_vm2 = vcmask 385344  }
  0x10   :  { %3622 = vmatpush1.bf16.msra.mxu0 %v4299_v31  ;;  %v4411_v0 = vpack.c.bf16 %v95_v60, %v94_v59  ;;  %v4415_v1 = vpack.c.bf16 %v3358_v63, %v3357_v62  ;;  %v3363_v11 = vld [vmem:[%s5940_s1 + $0x120] sm:$0xff]  ;;  %v3364_v12 = vld [vmem:[%s5940_s1 + $0x128] sm:$0xff]  ;;  %v3365_v38 = vld [vmem:[%s5940_s1 + $0x130] sm:$0xff] }
  0x11   :  { %3623 = vmatprep.subr.bf16.mxu0 %v4160_v3  ;;  %v4458_v33 = vpack.c.bf16 %v3364_v12, %v3363_v11  ;;  %v3366_v39 = vld [vmem:[%s5940_s1 + $0x138] sm:$0xff]  ;;  %v3367_v48 = vld [vmem:[%s5940_s1 + $0x140] sm:$0xff]  ;;  %v3368_v50 = vld [vmem:[%s5940_s1 + $0x148] sm:$0xff] }
  0x12   :  { %3652 = vmatpush1.bf16.msra.mxu1 %v4310_v34  ;;  %v4475_v44 = vpack.c.bf16 %v3366_v39, %v3365_v38  ;;  %v4495_v57 = vpack.c.bf16 %v3368_v50, %v3367_v48  ;;  %v3369_v59 = vld [vmem:[%s5940_s1 + $0x150] sm:$0xff]  ;;  %v3370_v60 = vld [vmem:[%s5940_s1 + $0x158] sm:$0xff] }
  0x13   :  { %3653 = vmatprep.subr.bf16.mxu1 %v4160_v3  ;;  %v4509_v63 = vpack.c.bf16 %v3370_v60, %v3369_v59  ;;  %v3377_v12 = vld [vmem:[%s5940_s1 + $0x190] sm:$0xff] }
  0x14   :  { %3625 = vmatpush1.bf16.msra.mxu0 %v4321_v37 }
  0x15   :  { %3626 = vmatprep.subr.bf16.mxu0 %v4160_v3 }
  0x16   :  { %3655 = vmatpush1.bf16.msra.mxu1 %v4331_v40 }
  0x17   :  { %3656 = vmatprep.subr.bf16.mxu1 %v4160_v3 }
  0x18   :  { %3628 = vmatpush1.bf16.msra.mxu0 %v4341_v43 }
  0x19   :  { %3629 = vmatprep.subr.bf16.mxu0 %v4160_v3 }
  0x1a   :  { %3658 = vmatpush1.bf16.msra.mxu1 %v4351_v46 }
  0x1b   :  { %3659 = vmatprep.subr.bf16.mxu1 %v4160_v3 }
  0x1c   :  { %3631 = vmatpush1.bf16.msra.mxu0 %v4361_v49 }
  0x1d   :  { %3632 = vmatprep.subr.bf16.mxu0 %v4160_v3 }
  0x1e   :  { %3661 = vmatpush1.bf16.msra.mxu1 %v4371_v52 }
  0x1f   :  { %3662 = vmatprep.subr.bf16.mxu1 %v4160_v3 }
  0x20   :  { %3634 = vmatpush1.bf16.msra.mxu0 %v4381_v55 }
  0x21   :  { %3635 = vmatprep.subr.bf16.mxu0 %v4160_v3 }
  0x22   :  { %3664 = vmatpush1.bf16.msra.mxu1 %v4391_v58 }
  0x23   :  { %3665 = vmatprep.subr.bf16.mxu1 %v4160_v3 }
  0x24   :  { %3637 = vmatpush1.bf16.msra.mxu0 %v4401_v61 }
  0x25   :  { %3638 = vmatprep.subr.bf16.mxu0 %v4160_v3 }
  0x26   :  { %3667 = vmatpush1.bf16.msra.mxu1 %v4411_v0 }
  0x27   :  { %3695 = vmatprep.subr.bf16.mxu1 %v4160_v3 }
  0x28   :  { %3640 = vmatpush1.bf16.msra.mxu0 %v4415_v1 }
  0x29   :  { %3668 = vmatprep.subr.bf16.mxu0 %v4160_v3 }
  0x76   :  { %v54_v2 = vpop.permute.xlu0 %53  ;;  %v58_v4 = vpop.permute.xlu1 %57 }
  0x77   :  { %63 = vst.msk [vmem:[#allocation3] sm:$0xfe] %vm62_vm3, %v54_v2 }
  0x78   :  { %65 = vst.msk [vmem:[#allocation3 + $0x8] sm:$0xfe] %vm64_vm4, %v54_v2  ;;  %v3372_v2 = vld [vmem:[%s5940_s1 + $0x168] sm:$0xff] }
  0x79   :  { %71 = vst.msk [vmem:[#allocation3 + $0x20] sm:$0x1] %vm70_vm5, %v58_v4 }
  0x7a   :  { %73 = vst.msk [vmem:[#allocation3 + $0x28] sm:$0x1] %vm5947_vm6, %v58_v4  ;;  %v56_v5 = vpop.permute.xlu0 %55 }
  0x7b   :  { %67 = vst.msk [vmem:[#allocation3 + $0x10] sm:$0xff] %vm66_vm7, %v56_v5  ;;  %v459_v6 = vpop.permute.xlu1 %458 }
  0x7c   :  { %69 = vst.msk [vmem:[#allocation3 + $0x18] sm:$0xff] %vm68_vm8, %v56_v5  ;;  %v3374_v5 = vld [vmem:[%s5940_s1 + $0x178] sm:$0xff] }
  0x7e   :  { %v74_v8 = vld [vmem:[#allocation3] sm:$0xff]  ;;  %v461_v17 = vpop.permute.xlu0 %460 }
  0x7f   :  { %v75_v7 = vld [vmem:[#allocation3 + $0x8] sm:$0xff]  ;;  %v463_v13 = vpop.permute.xlu1 %462  ;;  %v96_v14 = vld [vmem:[#allocation3] sm:$0xfe] }
  0x80   :  { %3361 = vmatprep.mubr.msk.f32.mxu1 %vm27_vm0, %v75_v7  ;;  %v97_v9 = vld [vmem:[#allocation3 + $0x8] sm:$0xfe]  ;;  %v98_v20 = vld [vmem:[#allocation3 + $0x20] sm:$0x1]  ;;  %v4436_v21 = vld [vmem:[#allocation3] sm:$0xfc] }
  0x81   :  { %287 = vmatmul.mubr.f32.vlgmr.msra.gmra.mrb[0].mxu1 %v74_v8  ;;  %v99_v15 = vld [vmem:[#allocation3 + $0x28] sm:$0x1]  ;;  %v298_v16 = vld [vmem:[#allocation3 + $0x8] sm:$0xfc]  ;;  %v4439_v22 = vld [vmem:[#allocation3 + $0x20] sm:$0x3] }
  0x82   :  { %3697 = vmatpush1.bf16.msra.mxu1 %v4260_v19  ;;  %468 = vst.msk [vmem:[#allocation3 + $0x8] sm:$0xfe] %vm64_vm4, %v459_v6  ;;  %v4444_v25 = vld [vmem:[#allocation3 + $0x10] sm:$0xff]  ;;  %v129_v26 = vrot.slane %v97_v9, 1  ;;  %v4447_v27 = vld [vmem:[#allocation3 + $0x28] sm:$0x3] }
  0x83   :  { %v4441_v23 = vld [vmem:[#allocation3 + $0x18] sm:$0xff]  ;;  %3698 = vmatprep.subr.bf16.mxu1 %v4160_v3  ;;  %467 = vst.msk [vmem:[#allocation3] sm:$0xfe] %vm62_vm3, %v459_v6  ;;  %v126_v29 = vrot.slane %v96_v14, 1  ;;  %v127_v30 = vrot.slane %v4444_v25, 1  ;;  %v134_v32 = vrot.slane %v99_v15, 1 }
  0x84   :  { %471 = vst.msk [vmem:[#allocation3 + $0x20] sm:$0x1] %vm70_vm5, %v463_v13  ;;  %3362 = vmatprep.mubr.msk.f32.mxu1 %vm27_vm0, %v4441_v23  ;;  %v130_v19 = vrot.slane %v4441_v23, 1  ;;  %v132_v41 = vrot.slane %v98_v20, 1  ;;  %v329_v42 = vrot.slane %v4441_v23, 2  ;;  %v328_v47 = vrot.slane %v298_v16, 2 }
  0x85   :  { %469 = vst.msk [vmem:[#allocation3 + $0x10] sm:$0xff] %vm66_vm7, %v461_v17  ;;  %292 = vmatmul.mubr.f32.gmra.mrb[2].mxu1 %v4444_v25  ;;  %v128_v36 = vsel %vm125_vm9, %v126_v29, %v127_v30  ;;  %v3376_v7 = vld [vmem:[%s5940_s1 + $0x188] sm:$0xff]  ;;  %v326_v39 = vrot.slane %v4444_v25, 2  ;;  %vm1037_vm3 = vcmask 450944   ;;  %vm5962_vm4 = vcmask 516544  }
  0x86   :  { %470 = vst.msk [vmem:[#allocation3 + $0x18] sm:$0xff] %vm68_vm8, %v461_v17  ;;  %3700 = vmatpush1.bf16.msra.mxu1 %v4276_v24  ;;  %v131_v35 = vsel %vm125_vm9, %v129_v26, %v130_v19  ;;  %v135_v24 = vsel %vm125_vm9, %v130_v19, %v134_v32  ;;  %v133_v53 = vsel %vm125_vm9, %v127_v30, %v132_v41  ;;  %v3379_v19 = vld [vmem:[%s5940_s1 + $0x1a0] sm:$0xff]  ;;  %v3380_v29 = vld [vmem:[%s5940_s1 + $0x1a8] sm:$0xff]  ;;  %v333_v41 = vrot.slane %v4447_v27, 2 }
  0x87   :  { %472 = vst.msk [vmem:[#allocation3 + $0x28] sm:$0x1] %vm5947_vm6, %v463_v13  ;;  %3359 = vmatprep.mubr.msk.f32.mxu0 %vm27_vm0, %v131_v35  ;;  %3701 = vmatprep.subr.bf16.mxu1 %v4160_v3  ;;  %v3378_v13 = vld [vmem:[%s5940_s1 + $0x198] sm:$0xff]  ;;  %v331_v27 = vrot.slane %v4439_v22, 2  ;;  %vm5963_vm5 = vcmask 582144   ;;  %vm1064_vm7 = vcmask 647744  }
  0x88   :  { %207 = vmatmul.mubr.f32.vlgmr.msra.gmra.mrb[0].mxu0 %v128_v36  ;;  %v3693_v36 = vpack.c.bf16 %v3380_v29, %v3379_v19  ;;  %vm5950_vm8 = vcmask 713344  }
  0x89   :  { %3670 = vmatpush1.bf16.msra.mxu0 %v4458_v33  ;;  %3360 = vmatprep.mubr.msk.f32.mxu0 %vm27_vm0, %v135_v24  ;;  %v496_v45 = vld [vmem:[#allocation3 + $0x8] sm:$0xfe] }
  0x8a   :  { %3703 = vmatpush1.bf16.msra.mxu1 %v4299_v31  ;;  %3671 = vmatprep.subr.bf16.mxu0 %v4160_v3  ;;  %v526_v51 = vrot.slane %v496_v45, 1  ;;  %v330_v31 = vsel %vm5958_vm10, %v328_v47, %v329_v42  ;;  %v495_v9 = vld [vmem:[#allocation3] sm:$0xfe]  ;;  %v695_v20 = vld [vmem:[#allocation3 + $0x8] sm:$0xfc]  ;;  %v325_v45 = vrot.slane %v4436_v21, 2  ;;  %v332_v21 = vsel %vm5958_vm10, %v326_v39, %v331_v27 }
  0x8b   :  { %3704 = vmatprep.subr.bf16.mxu1 %v4160_v3  ;;  %v523_v14 = vrot.slane %v495_v9, 1  ;;  %v497_v16 = vld [vmem:[#allocation3 + $0x20] sm:$0x1]  ;;  %v723_v35 = vrot.slane %v695_v20, 2 }
  0x8c   :  { %212 = vmatmul.mubr.f32.gmra.mrb[2].mxu0 %v133_v53  ;;  %v4544_v8 = vld [vmem:[#allocation3 + $0x10] sm:$0xff]  ;;  %v529_v30 = vrot.slane %v497_v16, 1  ;;  %v327_v25 = vsel %vm5958_vm10, %v325_v45, %v326_v39  ;;  %v696_v22 = vld [vmem:[#allocation3 + $0x20] sm:$0x3] }
  0x8d   :  { %v4487_v54 = vld [vmem:[#allocation3 + $0x18] sm:$0xff]  ;;  %3673 = vmatpush1.bf16.msra.mxu0 %v4475_v44  ;;  %3381 = vmatprep.mubr.msk.f32.mxu0 %vm27_vm0, %v330_v31  ;;  %v524_v15 = vrot.slane %v4544_v8, 1  ;;  %v726_v23 = vrot.slane %v696_v22, 2  ;;  %v473_v47 = vld [vmem:[#allocation3] sm:$0xff] }
  0x8e   :  { %v527_v56 = vrot.slane %v4487_v54, 1  ;;  %3706 = vmatpush1.bf16.msra.mxu1 %v4321_v37  ;;  %3674 = vmatprep.subr.bf16.mxu0 %v4160_v3  ;;  %v3371_v37 = vld [vmem:[%s5940_s1 + $0x160] sm:$0xff] }
  0x8f   :  { %3707 = vmatprep.subr.bf16.mxu1 %v4160_v3  ;;  %v4521_v4 = vpack.c.bf16 %v3372_v2, %v3371_v37  ;;  %v525_v26 = vsel %vm125_vm9, %v523_v14, %v524_v15  ;;  %v530_v38 = vsel %vm125_vm9, %v524_v15, %v529_v30 }
  0x90   :  { %v528_v62 = vsel %vm125_vm9, %v526_v51, %v527_v56 }
  0x91   :  { %3404 = vmatprep.mubr.msk.f32.mxu1 %vm27_vm0, %v528_v62  ;;  %3676 = vmatpush1.bf16.msra.mxu0 %v4495_v57 }
  0x92   :  { %3709 = vmatpush1.bf16.msra.mxu1 %v4341_v43  ;;  %3677 = vmatprep.subr.bf16.mxu0 %v4160_v3  ;;  %v3373_v43 = vld [vmem:[%s5940_s1 + $0x170] sm:$0xff] }
  0x93   :  { %3710 = vmatprep.subr.bf16.mxu1 %v4160_v3  ;;  %v4533_v6 = vpack.c.bf16 %v3374_v5, %v3373_v43 }
  0x95   :  { %3679 = vmatpush1.bf16.msra.mxu0 %v4509_v63 }
  0x96   :  { %3712 = vmatpush1.bf16.msra.mxu1 %v4361_v49  ;;  %3680 = vmatprep.subr.bf16.mxu0 %v4160_v3  ;;  %v3375_v49 = vld [vmem:[%s5940_s1 + $0x180] sm:$0xff] }
  0x97   :  { %3713 = vmatprep.subr.bf16.mxu1 %v4160_v3  ;;  %v4547_v11 = vpack.c.bf16 %v3376_v7, %v3375_v49 }
  0x99   :  { %3682 = vmatpush1.bf16.msra.mxu0 %v4521_v4 }
  0x9a   :  { %3715 = vmatpush1.bf16.msra.mxu1 %v4381_v55  ;;  %3683 = vmatprep.subr.bf16.mxu0 %v4160_v3  ;;  %v498_v55 = vld [vmem:[#allocation3 + $0x28] sm:$0x1] }
  0x9b   :  { %3716 = vmatprep.subr.bf16.mxu1 %v4160_v3  ;;  %v531_v17 = vrot.slane %v498_v55, 1 }
  0x9d   :  { %3685 = vmatpush1.bf16.msra.mxu0 %v4533_v6  ;;  %v532_v32 = vsel %vm125_vm9, %v527_v56, %v531_v17  ;;  %vm5955_vm9 = vcmask 778944  }
  0x9e   :  { %3718 = vmatpush1.bf16.msra.mxu1 %v4401_v61  ;;  %3686 = vmatprep.subr.bf16.mxu0 %v4160_v3  ;;  %v3690_v61 = vpack.c.bf16 %v3378_v13, %v3377_v12 }
  0x9f   :  { %3719 = vmatprep.subr.bf16.mxu1 %v4160_v3 }
  0xa1   :  { %3688 = vmatpush1.bf16.msra.mxu0 %v4547_v11 }
  0xa2   :  { %3721 = vmatpush1.bf16.msra.mxu1 %v4415_v1  ;;  %3689 = vmatprep.subr.bf16.mxu0 %v4160_v3  ;;  %v724_v1 = vrot.slane %v4487_v54, 2 }
  0xa3   :  { %3749 = vmatprep.subr.bf16.mxu1 %v4160_v3 }
  0xa4   :  { %v725_v24 = vsel %vm5958_vm10, %v723_v35, %v724_v1 }
  0xa5   :  { %3691 = vmatpush1.bf16.msra.mxu0 %v3690_v61  ;;  %604 = vmatmul.mubr.f32.vlgmr.msra.gmra.mrb[4].mxu1 %v525_v26 }
  0xa6   :  { %3751 = vmatpush1.bf16.msra.mxu1 %v4458_v33  ;;  %3692 = vmatprep.subr.bf16.mxu0 %v4160_v3  ;;  %v334_v33 = vsel %vm5958_vm10, %v329_v42, %v333_v41 }
  0xa7   :  { %3752 = vmatprep.subr.bf16.mxu1 %v4160_v3  ;;  %3405 = vmatprep.mubr.msk.f32.mxu1 %vm27_vm0, %v532_v32  ;;  %v426_v32 = vld [vmem:[#allocation5] sm:$0x1] }
  0xa9   :  { %3694 = vmatpush1.bf16.msra.mxu0 %v3693_v36  ;;  %609 = vmatmul.mubr.f32.gmra.mrb[6].mxu1 %v530_v38 }
  0xaa   :  { %3754 = vmatpush1.bf16.msra.mxu1 %v4475_v44  ;;  %3722 = vmatprep.subr.bf16.mxu0 %v4160_v3  ;;  %v474_v44 = vld [vmem:[#allocation3 + $0x8] sm:$0xff] }
  0xab   :  { %3755 = vmatprep.subr.bf16.mxu1 %v4160_v3  ;;  %3426 = vmatprep.mubr.msk.f32.mxu1 %vm27_vm0, %v725_v24 }
  0xac   :  { %406 = vmatmul.mubr.f32.vlgmr.msra.gmra.mrb[4].mxu0 %v327_v25 }
  0xad   :  { %3382 = vmatprep.mubr.msk.f32.mxu0 %vm27_vm0, %v334_v33  ;;  %3724 = vmatpush1.bf16.msra.mxu0 %v4240_v10  ;;  %v694_v10 = vld [vmem:[#allocation3] sm:$0xfc] }
  0xae   :  { %3757 = vmatpush1.bf16.msra.mxu1 %v4495_v57  ;;  %3725 = vmatprep.subr.bf16.mxu0 %v4160_v3 }
  0xaf   :  { %3758 = vmatprep.subr.bf16.mxu1 %v4160_v3 }
  0xb0   :  { %411 = vmatmul.mubr.f32.gmra.mrb[6].mxu0 %v332_v21 }
  0xb1   :  { %3727 = vmatpush1.bf16.msra.mxu0 %v4258_v18  ;;  %3406 = vmatprep.mubr.msk.f32.mxu0 %vm27_vm0, %v474_v44  ;;  %v697_v18 = vld [vmem:[#allocation3 + $0x28] sm:$0x3] }
  0xb2   :  { %3760 = vmatpush1.bf16.msra.mxu1 %v4509_v63  ;;  %3728 = vmatprep.subr.bf16.mxu0 %v4160_v3 }
  0xb3   :  { %3761 = vmatprep.subr.bf16.mxu1 %v4160_v3 }
  0xb5   :  { %3730 = vmatpush1.bf16.msra.mxu0 %v4288_v28  ;;  %v720_v28 = vrot.slane %v694_v10, 2 }
  0xb6   :  { %3763 = vmatpush1.bf16.msra.mxu1 %v4521_v4  ;;  %3731 = vmatprep.subr.bf16.mxu0 %v4160_v3 }
  0xb7   :  { %3764 = vmatprep.subr.bf16.mxu1 %v4160_v3 }
  0xb9   :  { %3733 = vmatpush1.bf16.msra.mxu0 %v4310_v34  ;;  %v721_v34 = vrot.slane %v4544_v8, 2 }
  0xba   :  { %3766 = vmatpush1.bf16.msra.mxu1 %v4533_v6  ;;  %3734 = vmatprep.subr.bf16.mxu0 %v4160_v3 }
  0xbb   :  { %3767 = vmatprep.subr.bf16.mxu1 %v4160_v3 }
  0xbd   :  { %3736 = vmatpush1.bf16.msra.mxu0 %v4331_v40  ;;  %v728_v40 = vrot.slane %v697_v18, 2 }
  0xbe   :  { %3769 = vmatpush1.bf16.msra.mxu1 %v4547_v11  ;;  %3737 = vmatprep.subr.bf16.mxu0 %v4160_v3 }
  0xbf   :  { %3770 = vmatprep.subr.bf16.mxu1 %v4160_v3  ;;  %v729_v42 = vsel %vm5958_vm10, %v724_v1, %v728_v40 }
  0xc1   :  { %3739 = vmatpush1.bf16.msra.mxu0 %v4351_v46  ;;  %v722_v46 = vsel %vm5958_vm10, %v720_v28, %v721_v34 }
  0xc2   :  { %3772 = vmatpush1.bf16.msra.mxu1 %v3690_v61  ;;  %3740 = vmatprep.subr.bf16.mxu0 %v4160_v3 }
  0xc3   :  { %3773 = vmatprep.subr.bf16.mxu1 %v4160_v3 }
  0xc5   :  { %3742 = vmatpush1.bf16.msra.mxu0 %v4371_v52  ;;  %v727_v52 = vsel %vm5958_vm10, %v721_v34, %v726_v23 }
  0xc6   :  { %3775 = vmatpush1.bf16.msra.mxu1 %v3693_v36  ;;  %3743 = vmatprep.subr.bf16.mxu0 %v4160_v3  ;;  %v436_v36 = vld [vmem:[#allocation6] sm:$0x1] }
  0xc7   :  { %3806 = vmatprep.subr.bf16.mxu1 %v4160_v3 }
  0xc9   :  { %3745 = vmatpush1.bf16.msra.mxu0 %v4391_v58  ;;  %801 = vmatmul.mubr.f32.vlgmr.msra.gmra.mrb[8].mxu1 %v722_v46 }
  0xca   :  { %3427 = vmatprep.mubr.msk.f32.mxu1 %vm27_vm0, %v729_v42  ;;  %3746 = vmatprep.subr.bf16.mxu0 %v4160_v3 }
  0xcd   :  { %3748 = vmatpush1.bf16.msra.mxu0 %v4411_v0  ;;  %806 = vmatmul.mubr.f32.gmra.mrb[10].mxu1 %v727_v52 }
  0xce   :  { %3776 = vmatprep.subr.bf16.mxu0 %v4160_v3 }
  0xd0   :  { %684 = vmatmul.mubr.f32.vlgmr.msra.gmra.mrb[8].mxu0 %v473_v47 }
  0xd1   :  { %3407 = vmatprep.mubr.msk.f32.mxu0 %vm27_vm0, %v4487_v54  ;;  %v3383_v54 = vld [vmem:[%s5941_s4] ss:$0 sm:$0xff] }
  0xd4   :  { %689 = vmatmul.mubr.f32.gmra.mrb[10].mxu0 %v4544_v8 }
 0x154   :  { %v288_v58 = vpop.f32.mrb[0].mxu1 }
 0x155   :  { %v290_v48 = vpop.f32.mrb[1].mxu1 }
 0x158   :  { %v293_v50 = vpop.f32.mrb[2].mxu1 }
 0x159   :  { %v295_v51 = vpop.f32.mrb[3].mxu1 }
 0x15b   :  { %v208_v53 = vpop.f32.mrb[0].mxu0 }
 0x15c   :  { %v289_v31 = vadd.f32 %v288_v58, %v208_v53  ;;  %v210_v56 = vpop.f32.mrb[1].mxu0 }
 0x15f   :  { %v213_v57 = vpop.f32.mrb[2].mxu0 }
 0x160   :  { %v294_v59 = vadd.f32 %v293_v50, %v213_v57  ;;  %v215_v0 = vpop.f32.mrb[3].mxu0 }
 0x178   :  { %v605_v60 = vpop.f32.mrb[4].mxu1 }
 0x179   :  { %v607_v62 = vpop.f32.mrb[5].mxu1 }
 0x17c   :  { %v610_v63 = vpop.f32.mrb[6].mxu1 }
 0x17d   :  { %v612_v37 = vpop.f32.mrb[7].mxu1 }
 0x17f   :  { %v407_v2 = vpop.f32.mrb[4].mxu0 }
 0x180   :  { %v416_v4 = vadd.f32 %v407_v2, %v289_v31  ;;  %v409_v43 = vpop.f32.mrb[5].mxu0 }
 0x182   :  { %v422_v5 = vadd.f32 %v3383_v54, %v416_v4 }
 0x183   :  { %v412_v6 = vpop.f32.mrb[6].mxu0 }
 0x184   :  { %v417_v49 = vadd.f32 %v412_v6, %v294_v59  ;;  %v414_v7 = vpop.f32.mrb[7].mxu0  ;;  %v4638_v8 = vmax.f32 %v422_v5, 0.0 }
 0x186   :  { %v423_v9 = vadd.f32 %v3383_v54, %v417_v49  ;;  %v437_v55 = vmul.f32 %v4638_v8, %v4638_v8 }
 0x188   :  { %v4640_v11 = vmax.f32 %v423_v9, 0.0 }
 0x18a   :  { %v427_v12 = vadd.f32 %v4640_v11, %v4638_v8  ;;  %v438_v13 = vmul.f32 %v4640_v11, %v4640_v11 }
 0x18c   :  { %v428_v14 = vrot.slane %v427_v12, 4  ;;  %v439_v15 = vadd.f32 %v438_v13, %v437_v55 }
 0x18e   :  { %v429_v16 = vadd.f32 %v428_v14, %v427_v12  ;;  %v440_v17 = vrot.slane %v439_v15, 4 }
 0x190   :  { %v430_v61 = vrot.slane %v429_v16, 2  ;;  %v441_v20 = vadd.f32 %v440_v17, %v439_v15 }
 0x192   :  { %v431_v26 = vadd.f32 %v430_v61, %v429_v16  ;;  %v442_v19 = vrot.slane %v441_v20, 2 }
 0x194   :  { %v432_v29 = vrot.slane %v431_v26, 1  ;;  %v443_v30 = vadd.f32 %v442_v19, %v441_v20 }
 0x196   :  { %v433_v35 = vadd.f32 %v432_v29, %v431_v26  ;;  %v444_v1 = vrot.slane %v443_v30, 1 }
 0x198   :  { %v434_v38 = vadd.f32 %v433_v35, %v426_v32  ;;  %v445_v39 = vadd.f32 %v444_v1, %v443_v30 }
 0x19a   :  { %435 = vst [vmem:[#allocation5] sm:$0x1] %v434_v38  ;;  %v446_v41 = vadd.f32 %v445_v39, %v436_v36 }
 0x19c   :  { %447 = vst [vmem:[#allocation6] sm:$0x1] %v446_v41  ;;  %v802_v24 = vpop.f32.mrb[8].mxu1 }
 0x19d   :  { %v804_v45 = vpop.f32.mrb[9].mxu1 }
 0x1a0   :  { %v807_v25 = vpop.f32.mrb[10].mxu1 }
 0x1a1   :  { %v809_v27 = vpop.f32.mrb[11].mxu1  ;;  %v817_v37 = vld [vmem:[#allocation5] sm:$0x1] }
 0x1a3   :  { %v685_v33 = vpop.f32.mrb[8].mxu0  ;;  %v827_v4 = vld [vmem:[#allocation6] sm:$0x1] }
 0x1a4   :  { %v686_v21 = vadd.f32 %v685_v33, %v605_v60  ;;  %v687_v44 = vpop.f32.mrb[9].mxu0 }
 0x1a6   :  { %v811_v10 = vadd.f32 %v802_v24, %v686_v21 }
 0x1a7   :  { %v690_v18 = vpop.f32.mrb[10].mxu0 }
 0x1a8   :  { %v813_v28 = vadd.f32 %v3383_v54, %v811_v10  ;;  %v691_v34 = vadd.f32 %v690_v18, %v610_v63  ;;  %v692_v40 = vpop.f32.mrb[11].mxu0 }
 0x1aa   :  { %v812_v22 = vadd.f32 %v807_v25, %v691_v34  ;;  %v4648_v46 = vmax.f32 %v813_v28, 0.0 }
 0x1ac   :  { %v814_v23 = vadd.f32 %v3383_v54, %v812_v22  ;;  %v828_v52 = vmul.f32 %v4648_v46, %v4648_v46 }
 0x1ae   :  { %v4650_v42 = vmax.f32 %v814_v23, 0.0 }
 0x1b0   :  { %v818_v47 = vadd.f32 %v4650_v42, %v4648_v46  ;;  %v829_v58 = vmul.f32 %v4650_v42, %v4650_v42 }
 0x1b2   :  { %v819_v48 = vrot.slane %v818_v47, 4  ;;  %v830_v50 = vadd.f32 %v829_v58, %v828_v52 }
 0x1b4   :  { %v820_v51 = vadd.f32 %v819_v48, %v818_v47  ;;  %v831_v53 = vrot.slane %v830_v50, 4 }
 0x1b6   :  { %v821_v31 = vrot.slane %v820_v51, 2  ;;  %v832_v56 = vadd.f32 %v831_v53, %v830_v50 }
 0x1b8   :  { %v822_v57 = vadd.f32 %v821_v31, %v820_v51  ;;  %v833_v59 = vrot.slane %v832_v56, 2 }
 0x1ba   :  { %v823_v0 = vrot.slane %v822_v57, 1  ;;  %v834_v60 = vadd.f32 %v833_v59, %v832_v56 }
 0x1bc   :  { %v824_v62 = vadd.f32 %v823_v0, %v822_v57  ;;  %v835_v63 = vrot.slane %v834_v60, 1  ;;  %v980_v57 = vlaneseq }
 0x1be   :  { %v825_v54 = vadd.f32 %v824_v62, %v817_v37  ;;  %v836_v2 = vadd.f32 %v835_v63, %v834_v60 }
 0x1c0   :  { %826 = vst [vmem:[#allocation5] sm:$0x1] %v825_v54  ;;  %v837_v43 = vadd.f32 %v836_v2, %v827_v4  ;;  %v981_v54 = vshrl.u32 %v980_v57, 7  ;;  %v3438_v57 = vld [vmem:[%s5942_s2 + $0xf0] sm:$0xff] }
 0x1c2   :  { %838 = vst [vmem:[#allocation6] sm:$0x1] %v837_v43 }
 0x1c7   :  { %v844_v5 = vld [vmem:[#allocation5] sm:$0x1] }
 0x1c8   :  { %849 = vrot.lane.b32.xlu0 %v844_v5, %s4163_s26 }
 0x1c9   :  { %v845_v6 = vld [vmem:[#allocation6] sm:$0x1] }
 0x1ca   :  { %854 = vrot.lane.b32.xlu1 %v845_v6, %s4163_s26 }
 0x1cc   :  { %858 = vrot.lane.b32.xlu0 %v844_v5, %s4164_s27 }
 0x1ce   :  { %862 = vrot.lane.b32.xlu1 %v845_v6, %s4164_s27 }
 0x1d0   :  { %866 = vrot.lane.b32.xlu0 %v844_v5, %s4165_s28 }
 0x1d2   :  { %870 = vrot.lane.b32.xlu1 %v845_v6, %s4165_s28 }
 0x1d4   :  { %874 = vrot.lane.b32.xlu0 %v844_v5, %s4166_s29 }
 0x1d6   :  { %878 = vrot.lane.b32.xlu1 %v845_v6, %s4166_s29 }
 0x1d8   :  { %882 = vrot.lane.b32.xlu0 %v844_v5, %s4167_s30 }
 0x1da   :  { %886 = vrot.lane.b32.xlu1 %v845_v6, %s4167_s30 }
 0x1dc   :  { %890 = vrot.lane.b32.xlu0 %v844_v5, %s4168_s8 }
 0x1de   :  { %894 = vrot.lane.b32.xlu1 %v845_v6, %s4168_s8 }
 0x1e0   :  { %898 = vrot.lane.b32.xlu0 %v844_v5, %s4169_s9 }
 0x1e2   :  { %902 = vrot.lane.b32.xlu1 %v845_v6, %s4169_s9 }
 0x1e4   :  { %906 = vrot.lane.b32.xlu0 %v844_v5, %s4170_s10 }
 0x1e6   :  { %910 = vrot.lane.b32.xlu1 %v845_v6, %s4170_s10 }
 0x1e8   :  { %914 = vrot.lane.b32.xlu0 %v844_v5, %s4171_s11 }
 0x1ea   :  { %918 = vrot.lane.b32.xlu1 %v845_v6, %s4171_s11 }
 0x1ec   :  { %922 = vrot.lane.b32.xlu0 %v844_v5, %s4172_s12 }
 0x1ee   :  { %926 = vrot.lane.b32.xlu1 %v845_v6, %s4172_s12 }
 0x1f0   :  { %930 = vrot.lane.b32.xlu0 %v844_v5, %s4173_s13 }
 0x1f2   :  { %934 = vrot.lane.b32.xlu1 %v845_v6, %s4173_s13 }
 0x1f4   :  { %938 = vrot.lane.b32.xlu0 %v844_v5, %s4174_s14 }
 0x1f6   :  { %942 = vrot.lane.b32.xlu1 %v845_v6, %s4174_s14 }
 0x1f8   :  { %946 = vrot.lane.b32.xlu0 %v844_v5, %s4175_s15 }
 0x1fa   :  { %950 = vrot.lane.b32.xlu1 %v845_v6, %s4175_s15 }
 0x1fc   :  { %954 = vrot.lane.b32.xlu0 %v844_v5, %s4176_s16 }
 0x1fe   :  { %958 = vrot.lane.b32.xlu1 %v845_v6, %s4176_s16 }
 0x200   :  { %962 = vrot.lane.b32.xlu0 %v844_v5, %s4162_s18 }
 0x202   :  { %966 = vrot.lane.b32.xlu1 %v845_v6, %s4162_s18 }
 0x23a   :  { %v850_v49 = vpop.permute.xlu0 %849 }
 0x23b   :  { %v852_v30 = vadd.f32 %v850_v49, %v844_v5  ;;  %v4688_v49 = vsub.s32 0, %v981_v54  ;;  %v3441_v54 = vld [vmem:[%s5942_s2 + $0x108] sm:$0xff] }
 0x23c   :  { %v855_v7 = vpop.permute.xlu1 %854 }
 0x23d   :  { %v857_v35 = vadd.f32 %v855_v7, %v845_v6 }
 0x23e   :  { %v859_v9 = vpop.permute.xlu0 %858 }
 0x23f   :  { %v861_v1 = vadd.f32 %v859_v9, %v852_v30  ;;  %v3428_v30 = vld [vmem:[%s5942_s2 + $0xa0] sm:$0xff] }
 0x240   :  { %v863_v55 = vpop.permute.xlu1 %862 }
 0x241   :  { %v865_v38 = vadd.f32 %v863_v55, %v857_v35 }
 0x242   :  { %v867_v12 = vpop.permute.xlu0 %866 }
 0x243   :  { %v869_v39 = vadd.f32 %v867_v12, %v861_v1  ;;  %v3429_v1 = vld [vmem:[%s5942_s2 + $0xa8] sm:$0xff] }
 0x244   :  { %v871_v13 = vpop.permute.xlu1 %870 }
 0x245   :  { %v873_v24 = vadd.f32 %v871_v13, %v865_v38  ;;  %v1178_v38 = vld [vmem:[%s5942_s2 + $0x18] sm:$0xff] }
 0x246   :  { %v875_v14 = vpop.permute.xlu0 %874 }
 0x247   :  { %v877_v45 = vadd.f32 %v875_v14, %v869_v39  ;;  %v4750_v39 = vpack.c.bf16 %v3429_v1, %v3428_v30 }
 0x248   :  { %v879_v15 = vpop.permute.xlu1 %878 }
 0x249   :  { %v881_v27 = vadd.f32 %v879_v15, %v873_v24  ;;  %v3431_v24 = vld [vmem:[%s5942_s2 + $0xb8] sm:$0xff]  ;;  %3778 = vmatpush1.bf16.msra.mxu0 %v4750_v39 }
 0x24a   :  { %v883_v16 = vpop.permute.xlu0 %882  ;;  %3779 = vmatprep.subr.bf16.mxu0 %v4160_v3 }
 0x24b   :  { %v885_v33 = vadd.f32 %v883_v16, %v877_v45 }
 0x24c   :  { %v887_v17 = vpop.permute.xlu1 %886 }
 0x24d   :  { %v889_v44 = vadd.f32 %v887_v17, %v881_v27  ;;  %v1179_v27 = vld [vmem:[%s5942_s2 + $0x20] sm:$0xff] }
 0x24e   :  { %v891_v61 = vpop.permute.xlu0 %890 }
 0x24f   :  { %v893_v10 = vadd.f32 %v891_v61, %v885_v33  ;;  %v1180_v33 = vld [vmem:[%s5942_s2 + $0x28] sm:$0xff] }
 0x250   :  { %v895_v20 = vpop.permute.xlu1 %894 }
 0x251   :  { %v897_v28 = vadd.f32 %v895_v20, %v889_v44  ;;  %v3433_v44 = vld [vmem:[%s5942_s2 + $0xc8] sm:$0xff] }
 0x252   :  { %v899_v26 = vpop.permute.xlu0 %898 }
 0x253   :  { %v901_v34 = vadd.f32 %v899_v26, %v893_v10  ;;  %v4779_v10 = vpack.c.bf16 %v1180_v33, %v1179_v27 }
 0x254   :  { %v903_v19 = vpop.permute.xlu1 %902 }
 0x255   :  { %v905_v22 = vadd.f32 %v903_v19, %v897_v28  ;;  %v1175_v19 = vld [vmem:[%s5942_s2] sm:$0xff]  ;;  %v1181_v28 = vld [vmem:[%s5942_s2 + $0x30] sm:$0xff] }
 0x256   :  { %v907_v29 = vpop.permute.xlu0 %906 }
 0x257   :  { %v909_v23 = vadd.f32 %v907_v29, %v901_v34  ;;  %v1176_v29 = vld [vmem:[%s5942_s2 + $0x8] sm:$0xff]  ;;  %v1182_v34 = vld [vmem:[%s5942_s2 + $0x38] sm:$0xff] }
 0x258   :  { %v911_v32 = vpop.permute.xlu1 %910  ;;  %v4739_v35 = vpack.c.bf16 %v1176_v29, %v1175_v19 }
 0x259   :  { %v913_v47 = vadd.f32 %v911_v32, %v905_v22  ;;  %v4733_v32 = vld [vmem:[#allocation4] sm:$0xff]  ;;  %v3435_v22 = vld [vmem:[%s5942_s2 + $0xd8] sm:$0xff] }
 0x25a   :  { %v915_v36 = vpop.permute.xlu0 %914  ;;  %36 = vst.msk [vmem:[#allocation4 + $0x8] sm:$0xff] %vm5959_vm11, %v4733_v32  ;;  %38 = vst.msk [vmem:[#allocation4 + $0x18] sm:$0xff] %vm5959_vm11, %v4733_v32  ;;  %3808 = vmatpush1.bf16.msra.mxu1 %v4739_v35 }
 0x25b   :  { %v917_v58 = vadd.f32 %v915_v36, %v909_v23  ;;  %v1177_v36 = vld [vmem:[%s5942_s2 + $0x10] sm:$0xff]  ;;  %3809 = vmatprep.subr.bf16.mxu1 %v4160_v3  ;;  %v4799_v23 = vpack.c.bf16 %v1182_v34, %v1181_v28 }
 0x25c   :  { %v919_v41 = vpop.permute.xlu1 %918  ;;  %v4759_v45 = vpack.c.bf16 %v1178_v38, %v1177_v36 }
 0x25d   :  { %v921_v50 = vadd.f32 %v919_v41, %v913_v47  ;;  %v3430_v41 = vld [vmem:[%s5942_s2 + $0xb0] sm:$0xff]  ;;  %v1183_v47 = vld [vmem:[%s5942_s2 + $0x40] sm:$0xff] }
 0x25e   :  { %v923_v25 = vpop.permute.xlu0 %922  ;;  %3811 = vmatpush1.bf16.msra.mxu1 %v4759_v45 }
 0x25f   :  { %v925_v51 = vadd.f32 %v923_v25, %v917_v58  ;;  %v4763_v25 = vpack.c.bf16 %v3431_v24, %v3430_v41  ;;  %3812 = vmatprep.subr.bf16.mxu1 %v4160_v3  ;;  %v1184_v58 = vld [vmem:[%s5942_s2 + $0x48] sm:$0xff] }
 0x260   :  { %v927_v21 = vpop.permute.xlu1 %926 }
 0x261   :  { %v929_v31 = vadd.f32 %v927_v21, %v921_v50  ;;  %v3432_v21 = vld [vmem:[%s5942_s2 + $0xc0] sm:$0xff]  ;;  %3781 = vmatpush1.bf16.msra.mxu0 %v4763_v25  ;;  %v3437_v50 = vld [vmem:[%s5942_s2 + $0xe8] sm:$0xff] }
 0x262   :  { %v931_v18 = vpop.permute.xlu0 %930  ;;  %3782 = vmatprep.subr.bf16.mxu0 %v4160_v3  ;;  %3814 = vmatpush1.bf16.msra.mxu1 %v4779_v10 }
 0x263   :  { %v933_v56 = vadd.f32 %v931_v18, %v925_v51  ;;  %v4783_v18 = vpack.c.bf16 %v3433_v44, %v3432_v21  ;;  %3815 = vmatprep.subr.bf16.mxu1 %v4160_v3  ;;  %v4819_v51 = vpack.c.bf16 %v1184_v58, %v1183_v47 }
 0x264   :  { %v935_v40 = vpop.permute.xlu1 %934 }
 0x265   :  { %v937_v0 = vadd.f32 %v935_v40, %v929_v31  ;;  %v3434_v40 = vld [vmem:[%s5942_s2 + $0xd0] sm:$0xff]  ;;  %3784 = vmatpush1.bf16.msra.mxu0 %v4783_v18 }
 0x266   :  { %v939_v52 = vpop.permute.xlu0 %938  ;;  %3785 = vmatprep.subr.bf16.mxu0 %v4160_v3  ;;  %3817 = vmatpush1.bf16.msra.mxu1 %v4799_v23  ;;  %v1185_v31 = vld [vmem:[%s5942_s2 + $0x50] sm:$0xff] }
 0x267   :  { %v941_v60 = vadd.f32 %v939_v52, %v933_v56  ;;  %v4803_v52 = vpack.c.bf16 %v3435_v22, %v3434_v40  ;;  %3818 = vmatprep.subr.bf16.mxu1 %v4160_v3  ;;  %v1186_v56 = vld [vmem:[%s5942_s2 + $0x58] sm:$0xff] }
 0x268   :  { %v943_v48 = vpop.permute.xlu1 %942 }
 0x269   :  { %v945_v63 = vadd.f32 %v943_v48, %v937_v0  ;;  %v3436_v48 = vld [vmem:[%s5942_s2 + $0xe0] sm:$0xff]  ;;  %3787 = vmatpush1.bf16.msra.mxu0 %v4803_v52  ;;  %v4839_v0 = vpack.c.bf16 %v1186_v56, %v1185_v31  ;;  %v3442_v56 = vld [vmem:[%s5942_s2 + $0x110] sm:$0xff] }
 0x26a   :  { %v947_v53 = vpop.permute.xlu0 %946  ;;  %3788 = vmatprep.subr.bf16.mxu0 %v4160_v3  ;;  %3820 = vmatpush1.bf16.msra.mxu1 %v4819_v51 }
 0x26b   :  { %v949_v37 = vadd.f32 %v947_v53, %v941_v60  ;;  %v4823_v53 = vpack.c.bf16 %v3437_v50, %v3436_v48  ;;  %3821 = vmatprep.subr.bf16.mxu1 %v4160_v3  ;;  %v842_v48 = vld [vmem:[%s5943_s5] sm:$0x1] }
 0x26c   :  { %v951_v59 = vpop.permute.xlu1 %950 }
 0x26d   :  { %v953_v4 = vadd.f32 %v951_v59, %v945_v63  ;;  %v3439_v59 = vld [vmem:[%s5942_s2 + $0xf8] sm:$0xff]  ;;  %3790 = vmatpush1.bf16.msra.mxu0 %v4823_v53  ;;  %v1188_v63 = vld [vmem:[%s5942_s2 + $0x68] sm:$0xff] }
 0x26e   :  { %v955_v62 = vpop.permute.xlu0 %954  ;;  %v4843_v60 = vpack.c.bf16 %v3439_v59, %v3438_v57  ;;  %3791 = vmatprep.subr.bf16.mxu0 %v4160_v3  ;;  %3823 = vmatpush1.bf16.msra.mxu1 %v4839_v0  ;;  %v3443_v57 = vld [vmem:[%s5942_s2 + $0x118] sm:$0xff]  ;;  %v1191_v59 = vld [vmem:[%s5942_s2 + $0x80] sm:$0xff] }
 0x26f   :  { %v957_v43 = vadd.f32 %v955_v62, %v949_v37  ;;  %v1187_v62 = vld [vmem:[%s5942_s2 + $0x60] sm:$0xff]  ;;  %3824 = vmatprep.subr.bf16.mxu1 %v4160_v3 }
 0x270   :  { %v959_v2 = vpop.permute.xlu1 %958  ;;  %v3440_v37 = vld [vmem:[%s5942_s2 + $0x100] sm:$0xff] }
 0x271   :  { %v961_v6 = vadd.f32 %v959_v2, %v953_v4  ;;  %v4859_v2 = vpack.c.bf16 %v1188_v63, %v1187_v62  ;;  %3793 = vmatpush1.bf16.msra.mxu0 %v4843_v60  ;;  %v4923_v62 = vpack.c.bf16 %v3443_v57, %v3442_v56  ;;  %v1192_v63 = vld [vmem:[%s5942_s2 + $0x88] sm:$0xff] }
 0x272   :  { %v963_v5 = vpop.permute.xlu0 %962  ;;  %3794 = vmatprep.subr.bf16.mxu0 %v4160_v3 }
 0x273   :  { %v965_v7 = vadd.f32 %v963_v5, %v957_v43  ;;  %v4863_v43 = vpack.c.bf16 %v3441_v54, %v3440_v37  ;;  %v1189_v5 = vld [vmem:[%s5942_s2 + $0x70] sm:$0xff]  ;;  %3826 = vmatpush1.bf16.msra.mxu1 %v4859_v2  ;;  %v843_v54 = vld [vmem:[%s5944_s6] sm:$0x1] }
 0x274   :  { %v967_v9 = vpop.permute.xlu1 %966  ;;  %3827 = vmatprep.subr.bf16.mxu1 %v4160_v3 }
 0x275   :  { %v970_v55 = vmul.f32 0.001953125, %v965_v7  ;;  %v969_v12 = vadd.f32 %v967_v9, %v961_v6  ;;  %v1190_v6 = vld [vmem:[%s5942_s2 + $0x78] sm:$0xff]  ;;  %3796 = vmatpush1.bf16.msra.mxu0 %v4863_v43 }
 0x276   :  { %v4874_v7 = vpack.c.bf16 %v1190_v6, %v1189_v5  ;;  %3797 = vmatprep.subr.bf16.mxu0 %v4160_v3 }
 0x277   :  { %v983_v13 = vrot.slane %v970_v55, %v4688_v49  ;;  %977 = vst.msk [vmem:[#allocation5] sm:$0x1] %vm5947_vm6, %v970_v55  ;;  %v971_v14 = vmul.f32 0.001953125, %v969_v12  ;;  %v972_v15 = vmul.f32 %v970_v55, %v970_v55 }
 0x278   :  { %3829 = vmatpush1.bf16.msra.mxu1 %v4874_v7 }
 0x279   :  { %v973_v16 = vsub.f32 %v971_v14, %v972_v15  ;;  %984 = vrot.lane.b32.xlu0 %v983_v13, %s4162_s18  ;;  %3830 = vmatprep.subr.bf16.mxu1 %v4160_v3 }
 0x27a   :  { %3799 = vmatpush1.bf16.msra.mxu0 %v4923_v62 }
 0x27b   :  { %v974_v17 = vmax.f32 %v973_v16, 0.0  ;;  %3800 = vmatprep.subr.bf16.mxu0 %v4160_v3 }
 0x27d   :  { %v975_v61 = vadd.f32 1e-05, %v974_v17  ;;  %998 = vrot.lane.b32.xlu0 %v983_v13, %s4176_s16 }
 0x27f   :  { %4153 = vrsqrt.f32 %v975_v61 }
 0x281   :  { %1007 = vrot.lane.b32.xlu0 %v983_v13, %s4175_s15 }
 0x285   :  { %1016 = vrot.lane.b32.xlu0 %v983_v13, %s4174_s14 }
 0x289   :  { %v4154_v20 = vpop.eup %4153  ;;  %1025 = vrot.lane.b32.xlu0 %v983_v13, %s4173_s13 }
 0x28a   :  { %v993_v26 = vrot.slane %v4154_v20, %v4688_v49  ;;  %978 = vst.msk [vmem:[#allocation6] sm:$0x1] %vm5947_vm6, %v4154_v20  ;;  %vm5954_vm6 = vcmask 844544  }
 0x28c   :  { %1003 = vrot.lane.b32.xlu1 %v993_v26, %s4176_s16 }
 0x28d   :  { %1034 = vrot.lane.b32.xlu0 %v983_v13, %s4172_s12 }
 0x290   :  { %1012 = vrot.lane.b32.xlu1 %v993_v26, %s4175_s15 }
 0x291   :  { %1043 = vrot.lane.b32.xlu0 %v983_v13, %s4171_s11 }
 0x294   :  { %1021 = vrot.lane.b32.xlu1 %v993_v26, %s4174_s14 }
 0x295   :  { %1052 = vrot.lane.b32.xlu0 %v983_v13, %s4170_s10 }
 0x298   :  { %1030 = vrot.lane.b32.xlu1 %v993_v26, %s4173_s13 }
 0x299   :  { %1061 = vrot.lane.b32.xlu0 %v983_v13, %s4169_s9 }
 0x29c   :  { %1039 = vrot.lane.b32.xlu1 %v993_v26, %s4172_s12 }
 0x29d   :  { %1070 = vrot.lane.b32.xlu0 %v983_v13, %s4168_s8 }
 0x2a0   :  { %1048 = vrot.lane.b32.xlu1 %v993_v26, %s4171_s11 }
 0x2a1   :  { %994 = vrot.lane.b32.xlu0 %v993_v26, %s4162_s18 }
 0x2a4   :  { %1057 = vrot.lane.b32.xlu1 %v993_v26, %s4170_s10 }
 0x2a5   :  { %1079 = vrot.lane.b32.xlu0 %v983_v13, %s4167_s30 }
 0x2a8   :  { %1066 = vrot.lane.b32.xlu1 %v993_v26, %s4169_s9 }
 0x2a9   :  { %1088 = vrot.lane.b32.xlu0 %v983_v13, %s4166_s29 }
 0x2ac   :  { %1075 = vrot.lane.b32.xlu1 %v993_v26, %s4168_s8 }
 0x2ad   :  { %1097 = vrot.lane.b32.xlu0 %v983_v13, %s4165_s28 }
 0x2b0   :  { %1084 = vrot.lane.b32.xlu1 %v993_v26, %s4167_s30 }
 0x2b1   :  { %1106 = vrot.lane.b32.xlu0 %v983_v13, %s4164_s27 }
 0x2b4   :  { %1093 = vrot.lane.b32.xlu1 %v993_v26, %s4166_s29 }
 0x2b8   :  { %1102 = vrot.lane.b32.xlu1 %v993_v26, %s4165_s28 }
 0x2bc   :  { %1111 = vrot.lane.b32.xlu1 %v993_v26, %s4164_s27 }
 0x2c0   :  { %1120 = vrot.lane.b32.xlu1 %v993_v26, %s4163_s26 }
 0x2c4   :  { %1115 = vrot.lane.b32.xlu1 %v983_v13, %s4163_s26 }
 0x2eb   :  { %v985_v4 = vpop.permute.xlu0 %984 }
 0x2ec   :  { %988 = vst.msk [vmem:[#allocation5] sm:$0x1] %vm987_vm12, %v985_v4  ;;  %v4931_v4 = vpack.c.bf16 %v1192_v63, %v1191_v59 }
 0x2ee   :  { %3832 = vmatpush1.bf16.msra.mxu1 %v4931_v4 }
 0x2ef   :  { %v999_v9 = vpop.permute.xlu0 %998  ;;  %3833 = vmatprep.subr.bf16.mxu1 %v4160_v3 }
 0x2f0   :  { %1002 = vst.msk [vmem:[#allocation5] sm:$0x1] %vm1001_vm13, %v999_v9  ;;  %v3444_v9 = vld [vmem:[%s5942_s2 + $0x120] sm:$0xff] }
 0x2f3   :  { %v1008_v55 = vpop.permute.xlu0 %1007 }
 0x2f4   :  { %1011 = vst.msk [vmem:[#allocation5] sm:$0x1] %vm5948_vm14, %v1008_v55  ;;  %v3445_v55 = vld [vmem:[%s5942_s2 + $0x128] sm:$0xff] }
 0x2f7   :  { %v1017_v12 = vpop.permute.xlu0 %1016 }
 0x2f8   :  { %1020 = vst.msk [vmem:[#allocation5] sm:$0x1] %vm5961_vm15, %v1017_v12  ;;  %v1193_v12 = vld [vmem:[%s5942_s2 + $0x90] sm:$0xff] }
 0x2fb   :  { %v1026_v13 = vpop.permute.xlu0 %1025 }
 0x2fc   :  { %1029 = vst.msk [vmem:[#allocation5] sm:$0x1] %vm5949_vm2, %v1026_v13 }
 0x2fe   :  { %v1004_v14 = vpop.permute.xlu1 %1003 }
 0x2ff   :  { %v1035_v15 = vpop.permute.xlu0 %1034 }
 0x300   :  { %1038 = vst.msk [vmem:[#allocation5] sm:$0x1] %vm1037_vm3, %v1035_v15  ;;  %v1194_v15 = vld [vmem:[%s5942_s2 + $0x98] sm:$0xff] }
 0x302   :  { %v1013_v16 = vpop.permute.xlu1 %1012 }
 0x303   :  { %v1044_v17 = vpop.permute.xlu0 %1043 }
 0x304   :  { %1047 = vst.msk [vmem:[#allocation5] sm:$0x1] %vm5962_vm4, %v1044_v17 }
 0x306   :  { %v1022_v61 = vpop.permute.xlu1 %1021 }
 0x307   :  { %v1053_v20 = vpop.permute.xlu0 %1052 }
 0x308   :  { %1056 = vst.msk [vmem:[#allocation5] sm:$0x1] %vm5963_vm5, %v1053_v20 }
 0x30a   :  { %v1031_v26 = vpop.permute.xlu1 %1030 }
 0x30b   :  { %v1062_v19 = vpop.permute.xlu0 %1061 }
 0x30c   :  { %1065 = vst.msk [vmem:[#allocation5] sm:$0x1] %vm1064_vm7, %v1062_v19  ;;  %v3447_v19 = vld [vmem:[%s5942_s2 + $0x138] sm:$0xff] }
 0x30e   :  { %v1040_v29 = vpop.permute.xlu1 %1039 }
 0x30f   :  { %v1071_v30 = vpop.permute.xlu0 %1070 }
 0x310   :  { %1074 = vst.msk [vmem:[#allocation5] sm:$0x1] %vm5950_vm8, %v1071_v30 }
 0x312   :  { %v1049_v1 = vpop.permute.xlu1 %1048 }
 0x313   :  { %v995_v36 = vpop.permute.xlu0 %994 }
 0x314   :  { %997 = vst.msk [vmem:[#allocation6] sm:$0x1] %vm987_vm12, %v995_v36 }
 0x315   :  { %1006 = vst.msk [vmem:[#allocation6] sm:$0x1] %vm1001_vm13, %v1004_v14  ;;  %v4949_v14 = vpack.c.bf16 %v3445_v55, %v3444_v9  ;;  %v3454_v55 = vld [vmem:[%s5942_s2 + $0x150] sm:$0xff] }
 0x316   :  { %1015 = vst.msk [vmem:[#allocation6] sm:$0x1] %vm5948_vm14, %v1013_v16  ;;  %v1058_v38 = vpop.permute.xlu1 %1057  ;;  %vm5953_vm14 = vcmask 910144   ;;  %v4954_v16 = vpack.c.bf16 %v1194_v15, %v1193_v12  ;;  %v3455_v12 = vld [vmem:[%s5942_s2 + $0x158] sm:$0xff] }
 0x317   :  { %1024 = vst.msk [vmem:[#allocation6] sm:$0x1] %vm5961_vm15, %v1022_v61  ;;  %v1080_v41 = vpop.permute.xlu0 %1079  ;;  %3802 = vmatpush1.bf16.msra.mxu0 %v4949_v14 }
 0x318   :  { %1033 = vst.msk [vmem:[#allocation6] sm:$0x1] %vm5949_vm2, %v1031_v26  ;;  %vm5952_vm2 = vcmask 975744   ;;  %3835 = vmatpush1.bf16.msra.mxu1 %v4954_v16  ;;  %3803 = vmatprep.subr.bf16.mxu0 %v4160_v3  ;;  %v3446_v26 = vld [vmem:[%s5942_s2 + $0x130] sm:$0xff] }
 0x319   :  { %1083 = vst.msk [vmem:[#allocation5] sm:$0x1] %vm5955_vm9, %v1080_v41  ;;  %3866 = vmatprep.subr.bf16.mxu1 %v4160_v3 }
 0x31a   :  { %1042 = vst.msk [vmem:[#allocation6] sm:$0x1] %vm1037_vm3, %v1040_v29  ;;  %v1067_v24 = vpop.permute.xlu1 %1066 }
 0x31b   :  { %1051 = vst.msk [vmem:[#allocation6] sm:$0x1] %vm5962_vm4, %v1049_v1  ;;  %v1089_v27 = vpop.permute.xlu0 %1088  ;;  %v4971_v1 = vpack.c.bf16 %v3447_v19, %v3446_v26 }
 0x31c   :  { %1060 = vst.msk [vmem:[#allocation6] sm:$0x1] %vm5963_vm5, %v1058_v38 }
 0x31d   :  { %1069 = vst.msk [vmem:[#allocation6] sm:$0x1] %vm1064_vm7, %v1067_v24  ;;  %3805 = vmatpush1.bf16.msra.mxu0 %v4971_v1 }
 0x31e   :  { %1092 = vst.msk [vmem:[#allocation5] sm:$0x1] %vm5954_vm6, %v1089_v27  ;;  %v1076_v33 = vpop.permute.xlu1 %1075  ;;  %3836 = vmatprep.subr.bf16.mxu0 %v4160_v3 }
 0x31f   :  { %1078 = vst.msk [vmem:[#allocation6] sm:$0x1] %vm5950_vm8, %v1076_v33  ;;  %v1098_v21 = vpop.permute.xlu0 %1097  ;;  %vm5951_vm8 = vcmask 1041344  }
 0x320   :  { %1101 = vst.msk [vmem:[#allocation5] sm:$0x1] %vm5953_vm14, %v1098_v21 }
 0x322   :  { %v1085_v44 = vpop.permute.xlu1 %1084 }
 0x323   :  { %1087 = vst.msk [vmem:[#allocation6] sm:$0x1] %vm5955_vm9, %v1085_v44  ;;  %v1107_v28 = vpop.permute.xlu0 %1106  ;;  %vm5956_vm9 = vcmask 1041536  }
 0x324   :  { %1110 = vst.msk [vmem:[#allocation5] sm:$0x1] %vm5952_vm2, %v1107_v28 }
 0x326   :  { %v1094_v34 = vpop.permute.xlu1 %1093 }
 0x327   :  { %1096 = vst.msk [vmem:[#allocation6] sm:$0x1] %vm5954_vm6, %v1094_v34  ;;  %vm1165_vm6 = vcmask 1047680  }
 0x32a   :  { %v1103_v40 = vpop.permute.xlu1 %1102 }
 0x32b   :  { %1105 = vst.msk [vmem:[#allocation6] sm:$0x1] %vm5953_vm14, %v1103_v40  ;;  %vm1163_vm14 = vcmask 130050   ;;  %v3452_v40 = vld [vmem:[%s5942_s2 + $0x140] sm:$0xff] }
 0x32e   :  { %v1112_v22 = vpop.permute.xlu1 %1111 }
 0x32f   :  { %1114 = vst.msk [vmem:[#allocation6] sm:$0x1] %vm5952_vm2, %v1112_v22  ;;  %vm1161_vm2 = vcmask 1047682   ;;  %v3453_v22 = vld [vmem:[%s5942_s2 + $0x148] sm:$0xff] }
 0x330   :  { %v5011_v9 = vpack.c.bf16 %v3453_v22, %v3452_v40  ;;  %v3460_v40 = vld [vmem:[%s5942_s2 + $0x180] sm:$0xff]  ;;  %v3461_v22 = vld [vmem:[%s5942_s2 + $0x188] sm:$0xff] }
 0x332   :  { %v1121_v47 = vpop.permute.xlu1 %1120 }
 0x333   :  { %1123 = vst.msk [vmem:[#allocation6] sm:$0x1] %vm5951_vm8, %v1121_v47 }
 0x336   :  { %v1116_v58 = vpop.permute.xlu1 %1115 }
 0x337   :  { %1119 = vst.msk [vmem:[#allocation5] sm:$0x1] %vm5951_vm8, %v1116_v58  ;;  %vm40_vm8 = vcmask 257024  }
 0x338   :  { %41 = vst.msk [vmem:[#allocation4 + $0x28] sm:$0xf] %vm40_vm8, %v4733_v32  ;;  %vm1148_vm8 = vcmask 1041408  }
 0x33a   :  { %v1124_v50 = vld [vmem:[#allocation6] sm:$0x1] }
 0x33b   :  { %1131 = vst [vmem:[#allocation6] sm:$0x1] %v4733_v32  ;;  %v1125_v31 = vmul.f32 %v1124_v50, %v842_v48 }
 0x33d   :  { %v1137_v6 = vrot.slane %v1125_v31, %v4688_v49 }
 0x33e   :  { %v1126_v37 = vld [vmem:[#allocation5] sm:$0x1] }
 0x33f   :  { %1130 = vst [vmem:[#allocation5] sm:$0x1] %v4733_v32  ;;  %v1127_v5 = vmul.f32 %v1126_v37, %v1125_v31  ;;  %v1138_v17 = vmul.f32 %v1137_v6, %v4638_v8  ;;  %v1139_v20 = vmul.f32 %v1137_v6, %v4640_v11  ;;  %v1554_v11 = vmul.f32 %v1137_v6, %v4648_v46 }
 0x340   :  { %v1555_v30 = vmul.f32 %v1137_v6, %v4650_v42 }
 0x341   :  { %v1128_v13 = vsub.f32 %v843_v54, %v1127_v5 }
 0x343   :  { %v1143_v61 = vrot.slane %v1128_v13, %v4688_v49 }
 0x345   :  { %v1144_v29 = vadd.f32 %v1143_v61, %v1138_v17  ;;  %v1145_v8 = vadd.f32 %v1143_v61, %v1139_v20  ;;  %v1556_v41 = vadd.f32 %v1554_v11, %v1143_v61  ;;  %v1557_v24 = vadd.f32 %v1555_v30, %v1143_v61 }
 0x346   :  { %v5033_v11 = vpack.c.bf16 %v3455_v12, %v3454_v55  ;;  %v3470_v12 = vld [vmem:[%s5942_s2 + $0x1d0] sm:$0xff] }
 0x347   :  { %v1149_v36 = vrot.slane %v1144_v29, 6  ;;  %v1150_v38 = vrot.slane %v1145_v8, 6  ;;  %v1560_v33 = vrot.slane %v1556_v41, 6  ;;  %v1561_v46 = vrot.slane %v1557_v24, 6  ;;  %v3456_v41 = vld [vmem:[%s5942_s2 + $0x160] sm:$0xff] }
 0x349   :  { %1152 = vrot.lane.b32.xlu0 %v1149_v36, %s4176_s16  ;;  %v1151_v27 = vsel %vm1148_vm8, %v1149_v36, %v1150_v38  ;;  %v1562_v42 = vsel %vm1148_vm8, %v1560_v33, %v1561_v46 }
 0x34a   :  { %1154 = vrot.lane.b32.xlu1 %v1151_v27, %s4176_s16 }
 0x34d   :  { %1156 = vrot.lane.b32.xlu0 %v1150_v38, %s4176_s16 }
 0x34e   :  { %1563 = vrot.lane.b32.xlu1 %v1560_v33, %s4176_s16 }
 0x351   :  { %1565 = vrot.lane.b32.xlu0 %v1562_v42, %s4176_s16 }
 0x352   :  { %1567 = vrot.lane.b32.xlu1 %v1561_v46, %s4176_s16 }
 0x3bb   :  { %v1153_v21 = vpop.permute.xlu0 %1152 }
 0x3bc   :  { %1162 = vst.msk [vmem:[#allocation4] sm:$0xfc] %vm1161_vm2, %v1153_v21  ;;  %v1155_v44 = vpop.permute.xlu1 %1154 }
 0x3bd   :  { %1164 = vst.msk [vmem:[#allocation4 + $0x8] sm:$0xfc] %vm1163_vm14, %v1153_v21 }
 0x3be   :  { %1166 = vst.msk [vmem:[#allocation4 + $0x10] sm:$0xff] %vm1165_vm6, %v1155_v44 }
 0x3bf   :  { %1167 = vst.msk [vmem:[#allocation4 + $0x18] sm:$0xff] %vm27_vm0, %v1155_v44  ;;  %v1157_v28 = vpop.permute.xlu0 %1156 }
 0x3c0   :  { %1169 = vst.msk [vmem:[#allocation4 + $0x20] sm:$0x3] %vm5956_vm9, %v1157_v28  ;;  %v1564_v34 = vpop.permute.xlu1 %1563 }
 0x3c1   :  { %1170 = vst.msk [vmem:[#allocation4 + $0x28] sm:$0x3] %vm5960_vm1, %v1157_v28  ;;  %v3458_v28 = vld [vmem:[%s5942_s2 + $0x170] sm:$0xff] }
 0x3c3   :  { %v1566_v47 = vpop.permute.xlu0 %1565  ;;  %v1171_v57 = vld [vmem:[#allocation4] sm:$0xff] }
 0x3c4   :  { %v1172_v58 = vld [vmem:[#allocation4 + $0x8] sm:$0xff]  ;;  %v1195_v63 = vld [vmem:[#allocation4] sm:$0xfc]  ;;  %v1568_v61 = vpop.permute.xlu1 %1567 }
 0x3c5   :  { %v1196_v48 = vld [vmem:[#allocation4 + $0x8] sm:$0xfc]  ;;  %v4995_v31 = vld [vmem:[#allocation4 + $0x10] sm:$0xff]  ;;  %3450 = vmatprep.mubr.msk.f32.mxu1 %vm5959_vm11, %v1172_v58  ;;  %v5003_v37 = vld [vmem:[#allocation4] sm:$0xf0]  ;;  %v1226_v6 = vrot.slane %v1195_v63, 2 }
 0x3c6   :  { %v1398_v50 = vld [vmem:[#allocation4 + $0x8] sm:$0xf0]  ;;  %v4997_v56 = vld [vmem:[#allocation4 + $0x18] sm:$0xff]  ;;  %v1229_v59 = vrot.slane %v1196_v48, 2  ;;  %1574 = vst.msk [vmem:[#allocation4 + $0x10] sm:$0xff] %vm1165_vm6, %v1566_v47  ;;  %1387 = vmatmul.mubr.f32.vlgmr.msra.gmra.mrb[12].mxu1 %v1171_v57  ;;  %v1227_v5 = vrot.slane %v4995_v31, 2 }
 0x3c7   :  { %1573 = vst.msk [vmem:[#allocation4 + $0x8] sm:$0xfc] %vm1163_vm14, %v1564_v34  ;;  %v1230_v54 = vrot.slane %v4997_v56, 2  ;;  %3868 = vmatpush1.bf16.msra.mxu1 %v4750_v39  ;;  %3451 = vmatprep.mubr.msk.f32.mxu1 %vm5959_vm11, %v4997_v56  ;;  %v1197_v13 = vld [vmem:[#allocation4 + $0x20] sm:$0x3]  ;;  %v1430_v30 = vrot.slane %v1398_v50, 4 }
 0x3c8   :  { %1575 = vst.msk [vmem:[#allocation4 + $0x18] sm:$0xff] %vm27_vm0, %v1566_v47  ;;  %v1198_v15 = vld [vmem:[#allocation4 + $0x28] sm:$0x3]  ;;  %v5019_v17 = vld [vmem:[#allocation4 + $0x20] sm:$0xf]  ;;  %3869 = vmatprep.subr.bf16.mxu1 %v4160_v3  ;;  %v1228_v26 = vsel %vm5958_vm10, %v1226_v6, %v1227_v5  ;;  %v1232_v29 = vrot.slane %v1197_v13, 2  ;;  %v5083_v47 = vpack.c.bf16 %v3461_v22, %v3460_v40 }
 0x3c9   :  { %1572 = vst.msk [vmem:[#allocation4] sm:$0xfc] %vm1161_vm2, %v1564_v34  ;;  %v1231_v39 = vsel %vm5958_vm10, %v1229_v59, %v1230_v54  ;;  %v5023_v20 = vld [vmem:[#allocation4 + $0x28] sm:$0xf]  ;;  %v1234_v19 = vrot.slane %v1198_v15, 2  ;;  %v1431_v36 = vrot.slane %v4997_v56, 4 }
 0x3ca   :  { %1576 = vst.msk [vmem:[#allocation4 + $0x20] sm:$0x3] %vm5956_vm9, %v1568_v61  ;;  %3448 = vmatprep.mubr.msk.f32.mxu0 %vm5959_vm11, %v1231_v39  ;;  %1392 = vmatmul.mubr.f32.gmra.mrb[14].mxu1 %v4995_v31  ;;  %vm5957_vm9 = vcmask 1043456   ;;  %v1233_v24 = vsel %vm5958_vm10, %v1227_v5, %v1232_v29  ;;  %v3463_v58 = vld [vmem:[%s5942_s2 + $0x198] sm:$0xff]  ;;  %v3465_v50 = vld [vmem:[%s5942_s2 + $0x1a8] sm:$0xff] }
 0x3cb   :  { %1577 = vst.msk [vmem:[#allocation4 + $0x28] sm:$0x3] %vm5960_vm1, %v1568_v61  ;;  %1307 = vmatmul.mubr.f32.vlgmr.msra.gmra.mrb[12].mxu0 %v1228_v26  ;;  %3871 = vmatpush1.bf16.msra.mxu1 %v4763_v25  ;;  %v1235_v8 = vsel %vm5958_vm10, %v1230_v54, %v1234_v19  ;;  %v3457_v25 = vld [vmem:[%s5942_s2 + $0x168] sm:$0xff]  ;;  %v1432_v42 = vsel %vm5957_vm9, %v1430_v30, %v1431_v36  ;;  %v3467_v59 = vld [vmem:[%s5942_s2 + $0x1b8] sm:$0xff]  ;;  %v1428_v30 = vrot.slane %v4995_v31, 4  ;;  %vm5970_vm1 = vcmask 778944  }
 0x3cc   :  { %3838 = vmatpush1.bf16.msra.mxu0 %v5011_v9  ;;  %3449 = vmatprep.mubr.msk.f32.mxu0 %vm5959_vm11, %v1235_v8  ;;  %v5054_v21 = vpack.c.bf16 %v3457_v25, %v3456_v41  ;;  %v3469_v54 = vld [vmem:[%s5942_s2 + $0x1c8] sm:$0xff]  ;;  %v3471_v13 = vld [vmem:[%s5942_s2 + $0x1d8] sm:$0xff]  ;;  %v1427_v8 = vrot.slane %v5003_v37, 4 }
 0x3cd   :  { %3839 = vmatprep.subr.bf16.mxu0 %v4160_v3  ;;  %3872 = vmatprep.subr.bf16.mxu1 %v4160_v3  ;;  %v5129_v5 = vld [vmem:[#allocation4 + $0x10] sm:$0xff]  ;;  %v5146_v26 = vpack.c.bf16 %v3471_v13, %v3470_v12 }
 0x3ce   :  { %v1603_v38 = vld [vmem:[#allocation4 + $0x8] sm:$0xfc]  ;;  %v1633_v61 = vrot.slane %v5129_v5, 2  ;;  %v1429_v31 = vsel %vm5957_vm9, %v1427_v8, %v1428_v30 }
 0x3cf   :  { %v5046_v27 = vld [vmem:[#allocation4 + $0x18] sm:$0xff]  ;;  %v1635_v33 = vrot.slane %v1603_v38, 2  ;;  %1312 = vmatmul.mubr.f32.gmra.mrb[14].mxu0 %v1233_v24  ;;  %3874 = vmatpush1.bf16.msra.mxu1 %v4783_v18  ;;  %v3459_v18 = vld [vmem:[%s5942_s2 + $0x178] sm:$0xff] }
 0x3d0   :  { %v1636_v46 = vrot.slane %v5046_v27, 2  ;;  %3841 = vmatpush1.bf16.msra.mxu0 %v5033_v11  ;;  %3472 = vmatprep.mubr.msk.f32.mxu0 %vm5959_vm11, %v1432_v42  ;;  %v5071_v34 = vpack.c.bf16 %v3459_v18, %v3458_v28  ;;  %v1602_v6 = vld [vmem:[#allocation4] sm:$0xfc]  ;;  %v1804_v19 = vld [vmem:[#allocation4 + $0x8] sm:$0xf0]  ;;  %v1835_v24 = vrot.slane %v5046_v27, 4 }
 0x3d1   :  { %3842 = vmatprep.subr.bf16.mxu0 %v4160_v3  ;;  %3875 = vmatprep.subr.bf16.mxu1 %v4160_v3  ;;  %v1632_v15 = vrot.slane %v1602_v6, 2  ;;  %v1834_v25 = vrot.slane %v1804_v19, 4  ;;  %v1579_v56 = vld [vmem:[#allocation4 + $0x8] sm:$0xff] }
 0x3d2   :  { %v1637_v44 = vsel %vm5958_vm10, %v1635_v33, %v1636_v46  ;;  %v1605_v55 = vld [vmem:[#allocation4 + $0x28] sm:$0x3]  ;;  %v1433_v33 = vrot.slane %v5019_v17, 4 }
 0x3d3   :  { %3495 = vmatprep.mubr.msk.f32.mxu1 %vm5959_vm11, %v1637_v44  ;;  %3877 = vmatpush1.bf16.msra.mxu1 %v4803_v52  ;;  %v3462_v52 = vld [vmem:[%s5942_s2 + $0x190] sm:$0xff]  ;;  %v1640_v39 = vrot.slane %v1605_v55, 2  ;;  %v1634_v29 = vsel %vm5958_vm10, %v1632_v15, %v1633_v61 }
 0x3d4   :  { %3844 = vmatpush1.bf16.msra.mxu0 %v5054_v21  ;;  %3878 = vmatprep.subr.bf16.mxu1 %v4160_v3  ;;  %v5095_v48 = vpack.c.bf16 %v3463_v58, %v3462_v52  ;;  %v1434_v17 = vsel %vm5957_vm9, %v1428_v30, %v1433_v33  ;;  %v3474_v58 = vld [vmem:[%s5941_s4 + $0x1] ss:$0 sm:$0xff] }
 0x3d5   :  { %3845 = vmatprep.subr.bf16.mxu0 %v4160_v3  ;;  %v1641_v41 = vsel %vm5958_vm10, %v1636_v46, %v1640_v39 }
 0x3d7   :  { %3880 = vmatpush1.bf16.msra.mxu1 %v4823_v53  ;;  %v3464_v53 = vld [vmem:[%s5942_s2 + $0x1a0] sm:$0xff] }
 0x3d8   :  { %3847 = vmatpush1.bf16.msra.mxu0 %v5071_v34  ;;  %3881 = vmatprep.subr.bf16.mxu1 %v4160_v3  ;;  %v5107_v57 = vpack.c.bf16 %v3465_v50, %v3464_v53 }
 0x3d9   :  { %3848 = vmatprep.subr.bf16.mxu0 %v4160_v3 }
 0x3db   :  { %3883 = vmatpush1.bf16.msra.mxu1 %v4843_v60  ;;  %v3466_v60 = vld [vmem:[%s5942_s2 + $0x1b0] sm:$0xff] }
 0x3dc   :  { %3850 = vmatpush1.bf16.msra.mxu0 %v5083_v47  ;;  %3884 = vmatprep.subr.bf16.mxu1 %v4160_v3  ;;  %v5119_v63 = vpack.c.bf16 %v3467_v59, %v3466_v60 }
 0x3dd   :  { %3851 = vmatprep.subr.bf16.mxu0 %v4160_v3 }
 0x3df   :  { %3886 = vmatpush1.bf16.msra.mxu1 %v4863_v43  ;;  %v3468_v43 = vld [vmem:[%s5942_s2 + $0x1c0] sm:$0xff] }
 0x3e0   :  { %3853 = vmatpush1.bf16.msra.mxu0 %v5095_v48  ;;  %3887 = vmatprep.subr.bf16.mxu1 %v4160_v3 }
 0x3e1   :  { %3854 = vmatprep.subr.bf16.mxu0 %v4160_v3 }
 0x3e3   :  { %3889 = vmatpush1.bf16.msra.mxu1 %v4923_v62  ;;  %v5133_v62 = vpack.c.bf16 %v3469_v54, %v3468_v43 }
 0x3e4   :  { %3856 = vmatpush1.bf16.msra.mxu0 %v5107_v57  ;;  %3890 = vmatprep.subr.bf16.mxu1 %v4160_v3 }
 0x3e5   :  { %3857 = vmatprep.subr.bf16.mxu0 %v4160_v3 }
 0x3e7   :  { %3892 = vmatpush1.bf16.msra.mxu1 %v4949_v14  ;;  %v1604_v14 = vld [vmem:[#allocation4 + $0x20] sm:$0x3] }
 0x3e8   :  { %3859 = vmatpush1.bf16.msra.mxu0 %v5119_v63  ;;  %3893 = vmatprep.subr.bf16.mxu1 %v4160_v3  ;;  %v1638_v38 = vrot.slane %v1604_v14, 2 }
 0x3e9   :  { %3860 = vmatprep.subr.bf16.mxu0 %v4160_v3 }
 0x3ea   :  { %v1639_v37 = vsel %vm5958_vm10, %v1633_v61, %v1638_v38  ;;  %v1528_v38 = vld [vmem:[#allocation5] sm:$0x1]  ;;  %vm5966_vm10 = vcmask 385344  }
 0x3eb   :  { %3895 = vmatpush1.bf16.msra.mxu1 %v4971_v1  ;;  %v1435_v1 = vrot.slane %v5023_v20, 4 }
 0x3ec   :  { %3862 = vmatpush1.bf16.msra.mxu0 %v5133_v62  ;;  %3926 = vmatprep.subr.bf16.mxu1 %v4160_v3 }
 0x3ed   :  { %3863 = vmatprep.subr.bf16.mxu0 %v4160_v3  ;;  %v1436_v20 = vsel %vm5957_vm9, %v1431_v36, %v1435_v1 }
 0x3ee   :  { %1713 = vmatmul.mubr.f32.vlgmr.msra.gmra.mrb[16].mxu1 %v1634_v29 }
 0x3ef   :  { %3496 = vmatprep.mubr.msk.f32.mxu1 %vm5959_vm11, %v1641_v41  ;;  %3928 = vmatpush1.bf16.msra.mxu1 %v5011_v9  ;;  %v1836_v9 = vsel %vm5957_vm9, %v1834_v25, %v1835_v24  ;;  %v1538_v25 = vld [vmem:[#allocation6] sm:$0x1] }
 0x3f0   :  { %3865 = vmatpush1.bf16.msra.mxu0 %v5146_v26  ;;  %3929 = vmatprep.subr.bf16.mxu1 %v4160_v3 }
 0x3f1   :  { %3896 = vmatprep.subr.bf16.mxu0 %v4160_v3 }
 0x3f2   :  { %1718 = vmatmul.mubr.f32.gmra.mrb[18].mxu1 %v1639_v37 }
 0x3f3   :  { %1508 = vmatmul.mubr.f32.vlgmr.msra.gmra.mrb[16].mxu0 %v1429_v31  ;;  %3931 = vmatpush1.bf16.msra.mxu1 %v5033_v11 }
 0x3f4   :  { %3473 = vmatprep.mubr.msk.f32.mxu0 %vm5959_vm11, %v1436_v20  ;;  %3898 = vmatpush1.bf16.msra.mxu0 %v4739_v35  ;;  %v1803_v35 = vld [vmem:[#allocation4] sm:$0xf0] }
 0x3f5   :  { %3519 = vmatprep.mubr.msk.f32.mxu1 %vm5959_vm11, %v1836_v9  ;;  %3899 = vmatprep.subr.bf16.mxu0 %v4160_v3 }
 0x3f6   :  { %3932 = vmatprep.subr.bf16.mxu1 %v4160_v3 }
 0x3f7   :  { %1513 = vmatmul.mubr.f32.gmra.mrb[18].mxu0 %v1434_v17  ;;  %3934 = vmatpush1.bf16.msra.mxu1 %v5054_v21 }
 0x3f8   :  { %3901 = vmatpush1.bf16.msra.mxu0 %v4759_v45  ;;  %3497 = vmatprep.mubr.msk.f32.mxu0 %vm5959_vm11, %v1579_v56  ;;  %v1806_v45 = vld [vmem:[#allocation4 + $0x28] sm:$0xf] }
 0x3f9   :  { %3902 = vmatprep.subr.bf16.mxu0 %v4160_v3  ;;  %3935 = vmatprep.subr.bf16.mxu1 %v4160_v3 }
 0x3fb   :  { %3937 = vmatpush1.bf16.msra.mxu1 %v5071_v34 }
 0x3fc   :  { %3904 = vmatpush1.bf16.msra.mxu0 %v4779_v10  ;;  %3938 = vmatprep.subr.bf16.mxu1 %v4160_v3  ;;  %v1831_v10 = vrot.slane %v1803_v35, 4 }
 0x3fd   :  { %3905 = vmatprep.subr.bf16.mxu0 %v4160_v3 }
 0x3ff   :  { %3940 = vmatpush1.bf16.msra.mxu1 %v5083_v47 }
 0x400   :  { %3907 = vmatpush1.bf16.msra.mxu0 %v4799_v23  ;;  %3941 = vmatprep.subr.bf16.mxu1 %v4160_v3  ;;  %v1832_v23 = vrot.slane %v5129_v5, 4 }
 0x401   :  { %3908 = vmatprep.subr.bf16.mxu0 %v4160_v3 }
 0x403   :  { %3943 = vmatpush1.bf16.msra.mxu1 %v5095_v48 }
 0x404   :  { %3910 = vmatpush1.bf16.msra.mxu0 %v4819_v51  ;;  %3944 = vmatprep.subr.bf16.mxu1 %v4160_v3  ;;  %v1839_v51 = vrot.slane %v1806_v45, 4 }
 0x405   :  { %3911 = vmatprep.subr.bf16.mxu0 %v4160_v3 }
 0x406   :  { %v1840_v11 = vsel %vm5957_vm9, %v1835_v24, %v1839_v51 }
 0x407   :  { %3946 = vmatpush1.bf16.msra.mxu1 %v5107_v57 }
 0x408   :  { %3913 = vmatpush1.bf16.msra.mxu0 %v4839_v0  ;;  %3947 = vmatprep.subr.bf16.mxu1 %v4160_v3  ;;  %v1805_v0 = vld [vmem:[#allocation4 + $0x20] sm:$0xf] }
 0x409   :  { %3914 = vmatprep.subr.bf16.mxu0 %v4160_v3 }
 0x40b   :  { %3949 = vmatpush1.bf16.msra.mxu1 %v5119_v63 }
 0x40c   :  { %3916 = vmatpush1.bf16.msra.mxu0 %v4859_v2  ;;  %3950 = vmatprep.subr.bf16.mxu1 %v4160_v3  ;;  %v1833_v2 = vsel %vm5957_vm9, %v1831_v10, %v1832_v23 }
 0x40d   :  { %3917 = vmatprep.subr.bf16.mxu0 %v4160_v3 }
 0x40f   :  { %3952 = vmatpush1.bf16.msra.mxu1 %v5133_v62 }
 0x410   :  { %3919 = vmatpush1.bf16.msra.mxu0 %v4874_v7  ;;  %3953 = vmatprep.subr.bf16.mxu1 %v4160_v3  ;;  %v1837_v7 = vrot.slane %v1805_v0, 4 }
 0x411   :  { %3920 = vmatprep.subr.bf16.mxu0 %v4160_v3 }
 0x412   :  { %v1838_v36 = vsel %vm5957_vm9, %v1832_v23, %v1837_v7  ;;  %vm5964_vm9 = vcmask 57344  }
 0x413   :  { %3955 = vmatpush1.bf16.msra.mxu1 %v5146_v26 }
 0x414   :  { %3922 = vmatpush1.bf16.msra.mxu0 %v4931_v4  ;;  %3986 = vmatprep.subr.bf16.mxu1 %v4160_v3  ;;  %v1578_v4 = vld [vmem:[#allocation4] sm:$0xff] }
 0x415   :  { %3923 = vmatprep.subr.bf16.mxu0 %v4160_v3 }
 0x416   :  { %1912 = vmatmul.mubr.f32.vlgmr.msra.gmra.mrb[20].mxu1 %v1833_v2 }
 0x417   :  { %3520 = vmatprep.mubr.msk.f32.mxu1 %vm5959_vm11, %v1840_v11 }
 0x418   :  { %3925 = vmatpush1.bf16.msra.mxu0 %v4954_v16 }
 0x419   :  { %3956 = vmatprep.subr.bf16.mxu0 %v4160_v3 }
 0x41a   :  { %1917 = vmatmul.mubr.f32.gmra.mrb[22].mxu1 %v1838_v36 }
 0x41b   :  { %1793 = vmatmul.mubr.f32.vlgmr.msra.gmra.mrb[20].mxu0 %v1578_v4 }
 0x41c   :  { %3498 = vmatprep.mubr.msk.f32.mxu0 %vm5959_vm11, %v5046_v27  ;;  %vm5969_vm11 = vcmask 385344  }
 0x41f   :  { %1798 = vmatmul.mubr.f32.gmra.mrb[22].mxu0 %v5129_v5 }
 0x499   :  { %v1388_v46 = vpop.f32.mrb[12].mxu1 }
 0x49a   :  { %v1390_v16 = vpop.f32.mrb[13].mxu1 }
 0x49d   :  { %v1393_v21 = vpop.f32.mrb[14].mxu1 }
 0x49e   :  { %v1308_v42 = vpop.f32.mrb[12].mxu0  ;;  %v1395_v18 = vpop.f32.mrb[15].mxu1 }
 0x49f   :  { %v1389_v44 = vadd.f32 %v1388_v46, %v1308_v42  ;;  %v1310_v28 = vpop.f32.mrb[13].mxu0 }
 0x4a2   :  { %v1313_v34 = vpop.f32.mrb[14].mxu0 }
 0x4a3   :  { %v1394_v40 = vadd.f32 %v1393_v21, %v1313_v34  ;;  %v1315_v22 = vpop.f32.mrb[15].mxu0 }
 0x4c1   :  { %v1714_v47 = vpop.f32.mrb[16].mxu1 }
 0x4c2   :  { %v1716_v52 = vpop.f32.mrb[17].mxu1 }
 0x4c5   :  { %v1719_v27 = vpop.f32.mrb[18].mxu1 }
 0x4c6   :  { %v1509_v48 = vpop.f32.mrb[16].mxu0  ;;  %v1721_v57 = vpop.f32.mrb[19].mxu1 }
 0x4c7   :  { %v1518_v53 = vadd.f32 %v1509_v48, %v1389_v44  ;;  %v1511_v50 = vpop.f32.mrb[17].mxu0 }
 0x4c9   :  { %v1524_v60 = vadd.f32 %v3474_v58, %v1518_v53 }
 0x4ca   :  { %v1514_v59 = vpop.f32.mrb[18].mxu0 }
 0x4cb   :  { %v1519_v63 = vadd.f32 %v1514_v59, %v1394_v40  ;;  %v1516_v43 = vpop.f32.mrb[19].mxu0  ;;  %v5227_v54 = vmax.f32 %v1524_v60, 0.0 }
 0x4cd   :  { %v1525_v5 = vadd.f32 %v3474_v58, %v1519_v63  ;;  %v1539_v62 = vmul.f32 %v5227_v54, %v5227_v54 }
 0x4cf   :  { %v5229_v6 = vmax.f32 %v1525_v5, 0.0 }
 0x4d1   :  { %v1529_v55 = vadd.f32 %v5229_v6, %v5227_v54  ;;  %v1540_v12 = vmul.f32 %v5229_v6, %v5229_v6 }
 0x4d3   :  { %v1530_v13 = vrot.slane %v1529_v55, 4  ;;  %v1541_v15 = vadd.f32 %v1540_v12, %v1539_v62 }
 0x4d5   :  { %v1531_v61 = vadd.f32 %v1530_v13, %v1529_v55  ;;  %v1542_v39 = vrot.slane %v1541_v15, 4 }
 0x4d7   :  { %v1532_v14 = vrot.slane %v1531_v61, 2  ;;  %v1543_v26 = vadd.f32 %v1542_v39, %v1541_v15 }
 0x4d9   :  { %v1533_v19 = vadd.f32 %v1532_v14, %v1531_v61  ;;  %v1544_v29 = vrot.slane %v1543_v26, 2 }
 0x4db   :  { %v1534_v8 = vrot.slane %v1533_v19, 1  ;;  %v1545_v30 = vadd.f32 %v1544_v29, %v1543_v26 }
 0x4dd   :  { %v1535_v41 = vadd.f32 %v1534_v8, %v1533_v19  ;;  %v1546_v1 = vrot.slane %v1545_v30, 1 }
 0x4df   :  { %v1536_v24 = vadd.f32 %v1535_v41, %v1528_v38  ;;  %v1547_v31 = vadd.f32 %v1546_v1, %v1545_v30 }
 0x4e1   :  { %1537 = vst [vmem:[#allocation5] sm:$0x1] %v1536_v24  ;;  %v1548_v37 = vadd.f32 %v1547_v31, %v1538_v25 }
 0x4e3   :  { %1549 = vst [vmem:[#allocation6] sm:$0x1] %v1548_v37 }
 0x4e8   :  { %v1928_v53 = vld [vmem:[#allocation5] sm:$0x1] }
 0x4e9   :  { %v1913_v33 = vpop.f32.mrb[20].mxu1 }
 0x4ea   :  { %v1915_v20 = vpop.f32.mrb[21].mxu1  ;;  %v1938_v60 = vld [vmem:[#allocation6] sm:$0x1] }
 0x4ed   :  { %v1918_v56 = vpop.f32.mrb[22].mxu1 }
 0x4ee   :  { %v1794_v9 = vpop.f32.mrb[20].mxu0  ;;  %v1920_v45 = vpop.f32.mrb[23].mxu1 }
 0x4ef   :  { %v1795_v17 = vadd.f32 %v1794_v9, %v1714_v47  ;;  %v1796_v35 = vpop.f32.mrb[21].mxu0 }
 0x4f1   :  { %v1922_v10 = vadd.f32 %v1913_v33, %v1795_v17 }
 0x4f2   :  { %v1799_v23 = vpop.f32.mrb[22].mxu0 }
 0x4f3   :  { %v1924_v51 = vadd.f32 %v3474_v58, %v1922_v10  ;;  %v1800_v0 = vadd.f32 %v1799_v23, %v1719_v27  ;;  %v1801_v2 = vpop.f32.mrb[23].mxu0 }
 0x4f5   :  { %v1923_v7 = vadd.f32 %v1918_v56, %v1800_v0  ;;  %v5237_v11 = vmax.f32 %v1924_v51, 0.0 }
 0x4f7   :  { %v1925_v4 = vadd.f32 %v3474_v58, %v1923_v7  ;;  %v1939_v46 = vmul.f32 %v5237_v11, %v5237_v11 }
 0x4f9   :  { %v5239_v36 = vmax.f32 %v1925_v4, 0.0 }
 0x4fb   :  { %v1929_v16 = vadd.f32 %v5239_v36, %v5237_v11  ;;  %v1940_v42 = vmul.f32 %v5239_v36, %v5239_v36 }
 0x4fd   :  { %v1930_v21 = vrot.slane %v1929_v16, 4  ;;  %v1941_v44 = vadd.f32 %v1940_v42, %v1939_v46 }
 0x4ff   :  { %v1931_v28 = vadd.f32 %v1930_v21, %v1929_v16  ;;  %v1942_v18 = vrot.slane %v1941_v44, 4 }
 0x501   :  { %v1932_v34 = vrot.slane %v1931_v28, 2  ;;  %v1943_v40 = vadd.f32 %v1942_v18, %v1941_v44 }
 0x503   :  { %v1933_v22 = vadd.f32 %v1932_v34, %v1931_v28  ;;  %v1944_v47 = vrot.slane %v1943_v40, 2 }
 0x505   :  { %v1934_v52 = vrot.slane %v1933_v22, 1  ;;  %v1945_v58 = vadd.f32 %v1944_v47, %v1943_v40 }
 0x507   :  { %v1935_v48 = vadd.f32 %v1934_v52, %v1933_v22  ;;  %v1946_v27 = vrot.slane %v1945_v58, 1 }
 0x509   :  { %v1936_v50 = vadd.f32 %v1935_v48, %v1928_v53  ;;  %v1947_v57 = vadd.f32 %v1946_v27, %v1945_v58 }
 0x50b   :  { %1937 = vst [vmem:[#allocation5] sm:$0x1] %v1936_v50  ;;  %v1948_v59 = vadd.f32 %v1947_v57, %v1938_v60 }
 0x50d   :  { %1949 = vst [vmem:[#allocation6] sm:$0x1] %v1948_v59 }
 0x512   :  { %v1954_v63 = vld [vmem:[#allocation5] sm:$0x1] }
 0x513   :  { %1959 = vrot.lane.b32.xlu0 %v1954_v63, %s4163_s26 }
 0x514   :  { %v1955_v43 = vld [vmem:[#allocation6] sm:$0x1] }
 0x515   :  { %1964 = vrot.lane.b32.xlu1 %v1955_v43, %s4163_s26 }
 0x517   :  { %1968 = vrot.lane.b32.xlu0 %v1954_v63, %s4164_s27 }
 0x519   :  { %1972 = vrot.lane.b32.xlu1 %v1955_v43, %s4164_s27 }
 0x51b   :  { %1976 = vrot.lane.b32.xlu0 %v1954_v63, %s4165_s28 }
 0x51d   :  { %1980 = vrot.lane.b32.xlu1 %v1955_v43, %s4165_s28 }
 0x51f   :  { %1984 = vrot.lane.b32.xlu0 %v1954_v63, %s4166_s29 }
 0x521   :  { %1988 = vrot.lane.b32.xlu1 %v1955_v43, %s4166_s29 }
 0x523   :  { %1992 = vrot.lane.b32.xlu0 %v1954_v63, %s4167_s30 }
 0x525   :  { %1996 = vrot.lane.b32.xlu1 %v1955_v43, %s4167_s30 }
 0x527   :  { %2000 = vrot.lane.b32.xlu0 %v1954_v63, %s4168_s8 }
 0x529   :  { %2004 = vrot.lane.b32.xlu1 %v1955_v43, %s4168_s8 }
 0x52b   :  { %2008 = vrot.lane.b32.xlu0 %v1954_v63, %s4169_s9 }
 0x52d   :  { %2012 = vrot.lane.b32.xlu1 %v1955_v43, %s4169_s9 }
 0x52f   :  { %2016 = vrot.lane.b32.xlu0 %v1954_v63, %s4170_s10 }
 0x531   :  { %2020 = vrot.lane.b32.xlu1 %v1955_v43, %s4170_s10 }
 0x533   :  { %2024 = vrot.lane.b32.xlu0 %v1954_v63, %s4171_s11 }
 0x535   :  { %2028 = vrot.lane.b32.xlu1 %v1955_v43, %s4171_s11 }
 0x537   :  { %2032 = vrot.lane.b32.xlu0 %v1954_v63, %s4172_s12 }
 0x539   :  { %2036 = vrot.lane.b32.xlu1 %v1955_v43, %s4172_s12 }
 0x53b   :  { %2040 = vrot.lane.b32.xlu0 %v1954_v63, %s4173_s13 }
 0x53d   :  { %2044 = vrot.lane.b32.xlu1 %v1955_v43, %s4173_s13 }
 0x53f   :  { %2048 = vrot.lane.b32.xlu0 %v1954_v63, %s4174_s14 }
 0x541   :  { %2052 = vrot.lane.b32.xlu1 %v1955_v43, %s4174_s14 }
 0x543   :  { %2056 = vrot.lane.b32.xlu0 %v1954_v63, %s4175_s15 }
 0x545   :  { %2060 = vrot.lane.b32.xlu1 %v1955_v43, %s4175_s15 }
 0x547   :  { %2064 = vrot.lane.b32.xlu0 %v1954_v63, %s4176_s16 }
 0x549   :  { %2068 = vrot.lane.b32.xlu1 %v1955_v43, %s4176_s16 }
 0x54b   :  { %2072 = vrot.lane.b32.xlu0 %v1954_v63, %s4162_s18 }
 0x54d   :  { %2076 = vrot.lane.b32.xlu1 %v1955_v43, %s4162_s18 }
 0x585   :  { %v1960_v5 = vpop.permute.xlu0 %1959 }
 0x586   :  { %v1962_v41 = vadd.f32 %v1960_v5, %v1954_v63 }
 0x587   :  { %v1965_v62 = vpop.permute.xlu1 %1964 }
 0x588   :  { %v1967_v25 = vadd.f32 %v1965_v62, %v1955_v43 }
 0x589   :  { %v1969_v55 = vpop.permute.xlu0 %1968 }
 0x58a   :  { %v1971_v24 = vadd.f32 %v1969_v55, %v1962_v41 }
 0x58b   :  { %v1973_v12 = vpop.permute.xlu1 %1972 }
 0x58c   :  { %v1975_v37 = vadd.f32 %v1973_v12, %v1967_v25  ;;  %v2267_v25 = vld [vmem:[%s5945_s3 + $0x10] sm:$0xff] }
 0x58d   :  { %v1977_v13 = vpop.permute.xlu0 %1976 }
 0x58e   :  { %v1979_v33 = vadd.f32 %v1977_v13, %v1971_v24  ;;  %v2268_v24 = vld [vmem:[%s5945_s3 + $0x18] sm:$0xff] }
 0x58f   :  { %v1981_v15 = vpop.permute.xlu1 %1980 }
 0x590   :  { %v1983_v9 = vadd.f32 %v1981_v15, %v1975_v37  ;;  %v3523_v37 = vld [vmem:[%s5945_s3 + $0xb0] sm:$0xff] }
 0x591   :  { %v1985_v61 = vpop.permute.xlu0 %1984 }
 0x592   :  { %v1987_v17 = vadd.f32 %v1985_v61, %v1979_v33  ;;  %v3524_v33 = vld [vmem:[%s5945_s3 + $0xb8] sm:$0xff] }
 0x593   :  { %v1989_v39 = vpop.permute.xlu1 %1988 }
 0x594   :  { %v1991_v35 = vadd.f32 %v1989_v39, %v1983_v9  ;;  %v5344_v9 = vpack.c.bf16 %v3524_v33, %v3523_v37 }
 0x595   :  { %v1993_v14 = vpop.permute.xlu0 %1992 }
 0x596   :  { %v1995_v45 = vadd.f32 %v1993_v14, %v1987_v17  ;;  %v2269_v17 = vld [vmem:[%s5945_s3 + $0x20] sm:$0xff] }
 0x597   :  { %v1997_v26 = vpop.permute.xlu1 %1996 }
 0x598   :  { %v1999_v23 = vadd.f32 %v1997_v26, %v1991_v35  ;;  %v3525_v35 = vld [vmem:[%s5945_s3 + $0xc0] sm:$0xff] }
 0x599   :  { %v2001_v19 = vpop.permute.xlu0 %2000 }
 0x59a   :  { %v2003_v51 = vadd.f32 %v2001_v19, %v1995_v45  ;;  %v3526_v45 = vld [vmem:[%s5945_s3 + $0xc8] sm:$0xff] }
 0x59b   :  { %v2005_v29 = vpop.permute.xlu1 %2004 }
 0x59c   :  { %v2007_v2 = vadd.f32 %v2005_v29, %v1999_v23  ;;  %v5364_v23 = vpack.c.bf16 %v3526_v45, %v3525_v35 }
 0x59d   :  { %v2009_v8 = vpop.permute.xlu0 %2008 }
 0x59e   :  { %v2011_v7 = vadd.f32 %v2009_v8, %v2003_v51  ;;  %v2265_v8 = vld [vmem:[%s5945_s3] sm:$0xff]  ;;  %v2271_v51 = vld [vmem:[%s5945_s3 + $0x30] sm:$0xff] }
 0x59f   :  { %v2013_v30 = vpop.permute.xlu1 %2012 }
 0x5a0   :  { %v2015_v46 = vadd.f32 %v2013_v30, %v2007_v2  ;;  %v2266_v30 = vld [vmem:[%s5945_s3 + $0x8] sm:$0xff]  ;;  %v3527_v2 = vld [vmem:[%s5945_s3 + $0xd0] sm:$0xff] }
 0x5a1   :  { %v2017_v38 = vpop.permute.xlu0 %2016  ;;  %v5320_v41 = vpack.c.bf16 %v2266_v30, %v2265_v8 }
 0x5a2   :  { %v2019_v16 = vadd.f32 %v2017_v38, %v2011_v7  ;;  %v3521_v38 = vld [vmem:[%s5945_s3 + $0xa0] sm:$0xff]  ;;  %v3528_v7 = vld [vmem:[%s5945_s3 + $0xd8] sm:$0xff] }
 0x5a3   :  { %v2021_v1 = vpop.permute.xlu1 %2020  ;;  %3988 = vmatpush1.bf16.msra.mxu1 %v5320_v41 }
 0x5a4   :  { %v2023_v21 = vadd.f32 %v2021_v1, %v2015_v46  ;;  %v3522_v1 = vld [vmem:[%s5945_s3 + $0xa8] sm:$0xff]  ;;  %3989 = vmatprep.subr.bf16.mxu1 %v4160_v3  ;;  %v5384_v46 = vpack.c.bf16 %v3528_v7, %v3527_v2 }
 0x5a5   :  { %v2025_v31 = vpop.permute.xlu0 %2024 }
 0x5a6   :  { %v2027_v44 = vadd.f32 %v2025_v31, %v2019_v16  ;;  %v5331_v31 = vpack.c.bf16 %v3522_v1, %v3521_v38  ;;  %v2273_v16 = vld [vmem:[%s5945_s3 + $0x40] sm:$0xff] }
 0x5a7   :  { %v2029_v20 = vpop.permute.xlu1 %2028 }
 0x5a8   :  { %v2031_v18 = vadd.f32 %v2029_v20, %v2023_v21  ;;  %v5340_v20 = vpack.c.bf16 %v2268_v24, %v2267_v25  ;;  %3958 = vmatpush1.bf16.msra.mxu0 %v5331_v31  ;;  %v3529_v21 = vld [vmem:[%s5945_s3 + $0xe0] sm:$0xff] }
 0x5a9   :  { %v2033_v56 = vpop.permute.xlu0 %2032  ;;  %3959 = vmatprep.subr.bf16.mxu0 %v4160_v3 }
 0x5aa   :  { %v2035_v34 = vadd.f32 %v2033_v56, %v2027_v44  ;;  %v2270_v56 = vld [vmem:[%s5945_s3 + $0x28] sm:$0xff]  ;;  %3991 = vmatpush1.bf16.msra.mxu1 %v5340_v20 }
 0x5ab   :  { %v2037_v10 = vpop.permute.xlu1 %2036  ;;  %3992 = vmatprep.subr.bf16.mxu1 %v4160_v3  ;;  %v3530_v44 = vld [vmem:[%s5945_s3 + $0xe8] sm:$0xff] }
 0x5ac   :  { %v2039_v22 = vadd.f32 %v2037_v10, %v2031_v18  ;;  %v5360_v10 = vpack.c.bf16 %v2270_v56, %v2269_v17  ;;  %3961 = vmatpush1.bf16.msra.mxu0 %v5344_v9  ;;  %v5404_v18 = vpack.c.bf16 %v3530_v44, %v3529_v21  ;;  %v1952_v21 = vld [vmem:[%s5943_s5 + $0x1] sm:$0x1] }
 0x5ad   :  { %v2041_v0 = vpop.permute.xlu0 %2040  ;;  %3962 = vmatprep.subr.bf16.mxu0 %v4160_v3 }
 0x5ae   :  { %v2043_v47 = vadd.f32 %v2041_v0, %v2035_v34  ;;  %v2272_v0 = vld [vmem:[%s5945_s3 + $0x38] sm:$0xff]  ;;  %3994 = vmatpush1.bf16.msra.mxu1 %v5360_v10  ;;  %v2275_v34 = vld [vmem:[%s5945_s3 + $0x50] sm:$0xff] }
 0x5af   :  { %v2045_v4 = vpop.permute.xlu1 %2044  ;;  %3995 = vmatprep.subr.bf16.mxu1 %v4160_v3 }
 0x5b0   :  { %v2047_v58 = vadd.f32 %v2045_v4, %v2039_v22  ;;  %v5380_v4 = vpack.c.bf16 %v2272_v0, %v2271_v51  ;;  %3964 = vmatpush1.bf16.msra.mxu0 %v5364_v23  ;;  %v3531_v22 = vld [vmem:[%s5945_s3 + $0xf0] sm:$0xff] }
 0x5b1   :  { %v2049_v42 = vpop.permute.xlu0 %2048  ;;  %3965 = vmatprep.subr.bf16.mxu0 %v4160_v3 }
 0x5b2   :  { %v2051_v48 = vadd.f32 %v2049_v42, %v2043_v47  ;;  %v2274_v42 = vld [vmem:[%s5945_s3 + $0x48] sm:$0xff]  ;;  %3997 = vmatpush1.bf16.msra.mxu1 %v5380_v4  ;;  %v3532_v47 = vld [vmem:[%s5945_s3 + $0xf8] sm:$0xff] }
 0x5b3   :  { %v2053_v28 = vpop.permute.xlu1 %2052  ;;  %3998 = vmatprep.subr.bf16.mxu1 %v4160_v3 }
 0x5b4   :  { %v2055_v53 = vadd.f32 %v2053_v28, %v2047_v58  ;;  %v5400_v28 = vpack.c.bf16 %v2274_v42, %v2273_v16  ;;  %3967 = vmatpush1.bf16.msra.mxu0 %v5384_v46  ;;  %v5424_v58 = vpack.c.bf16 %v3532_v47, %v3531_v22  ;;  %v3536_v22 = vld [vmem:[%s5945_s3 + $0x118] sm:$0xff]  ;;  %v2281_v47 = vld [vmem:[%s5945_s3 + $0x80] sm:$0xff] }
 0x5b5   :  { %v2057_v40 = vpop.permute.xlu0 %2056  ;;  %3968 = vmatprep.subr.bf16.mxu0 %v4160_v3 }
 0x5b6   :  { %v2059_v50 = vadd.f32 %v2057_v40, %v2051_v48  ;;  %v2276_v40 = vld [vmem:[%s5945_s3 + $0x58] sm:$0xff]  ;;  %4000 = vmatpush1.bf16.msra.mxu1 %v5400_v28  ;;  %v2277_v48 = vld [vmem:[%s5945_s3 + $0x60] sm:$0xff] }
 0x5b7   :  { %v2061_v52 = vpop.permute.xlu1 %2060  ;;  %4001 = vmatprep.subr.bf16.mxu1 %v4160_v3 }
 0x5b8   :  { %v2063_v60 = vadd.f32 %v2061_v52, %v2055_v53  ;;  %v5420_v52 = vpack.c.bf16 %v2276_v40, %v2275_v34  ;;  %3970 = vmatpush1.bf16.msra.mxu0 %v5404_v18  ;;  %v3533_v53 = vld [vmem:[%s5945_s3 + $0x100] sm:$0xff]  ;;  %v3535_v40 = vld [vmem:[%s5945_s3 + $0x110] sm:$0xff] }
 0x5b9   :  { %v2065_v27 = vpop.permute.xlu0 %2064  ;;  %3971 = vmatprep.subr.bf16.mxu0 %v4160_v3 }
 0x5ba   :  { %v2067_v59 = vadd.f32 %v2065_v27, %v2059_v50  ;;  %v2278_v27 = vld [vmem:[%s5945_s3 + $0x68] sm:$0xff]  ;;  %4003 = vmatpush1.bf16.msra.mxu1 %v5420_v52 }
 0x5bb   :  { %v2069_v57 = vpop.permute.xlu1 %2068  ;;  %v3534_v50 = vld [vmem:[%s5945_s3 + $0x108] sm:$0xff]  ;;  %4004 = vmatprep.subr.bf16.mxu1 %v4160_v3 }
 0x5bc   :  { %v2071_v43 = vadd.f32 %v2069_v57, %v2063_v60  ;;  %v5440_v57 = vpack.c.bf16 %v2278_v27, %v2277_v48  ;;  %3973 = vmatpush1.bf16.msra.mxu0 %v5424_v58  ;;  %v5504_v48 = vpack.c.bf16 %v3536_v22, %v3535_v40  ;;  %v2282_v27 = vld [vmem:[%s5945_s3 + $0x88] sm:$0xff] }
 0x5bd   :  { %v2073_v63 = vpop.permute.xlu0 %2072  ;;  %3974 = vmatprep.subr.bf16.mxu0 %v4160_v3 }
 0x5be   :  { %v2075_v5 = vadd.f32 %v2073_v63, %v2067_v59  ;;  %v5444_v59 = vpack.c.bf16 %v3534_v50, %v3533_v53  ;;  %v2279_v63 = vld [vmem:[%s5945_s3 + $0x70] sm:$0xff]  ;;  %4006 = vmatpush1.bf16.msra.mxu1 %v5440_v57  ;;  %v1953_v50 = vld [vmem:[%s5944_s6 + $0x1] sm:$0x1] }
 0x5bf   :  { %v2077_v62 = vpop.permute.xlu1 %2076  ;;  %4007 = vmatprep.subr.bf16.mxu1 %v4160_v3 }
 0x5c0   :  { %v2080_v55 = vmul.f32 0.001953125, %v2075_v5  ;;  %v2079_v12 = vadd.f32 %v2077_v62, %v2071_v43  ;;  %v2280_v43 = vld [vmem:[%s5945_s3 + $0x78] sm:$0xff]  ;;  %3976 = vmatpush1.bf16.msra.mxu0 %v5444_v59 }
 0x5c1   :  { %v5455_v5 = vpack.c.bf16 %v2280_v43, %v2279_v63  ;;  %3977 = vmatprep.subr.bf16.mxu0 %v4160_v3 }
 0x5c2   :  { %v2093_v13 = vrot.slane %v2080_v55, %v4688_v49  ;;  %2087 = vst.msk [vmem:[#allocation5] sm:$0x1] %vm5964_vm9, %v2080_v55  ;;  %v2081_v15 = vmul.f32 0.001953125, %v2079_v12  ;;  %v2082_v61 = vmul.f32 %v2080_v55, %v2080_v55 }
 0x5c3   :  { %4009 = vmatpush1.bf16.msra.mxu1 %v5455_v5 }
 0x5c4   :  { %v2083_v39 = vsub.f32 %v2081_v15, %v2082_v61  ;;  %2094 = vrot.lane.b32.xlu0 %v2093_v13, %s4162_s18  ;;  %4010 = vmatprep.subr.bf16.mxu1 %v4160_v3 }
 0x5c5   :  { %3979 = vmatpush1.bf16.msra.mxu0 %v5504_v48 }
 0x5c6   :  { %v2084_v14 = vmax.f32 %v2083_v39, 0.0  ;;  %3980 = vmatprep.subr.bf16.mxu0 %v4160_v3 }
 0x5c8   :  { %v2085_v26 = vadd.f32 1e-05, %v2084_v14  ;;  %2107 = vrot.lane.b32.xlu0 %v2093_v13, %s4176_s16 }
 0x5ca   :  { %4155 = vrsqrt.f32 %v2085_v26 }
 0x5cc   :  { %2115 = vrot.lane.b32.xlu0 %v2093_v13, %s4175_s15 }
 0x5d0   :  { %2123 = vrot.lane.b32.xlu0 %v2093_v13, %s4174_s14 }
 0x5d4   :  { %v4156_v19 = vpop.eup %4155  ;;  %2131 = vrot.lane.b32.xlu0 %v2093_v13, %s4173_s13 }
 0x5d5   :  { %v2102_v29 = vrot.slane %v4156_v19, %v4688_v49  ;;  %2088 = vst.msk [vmem:[#allocation6] sm:$0x1] %vm5964_vm9, %v4156_v19  ;;  %vm5965_vm9 = vcmask 254144  }
 0x5d7   :  { %2111 = vrot.lane.b32.xlu1 %v2102_v29, %s4176_s16 }
 0x5d8   :  { %2139 = vrot.lane.b32.xlu0 %v2093_v13, %s4172_s12 }
 0x5db   :  { %2119 = vrot.lane.b32.xlu1 %v2102_v29, %s4175_s15 }
 0x5dc   :  { %2147 = vrot.lane.b32.xlu0 %v2093_v13, %s4171_s11 }
 0x5df   :  { %2127 = vrot.lane.b32.xlu1 %v2102_v29, %s4174_s14 }
 0x5e0   :  { %2155 = vrot.lane.b32.xlu0 %v2093_v13, %s4170_s10 }
 0x5e3   :  { %2135 = vrot.lane.b32.xlu1 %v2102_v29, %s4173_s13 }
 0x5e4   :  { %2163 = vrot.lane.b32.xlu0 %v2093_v13, %s4169_s9 }
 0x5e7   :  { %2143 = vrot.lane.b32.xlu1 %v2102_v29, %s4172_s12 }
 0x5e8   :  { %2171 = vrot.lane.b32.xlu0 %v2093_v13, %s4168_s8 }
 0x5eb   :  { %2151 = vrot.lane.b32.xlu1 %v2102_v29, %s4171_s11 }
 0x5ec   :  { %2103 = vrot.lane.b32.xlu0 %v2102_v29, %s4162_s18 }
 0x5ef   :  { %2159 = vrot.lane.b32.xlu1 %v2102_v29, %s4170_s10 }
 0x5f0   :  { %2179 = vrot.lane.b32.xlu0 %v2093_v13, %s4167_s30 }
 0x5f3   :  { %2167 = vrot.lane.b32.xlu1 %v2102_v29, %s4169_s9 }
 0x5f4   :  { %2187 = vrot.lane.b32.xlu0 %v2093_v13, %s4166_s29 }
 0x5f7   :  { %2175 = vrot.lane.b32.xlu1 %v2102_v29, %s4168_s8 }
 0x5f8   :  { %2195 = vrot.lane.b32.xlu0 %v2093_v13, %s4165_s28 }
 0x5fb   :  { %2183 = vrot.lane.b32.xlu1 %v2102_v29, %s4167_s30 }
 0x5fc   :  { %2203 = vrot.lane.b32.xlu0 %v2093_v13, %s4164_s27 }
 0x5ff   :  { %2191 = vrot.lane.b32.xlu1 %v2102_v29, %s4166_s29 }
 0x603   :  { %2199 = vrot.lane.b32.xlu1 %v2102_v29, %s4165_s28 }
 0x607   :  { %2207 = vrot.lane.b32.xlu1 %v2102_v29, %s4164_s27 }
 0x60b   :  { %2215 = vrot.lane.b32.xlu1 %v2102_v29, %s4163_s26 }
 0x60f   :  { %2211 = vrot.lane.b32.xlu1 %v2093_v13, %s4163_s26 }
 0x636   :  { %v2095_v60 = vpop.permute.xlu0 %2094 }
 0x637   :  { %2097 = vst.msk [vmem:[#allocation5] sm:$0x1] %vm987_vm12, %v2095_v60  ;;  %v5512_v60 = vpack.c.bf16 %v2282_v27, %v2281_v47 }
 0x639   :  { %4012 = vmatpush1.bf16.msra.mxu1 %v5512_v60 }
 0x63a   :  { %v2108_v62 = vpop.permute.xlu0 %2107  ;;  %4013 = vmatprep.subr.bf16.mxu1 %v4160_v3 }
 0x63b   :  { %2110 = vst.msk [vmem:[#allocation5] sm:$0x1] %vm1001_vm13, %v2108_v62  ;;  %v3537_v62 = vld [vmem:[%s5945_s3 + $0x120] sm:$0xff] }
 0x63e   :  { %v2116_v55 = vpop.permute.xlu0 %2115 }
 0x63f   :  { %2118 = vst.msk [vmem:[#allocation5] sm:$0x1] %vm5965_vm9, %v2116_v55  ;;  %vm5967_vm9 = vcmask 713344   ;;  %v3538_v55 = vld [vmem:[%s5945_s3 + $0x128] sm:$0xff] }
 0x642   :  { %v2124_v12 = vpop.permute.xlu0 %2123 }
 0x643   :  { %2126 = vst.msk [vmem:[#allocation5] sm:$0x1] %vm5961_vm15, %v2124_v12 }
 0x646   :  { %v2132_v13 = vpop.permute.xlu0 %2131 }
 0x647   :  { %2134 = vst.msk [vmem:[#allocation5] sm:$0x1] %vm5966_vm10, %v2132_v13  ;;  %vm5968_vm10 = vcmask 254144   ;;  %v5529_v13 = vpack.c.bf16 %v3538_v55, %v3537_v62  ;;  %v3548_v62 = vld [vmem:[%s5945_s3 + $0x158] sm:$0xff] }
 0x649   :  { %v2112_v15 = vpop.permute.xlu1 %2111  ;;  %3982 = vmatpush1.bf16.msra.mxu0 %v5529_v13 }
 0x64a   :  { %v2140_v61 = vpop.permute.xlu0 %2139  ;;  %3983 = vmatprep.subr.bf16.mxu0 %v4160_v3 }
 0x64b   :  { %2142 = vst.msk [vmem:[#allocation5] sm:$0x1] %vm1037_vm3, %v2140_v61 }
 0x64d   :  { %v2120_v39 = vpop.permute.xlu1 %2119 }
 0x64e   :  { %v2148_v14 = vpop.permute.xlu0 %2147 }
 0x64f   :  { %2150 = vst.msk [vmem:[#allocation5] sm:$0x1] %vm5962_vm4, %v2148_v14 }
 0x651   :  { %v2128_v26 = vpop.permute.xlu1 %2127 }
 0x652   :  { %v2156_v19 = vpop.permute.xlu0 %2155 }
 0x653   :  { %2158 = vst.msk [vmem:[#allocation5] sm:$0x1] %vm5963_vm5, %v2156_v19  ;;  %v3539_v19 = vld [vmem:[%s5945_s3 + $0x130] sm:$0xff] }
 0x655   :  { %v2136_v29 = vpop.permute.xlu1 %2135 }
 0x656   :  { %v2164_v8 = vpop.permute.xlu0 %2163 }
 0x657   :  { %2166 = vst.msk [vmem:[#allocation5] sm:$0x1] %vm1064_vm7, %v2164_v8 }
 0x659   :  { %v2144_v30 = vpop.permute.xlu1 %2143 }
 0x65a   :  { %v2172_v38 = vpop.permute.xlu0 %2171 }
 0x65b   :  { %2174 = vst.msk [vmem:[#allocation5] sm:$0x1] %vm5967_vm9, %v2172_v38  ;;  %vm5971_vm9 = vcmask 844544  }
 0x65d   :  { %v2152_v1 = vpop.permute.xlu1 %2151 }
 0x65e   :  { %v2104_v25 = vpop.permute.xlu0 %2103 }
 0x65f   :  { %2106 = vst.msk [vmem:[#allocation6] sm:$0x1] %vm987_vm12, %v2104_v25 }
 0x660   :  { %2114 = vst.msk [vmem:[#allocation6] sm:$0x1] %vm1001_vm13, %v2112_v15  ;;  %v2284_v15 = vld [vmem:[%s5945_s3 + $0x98] sm:$0xff] }
 0x661   :  { %2122 = vst.msk [vmem:[#allocation6] sm:$0x1] %vm5968_vm10, %v2120_v39  ;;  %v2160_v24 = vpop.permute.xlu1 %2159  ;;  %vm5972_vm10 = vcmask 713344  }
 0x662   :  { %2130 = vst.msk [vmem:[#allocation6] sm:$0x1] %vm5961_vm15, %v2128_v26  ;;  %v2180_v37 = vpop.permute.xlu0 %2179  ;;  %vm5973_vm15 = vcmask 910144  }
 0x663   :  { %2138 = vst.msk [vmem:[#allocation6] sm:$0x1] %vm5969_vm11, %v2136_v29  ;;  %vm5974_vm11 = vcmask 975744   ;;  %v3540_v29 = vld [vmem:[%s5945_s3 + $0x138] sm:$0xff] }
 0x664   :  { %2182 = vst.msk [vmem:[#allocation5] sm:$0x1] %vm5970_vm1, %v2180_v37  ;;  %v5551_v38 = vpack.c.bf16 %v3540_v29, %v3539_v19 }
 0x665   :  { %2146 = vst.msk [vmem:[#allocation6] sm:$0x1] %vm1037_vm3, %v2144_v30  ;;  %v2168_v33 = vpop.permute.xlu1 %2167 }
 0x666   :  { %2154 = vst.msk [vmem:[#allocation6] sm:$0x1] %vm5962_vm4, %v2152_v1  ;;  %v2188_v17 = vpop.permute.xlu0 %2187  ;;  %vm5975_vm4 = vmmov %vm5971_vm9  ;;  %3985 = vmatpush1.bf16.msra.mxu0 %v5551_v38 }
 0x667   :  { %2162 = vst.msk [vmem:[#allocation6] sm:$0x1] %vm5963_vm5, %v2160_v24  ;;  %vm5976_vm5 = vmmov %vm5973_vm15  ;;  %4016 = vmatprep.subr.bf16.mxu0 %v4160_v3 }
 0x668   :  { %2170 = vst.msk [vmem:[#allocation6] sm:$0x1] %vm1064_vm7, %v2168_v33 }
 0x669   :  { %2190 = vst.msk [vmem:[#allocation5] sm:$0x1] %vm5971_vm9, %v2188_v17  ;;  %v2176_v56 = vpop.permute.xlu1 %2175  ;;  %vm5977_vm9 = vmmov %vm5974_vm11 }
 0x66a   :  { %2178 = vst.msk [vmem:[#allocation6] sm:$0x1] %vm5972_vm10, %v2176_v56  ;;  %v2196_v35 = vpop.permute.xlu0 %2195  ;;  %vm5978_vm10 = vcmask 1041344  }
 0x66b   :  { %2198 = vst.msk [vmem:[#allocation5] sm:$0x1] %vm5973_vm15, %v2196_v35  ;;  %vm5979_vm15 = vmmov %vm5978_vm10 }
 0x66d   :  { %v2184_v45 = vpop.permute.xlu1 %2183 }
 0x66e   :  { %2186 = vst.msk [vmem:[#allocation6] sm:$0x1] %vm5970_vm1, %v2184_v45  ;;  %v2204_v51 = vpop.permute.xlu0 %2203 }
 0x66f   :  { %2206 = vst.msk [vmem:[#allocation5] sm:$0x1] %vm5974_vm11, %v2204_v51 }
 0x671   :  { %v2192_v0 = vpop.permute.xlu1 %2191 }
 0x672   :  { %2194 = vst.msk [vmem:[#allocation6] sm:$0x1] %vm5975_vm4, %v2192_v0  ;;  %vm5980_vm4 = vcmask 1041536   ;;  %v3545_v0 = vld [vmem:[%s5945_s3 + $0x140] sm:$0xff] }
 0x675   :  { %v2200_v2 = vpop.permute.xlu1 %2199 }
 0x676   :  { %2202 = vst.msk [vmem:[#allocation6] sm:$0x1] %vm5976_vm5, %v2200_v2  ;;  %vm5981_vm5 = vcmask 123904   ;;  %v3546_v2 = vld [vmem:[%s5945_s3 + $0x148] sm:$0xff] }
 0x677   :  { %vm5987_vm11 = vmmov %vm5981_vm5 }
 0x679   :  { %v2208_v7 = vpop.permute.xlu1 %2207 }
 0x67a   :  { %2210 = vst.msk [vmem:[#allocation6] sm:$0x1] %vm5977_vm9, %v2208_v7  ;;  %vm5988_vm9 = vmmov %vm5980_vm4 }
 0x67d   :  { %v2216_v16 = vpop.permute.xlu1 %2215 }
 0x67e   :  { %2218 = vst.msk [vmem:[#allocation6] sm:$0x1] %vm5978_vm10, %v2216_v16 }
 0x681   :  { %v2212_v42 = vpop.permute.xlu1 %2211 }
 0x682   :  { %2214 = vst.msk [vmem:[#allocation5] sm:$0x1] %vm5979_vm15, %v2212_v42 }
 0x685   :  { %v2219_v44 = vld [vmem:[#allocation6] sm:$0x1] }
 0x686   :  { %2226 = vst [vmem:[#allocation6] sm:$0x1] %v4733_v32  ;;  %v2220_v34 = vmul.f32 %v2219_v44, %v1952_v21 }
 0x688   :  { %v2232_v43 = vrot.slane %v2220_v34, %v4688_v49 }
 0x689   :  { %v2221_v53 = vld [vmem:[#allocation5] sm:$0x1] }
 0x68a   :  { %2225 = vst [vmem:[#allocation5] sm:$0x1] %v4733_v32  ;;  %v2222_v63 = vmul.f32 %v2221_v53, %v2220_v34  ;;  %v2283_v32 = vld [vmem:[%s5945_s3 + $0x90] sm:$0xff]  ;;  %v2233_v39 = vmul.f32 %v2232_v43, %v5227_v54  ;;  %v2234_v26 = vmul.f32 %v2232_v43, %v5229_v6  ;;  %v2643_v6 = vmul.f32 %v2232_v43, %v5237_v11 }
 0x68b   :  { %v5534_v61 = vpack.c.bf16 %v2284_v15, %v2283_v32  ;;  %v2644_v30 = vmul.f32 %v2232_v43, %v5239_v36  ;;  %v3547_v43 = vld [vmem:[%s5945_s3 + $0x150] sm:$0xff] }
 0x68c   :  { %v2223_v12 = vsub.f32 %v1953_v50, %v2222_v63  ;;  %v5590_v63 = vpack.c.bf16 %v3546_v2, %v3545_v0  ;;  %v3554_v0 = vld [vmem:[%s5945_s3 + $0x188] sm:$0xff] }
 0x68d   :  { %4015 = vmatpush1.bf16.msra.mxu1 %v5534_v61 }
 0x68e   :  { %v2238_v14 = vrot.slane %v2223_v12, %v4688_v49  ;;  %4046 = vmatprep.subr.bf16.mxu1 %v4160_v3 }
 0x690   :  { %v2239_v8 = vadd.f32 %v2238_v14, %v2233_v39  ;;  %v2240_v54 = vadd.f32 %v2238_v14, %v2234_v26  ;;  %v2645_v24 = vadd.f32 %v2643_v6, %v2238_v14  ;;  %v2646_v37 = vadd.f32 %v2644_v30, %v2238_v14 }
 0x692   :  { %v2243_v1 = vrot.slane %v2239_v8, 6  ;;  %v2244_v25 = vrot.slane %v2240_v54, 6  ;;  %v2649_v17 = vrot.slane %v2645_v24, 6  ;;  %v2650_v11 = vrot.slane %v2646_v37, 6 }
 0x693   :  { %v5613_v54 = vpack.c.bf16 %v3548_v62, %v3547_v43  ;;  %v3564_v62 = vld [vmem:[%s5945_s3 + $0x1d8] sm:$0xff] }
 0x694   :  { %2246 = vrot.lane.b32.xlu0 %v2243_v1, %s4176_s16  ;;  %v2245_v33 = vsel %vm1148_vm8, %v2243_v1, %v2244_v25  ;;  %v2651_v36 = vsel %vm1148_vm8, %v2649_v17, %v2650_v11  ;;  %vm5982_vm8 = vcmask 261120   ;;  %v3549_v1 = vld [vmem:[%s5945_s3 + $0x160] sm:$0xff] }
 0x695   :  { %2248 = vrot.lane.b32.xlu1 %v2245_v33, %s4176_s16  ;;  %vm5983_vm1 = vmmov %vm5982_vm8 }
 0x698   :  { %2250 = vrot.lane.b32.xlu0 %v2244_v25, %s4176_s16  ;;  %v3550_v25 = vld [vmem:[%s5945_s3 + $0x168] sm:$0xff] }
 0x699   :  { %2652 = vrot.lane.b32.xlu1 %v2649_v17, %s4176_s16 }
 0x69c   :  { %2654 = vrot.lane.b32.xlu0 %v2651_v36, %s4176_s16 }
 0x69d   :  { %2656 = vrot.lane.b32.xlu1 %v2650_v11, %s4176_s16  ;;  %v5634_v11 = vpack.c.bf16 %v3550_v25, %v3549_v1 }
 0x706   :  { %v2247_v56 = vpop.permute.xlu0 %2246 }
 0x707   :  { %2255 = vst.msk [vmem:[#allocation4] sm:$0xfc] %vm1161_vm2, %v2247_v56  ;;  %v2249_v35 = vpop.permute.xlu1 %2248 }
 0x708   :  { %2256 = vst.msk [vmem:[#allocation4 + $0x8] sm:$0xfc] %vm1163_vm14, %v2247_v56  ;;  %v3551_v56 = vld [vmem:[%s5945_s3 + $0x170] sm:$0xff] }
 0x709   :  { %2257 = vst.msk [vmem:[#allocation4 + $0x10] sm:$0xff] %vm1165_vm6, %v2249_v35 }
 0x70a   :  { %2258 = vst.msk [vmem:[#allocation4 + $0x18] sm:$0xff] %vm27_vm0, %v2249_v35  ;;  %v2251_v45 = vpop.permute.xlu0 %2250 }
 0x70b   :  { %2259 = vst.msk [vmem:[#allocation4 + $0x20] sm:$0x3] %vm5980_vm4, %v2251_v45  ;;  %v2653_v51 = vpop.permute.xlu1 %2652  ;;  %vm5992_vm4 = vcmask 1043456  }
 0x70c   :  { %2260 = vst.msk [vmem:[#allocation4 + $0x28] sm:$0x3] %vm5981_vm5, %v2251_v45  ;;  %vm5993_vm5 = vmmov %vm5983_vm1 }
 0x70e   :  { %v5575_v7 = vld [vmem:[#allocation4] sm:$0xf0]  ;;  %v2655_v16 = vpop.permute.xlu0 %2654 }
 0x70f   :  { %v2262_v42 = vld [vmem:[#allocation4 + $0x8] sm:$0xff]  ;;  %v2261_v21 = vld [vmem:[#allocation4] sm:$0xff]  ;;  %v2657_v12 = vpop.permute.xlu1 %2656 }
 0x710   :  { %v5577_v44 = vld [vmem:[#allocation4 + $0x10] sm:$0xff]  ;;  %3543 = vmatprep.mubr.msk.f32.mxu1 %vm5982_vm8, %v2262_v42  ;;  %v2286_v40 = vld [vmem:[#allocation4 + $0x8] sm:$0xfc]  ;;  %v2285_v27 = vld [vmem:[#allocation4] sm:$0xfc] }
 0x711   :  { %v5579_v34 = vld [vmem:[#allocation4 + $0x18] sm:$0xff]  ;;  %2663 = vst.msk [vmem:[#allocation4 + $0x10] sm:$0xff] %vm1165_vm6, %v2655_v16  ;;  %2477 = vmatmul.mubr.f32.vlgmr.msra.gmra.mrb[24].mxu1 %v2261_v21  ;;  %v2319_v22 = vrot.slane %v2286_v40, 2  ;;  %v2317_v53 = vrot.slane %v5577_v44, 2  ;;  %v2316_v50 = vrot.slane %v2285_v27, 2  ;;  %vm5985_vm6 = vmmov %vm5983_vm1 }
 0x712   :  { %2664 = vst.msk [vmem:[#allocation4 + $0x18] sm:$0xff] %vm27_vm0, %v2655_v16  ;;  %v2320_v47 = vrot.slane %v5579_v34, 2  ;;  %4048 = vmatpush1.bf16.msra.mxu1 %v5331_v31  ;;  %3544 = vmatprep.mubr.msk.f32.mxu1 %vm5983_vm1, %v5579_v34  ;;  %v2488_v55 = vld [vmem:[#allocation4 + $0x8] sm:$0xf0]  ;;  %v5598_v32 = vld [vmem:[#allocation4 + $0x20] sm:$0xf] }
 0x713   :  { %2661 = vst.msk [vmem:[#allocation4] sm:$0xfc] %vm1161_vm2, %v2653_v51  ;;  %v5600_v31 = vld [vmem:[#allocation4 + $0x28] sm:$0xf]  ;;  %vm5984_vm0 = vcmask 1045504   ;;  %4049 = vmatprep.subr.bf16.mxu1 %v4160_v3  ;;  %v2519_v6 = vrot.slane %v2488_v55, 4 }
 0x714   :  { %v2321_v15 = vsel %vm5984_vm0, %v2319_v22, %v2320_v47  ;;  %v2288_v39 = vld [vmem:[#allocation4 + $0x28] sm:$0x3]  ;;  %2662 = vst.msk [vmem:[#allocation4 + $0x8] sm:$0xfc] %vm1163_vm14, %v2653_v51  ;;  %vm5986_vm2 = vmmov %vm5984_vm0  ;;  %v2287_v19 = vld [vmem:[#allocation4 + $0x20] sm:$0x3] }
 0x715   :  { %3541 = vmatprep.mubr.msk.f32.mxu0 %vm5985_vm6, %v2321_v15  ;;  %v2318_v14 = vsel %vm5986_vm2, %v2316_v50, %v2317_v53  ;;  %v2324_v26 = vrot.slane %v2288_v39, 2  ;;  %2666 = vst.msk [vmem:[#allocation4 + $0x28] sm:$0x3] %vm5987_vm11, %v2657_v12  ;;  %2482 = vmatmul.mubr.f32.gmra.mrb[26].mxu1 %v5577_v44  ;;  %v2322_v29 = vrot.slane %v2287_v19, 2  ;;  %vm5989_vm10 = vmmov %vm5984_vm0  ;;  %v2520_v30 = vrot.slane %v5579_v34, 4  ;;  %v3553_v51 = vld [vmem:[%s5945_s3 + $0x180] sm:$0xff] }
 0x716   :  { %2397 = vmatmul.mubr.f32.vlgmr.msra.gmra.mrb[24].mxu0 %v2318_v14  ;;  %2665 = vst.msk [vmem:[#allocation4 + $0x20] sm:$0x3] %vm5988_vm9, %v2657_v12  ;;  %4051 = vmatpush1.bf16.msra.mxu1 %v5344_v9  ;;  %vm5990_vm14 = vmmov %vm5983_vm1  ;;  %v5662_v2 = vpack.c.bf16 %v3554_v0, %v3553_v51  ;;  %v3556_v16 = vld [vmem:[%s5945_s3 + $0x198] sm:$0xff]  ;;  %v3558_v21 = vld [vmem:[%s5945_s3 + $0x1a8] sm:$0xff]  ;;  %v2517_v19 = vrot.slane %v5577_v44, 4  ;;  %v2524_v1 = vrot.slane %v5600_v31, 4 }
 0x717   :  { %4018 = vmatpush1.bf16.msra.mxu0 %v5590_v63  ;;  %v2325_v8 = vsel %vm5989_vm10, %v2320_v47, %v2324_v26  ;;  %4052 = vmatprep.subr.bf16.mxu1 %v4160_v3  ;;  %vm5991_vm15 = vmmov %vm5984_vm0  ;;  %v2521_v33 = vsel %vm5992_vm4, %v2519_v6, %v2520_v30  ;;  %v3560_v22 = vld [vmem:[%s5945_s3 + $0x1b8] sm:$0xff]  ;;  %v3562_v27 = vld [vmem:[%s5945_s3 + $0x1c8] sm:$0xff]  ;;  %v2516_v26 = vrot.slane %v5575_v7, 4  ;;  %v2522_v31 = vrot.slane %v5598_v32, 4 }
 0x718   :  { %3542 = vmatprep.mubr.msk.f32.mxu0 %vm5990_vm14, %v2325_v8  ;;  %4019 = vmatprep.subr.bf16.mxu0 %v4160_v3  ;;  %v2323_v9 = vsel %vm5991_vm15, %v2317_v53, %v2322_v29  ;;  %vm5994_vm8 = vmmov %vm5984_vm0  ;;  %v5712_v50 = vld [vmem:[#allocation4 + $0x10] sm:$0xff] }
 0x719   :  { %v5626_v24 = vld [vmem:[#allocation4 + $0x18] sm:$0xff]  ;;  %v2722_v15 = vrot.slane %v5712_v50, 2  ;;  %vm5995_vm6 = vmmov %vm5984_vm0 }
 0x71a   :  { %2402 = vmatmul.mubr.f32.gmra.mrb[26].mxu0 %v2323_v9  ;;  %v2725_v37 = vrot.slane %v5626_v24, 2  ;;  %4054 = vmatpush1.bf16.msra.mxu1 %v5364_v23  ;;  %v3552_v23 = vld [vmem:[%s5945_s3 + $0x178] sm:$0xff]  ;;  %v2691_v43 = vld [vmem:[#allocation4] sm:$0xfc]  ;;  %vm5996_vm2 = vmmov %vm5983_vm1  ;;  %v2924_v44 = vrot.slane %v5626_v24, 4 }
 0x71b   :  { %4021 = vmatpush1.bf16.msra.mxu0 %v5613_v54  ;;  %v2692_v17 = vld [vmem:[#allocation4 + $0x8] sm:$0xfc]  ;;  %3565 = vmatprep.mubr.msk.f32.mxu0 %vm5993_vm5, %v2521_v33  ;;  %v5650_v45 = vpack.c.bf16 %v3552_v23, %v3551_v56  ;;  %v2721_v12 = vrot.slane %v2691_v43, 2  ;;  %vm5997_vm11 = vmmov %vm5992_vm4 }
 0x71c   :  { %4022 = vmatprep.subr.bf16.mxu0 %v4160_v3  ;;  %v2724_v36 = vrot.slane %v2692_v17, 2  ;;  %4055 = vmatprep.subr.bf16.mxu1 %v4160_v3  ;;  %v2694_v55 = vld [vmem:[#allocation4 + $0x28] sm:$0x3]  ;;  %v2893_v29 = vld [vmem:[#allocation4 + $0x8] sm:$0xf0]  ;;  %v2518_v25 = vsel %vm5997_vm11, %v2516_v26, %v2517_v19  ;;  %vm5998_vm9 = vmmov %vm5984_vm0 }
 0x71d   :  { %v2693_v14 = vld [vmem:[#allocation4 + $0x20] sm:$0x3]  ;;  %v2723_v8 = vsel %vm5984_vm0, %v2721_v12, %v2722_v15  ;;  %v2923_v7 = vrot.slane %v2893_v29, 4  ;;  %vm5999_vm10 = vmmov %vm5992_vm4  ;;  %v2668_v34 = vld [vmem:[#allocation4 + $0x8] sm:$0xff] }
 0x71e   :  { %v2726_v35 = vsel %vm5994_vm8, %v2724_v36, %v2725_v37  ;;  %4057 = vmatpush1.bf16.msra.mxu1 %v5384_v46  ;;  %v3555_v46 = vld [vmem:[%s5945_s3 + $0x190] sm:$0xff]  ;;  %v2727_v6 = vrot.slane %v2693_v14, 2  ;;  %vm6000_vm14 = vmmov %vm5983_vm1  ;;  %v2617_v29 = vld [vmem:[#allocation5] sm:$0x1] }
 0x71f   :  { %3588 = vmatprep.mubr.msk.f32.mxu1 %vm5983_vm1, %v2726_v35  ;;  %4024 = vmatpush1.bf16.msra.mxu0 %v5634_v11  ;;  %v5674_v42 = vpack.c.bf16 %v3556_v16, %v3555_v46  ;;  %vm6001_vm15 = vmmov %vm5992_vm4 }
 0x720   :  { %4025 = vmatprep.subr.bf16.mxu0 %v4160_v3  ;;  %4058 = vmatprep.subr.bf16.mxu1 %v4160_v3  ;;  %v2728_v9 = vsel %vm5998_vm9, %v2722_v15, %v2727_v6  ;;  %vm6002_vm4 = vmmov %vm5983_vm1  ;;  %vm6010_vm9 = vcmask 57344  }
 0x721   :  { %vm6003_vm5 = vmmov %vm5999_vm10 }
 0x722   :  { %4060 = vmatpush1.bf16.msra.mxu1 %v5404_v18  ;;  %v3557_v18 = vld [vmem:[%s5945_s3 + $0x1a0] sm:$0xff]  ;;  %v2523_v32 = vsel %vm6003_vm5, %v2517_v19, %v2522_v31  ;;  %vm6004_vm8 = vmmov %vm5983_vm1 }
 0x723   :  { %4027 = vmatpush1.bf16.msra.mxu0 %v5650_v45  ;;  %4061 = vmatprep.subr.bf16.mxu1 %v4160_v3  ;;  %v5686_v40 = vpack.c.bf16 %v3558_v21, %v3557_v18  ;;  %vm6005_vm1 = vmmov %vm6003_vm5  ;;  %vm6015_vm5 = vcmask 516544  }
 0x724   :  { %4028 = vmatprep.subr.bf16.mxu0 %v4160_v3  ;;  %vm6006_vm0 = vmmov %vm6005_vm1 }
 0x725   :  { %vm6009_vm11 = vmmov %vm6002_vm4 }
 0x726   :  { %4063 = vmatpush1.bf16.msra.mxu1 %v5424_v58  ;;  %v3559_v58 = vld [vmem:[%s5945_s3 + $0x1b0] sm:$0xff] }
 0x727   :  { %4030 = vmatpush1.bf16.msra.mxu0 %v5662_v2  ;;  %4064 = vmatprep.subr.bf16.mxu1 %v4160_v3  ;;  %v5698_v47 = vpack.c.bf16 %v3560_v22, %v3559_v58 }
 0x728   :  { %4031 = vmatprep.subr.bf16.mxu0 %v4160_v3 }
 0x72a   :  { %4066 = vmatpush1.bf16.msra.mxu1 %v5444_v59  ;;  %v3561_v59 = vld [vmem:[%s5945_s3 + $0x1c0] sm:$0xff] }
 0x72b   :  { %4033 = vmatpush1.bf16.msra.mxu0 %v5674_v42  ;;  %4067 = vmatprep.subr.bf16.mxu1 %v4160_v3  ;;  %v5710_v53 = vpack.c.bf16 %v3562_v27, %v3561_v59 }
 0x72c   :  { %4034 = vmatprep.subr.bf16.mxu0 %v4160_v3 }
 0x72e   :  { %4069 = vmatpush1.bf16.msra.mxu1 %v5504_v48  ;;  %v3563_v48 = vld [vmem:[%s5945_s3 + $0x1d0] sm:$0xff] }
 0x72f   :  { %4036 = vmatpush1.bf16.msra.mxu0 %v5686_v40  ;;  %4070 = vmatprep.subr.bf16.mxu1 %v4160_v3  ;;  %v5725_v39 = vpack.c.bf16 %v3564_v62, %v3563_v48 }
 0x730   :  { %4037 = vmatprep.subr.bf16.mxu0 %v4160_v3 }
 0x732   :  { %4072 = vmatpush1.bf16.msra.mxu1 %v5529_v13  ;;  %v2729_v13 = vrot.slane %v2694_v55, 2 }
 0x733   :  { %4039 = vmatpush1.bf16.msra.mxu0 %v5698_v47  ;;  %4073 = vmatprep.subr.bf16.mxu1 %v4160_v3 }
 0x734   :  { %4040 = vmatprep.subr.bf16.mxu0 %v4160_v3 }
 0x736   :  { %4075 = vmatpush1.bf16.msra.mxu1 %v5551_v38  ;;  %v2730_v38 = vsel %vm5995_vm6, %v2725_v37, %v2729_v13  ;;  %v2525_v37 = vsel %vm5999_vm10, %v2520_v30, %v2524_v1  ;;  %vm6007_vm6 = vmmov %vm5996_vm2  ;;  %v2667_v30 = vld [vmem:[#allocation4] sm:$0xff]  ;;  %v2627_v1 = vld [vmem:[#allocation6] sm:$0x1] }
 0x737   :  { %4042 = vmatpush1.bf16.msra.mxu0 %v5710_v53  ;;  %4106 = vmatprep.subr.bf16.mxu1 %v4160_v3  ;;  %vm6011_vm10 = vmmov %vm6010_vm9 }
 0x738   :  { %4043 = vmatprep.subr.bf16.mxu0 %v4160_v3 }
 0x739   :  { %2802 = vmatmul.mubr.f32.vlgmr.msra.gmra.mrb[28].mxu1 %v2723_v8 }
 0x73a   :  { %3589 = vmatprep.mubr.msk.f32.mxu1 %vm5996_vm2, %v2730_v38  ;;  %4108 = vmatpush1.bf16.msra.mxu1 %v5590_v63  ;;  %v2925_v63 = vsel %vm6001_vm15, %v2923_v7, %v2924_v44  ;;  %vm6008_vm2 = vmmov %vm6006_vm0  ;;  %vm6013_vm15 = vcmask 319744  }
 0x73b   :  { %4045 = vmatpush1.bf16.msra.mxu0 %v5725_v39  ;;  %4109 = vmatprep.subr.bf16.mxu1 %v4160_v3 }
 0x73c   :  { %4076 = vmatprep.subr.bf16.mxu0 %v4160_v3 }
 0x73d   :  { %2807 = vmatmul.mubr.f32.gmra.mrb[30].mxu1 %v2728_v9 }
 0x73e   :  { %2597 = vmatmul.mubr.f32.vlgmr.msra.gmra.mrb[28].mxu0 %v2518_v25  ;;  %4111 = vmatpush1.bf16.msra.mxu1 %v5613_v54 }
 0x73f   :  { %3566 = vmatprep.mubr.msk.f32.mxu0 %vm6000_vm14, %v2525_v37  ;;  %4078 = vmatpush1.bf16.msra.mxu0 %v5320_v41  ;;  %v2892_v41 = vld [vmem:[#allocation4] sm:$0xf0]  ;;  %vm6012_vm14 = vcmask 254144  }
 0x740   :  { %3612 = vmatprep.mubr.msk.f32.mxu1 %vm6002_vm4, %v2925_v63  ;;  %4079 = vmatprep.subr.bf16.mxu0 %v4160_v3  ;;  %vm6014_vm4 = vcmask 385344  }
 0x741   :  { %4112 = vmatprep.subr.bf16.mxu1 %v4160_v3 }
 0x742   :  { %2602 = vmatmul.mubr.f32.gmra.mrb[30].mxu0 %v2523_v32  ;;  %4114 = vmatpush1.bf16.msra.mxu1 %v5634_v11 }
 0x743   :  { %3590 = vmatprep.mubr.msk.f32.mxu0 %vm6004_vm8, %v2668_v34  ;;  %4081 = vmatpush1.bf16.msra.mxu0 %v5340_v20  ;;  %v2895_v20 = vld [vmem:[#allocation4 + $0x28] sm:$0xf]  ;;  %vm6016_vm8 = vcmask 582144  }
 0x744   :  { %4082 = vmatprep.subr.bf16.mxu0 %v4160_v3  ;;  %4115 = vmatprep.subr.bf16.mxu1 %v4160_v3 }
 0x746   :  { %4117 = vmatpush1.bf16.msra.mxu1 %v5650_v45 }
 0x747   :  { %4084 = vmatpush1.bf16.msra.mxu0 %v5360_v10  ;;  %4118 = vmatprep.subr.bf16.mxu1 %v4160_v3  ;;  %v2920_v10 = vrot.slane %v2892_v41, 4 }
 0x748   :  { %4085 = vmatprep.subr.bf16.mxu0 %v4160_v3 }
 0x74a   :  { %4120 = vmatpush1.bf16.msra.mxu1 %v5662_v2  ;;  %v3567_v2 = vld [vmem:[%s5941_s4 + $0x2] ss:$0 sm:$0xff] }
 0x74b   :  { %4087 = vmatpush1.bf16.msra.mxu0 %v5380_v4  ;;  %4121 = vmatprep.subr.bf16.mxu1 %v4160_v3  ;;  %v2921_v4 = vrot.slane %v5712_v50, 4 }
 0x74c   :  { %4088 = vmatprep.subr.bf16.mxu0 %v4160_v3 }
 0x74e   :  { %4123 = vmatpush1.bf16.msra.mxu1 %v5674_v42 }
 0x74f   :  { %4090 = vmatpush1.bf16.msra.mxu0 %v5400_v28  ;;  %4124 = vmatprep.subr.bf16.mxu1 %v4160_v3  ;;  %v2928_v28 = vrot.slane %v2895_v20, 4 }
 0x750   :  { %4091 = vmatprep.subr.bf16.mxu0 %v4160_v3 }
 0x751   :  { %v2929_v54 = vsel %vm6006_vm0, %v2924_v44, %v2928_v28  ;;  %vm6018_vm0 = vmmov %vm6012_vm14 }
 0x752   :  { %4126 = vmatpush1.bf16.msra.mxu1 %v5686_v40 }
 0x753   :  { %4093 = vmatpush1.bf16.msra.mxu0 %v5420_v52  ;;  %4127 = vmatprep.subr.bf16.mxu1 %v4160_v3  ;;  %v2894_v52 = vld [vmem:[#allocation4 + $0x20] sm:$0xf] }
 0x754   :  { %4094 = vmatprep.subr.bf16.mxu0 %v4160_v3 }
 0x756   :  { %4129 = vmatpush1.bf16.msra.mxu1 %v5698_v47 }
 0x757   :  { %4096 = vmatpush1.bf16.msra.mxu0 %v5440_v57  ;;  %4130 = vmatprep.subr.bf16.mxu1 %v4160_v3  ;;  %v2922_v57 = vsel %vm6005_vm1, %v2920_v10, %v2921_v4  ;;  %vm6017_vm1 = vcmask 713344  }
 0x758   :  { %4097 = vmatprep.subr.bf16.mxu0 %v4160_v3 }
 0x75a   :  { %4132 = vmatpush1.bf16.msra.mxu1 %v5710_v53 }
 0x75b   :  { %4099 = vmatpush1.bf16.msra.mxu0 %v5455_v5  ;;  %4133 = vmatprep.subr.bf16.mxu1 %v4160_v3  ;;  %v2926_v5 = vrot.slane %v2894_v52, 4 }
 0x75c   :  { %4100 = vmatprep.subr.bf16.mxu0 %v4160_v3 }
 0x75d   :  { %v2927_v33 = vsel %vm6008_vm2, %v2921_v4, %v2926_v5  ;;  %vm6020_vm2 = vmmov %vm6014_vm4 }
 0x75e   :  { %4135 = vmatpush1.bf16.msra.mxu1 %v5725_v39 }
 0x75f   :  { %4102 = vmatpush1.bf16.msra.mxu0 %v5512_v60 }
 0x760   :  { %4103 = vmatprep.subr.bf16.mxu0 %v4160_v3 }
 0x761   :  { %3001 = vmatmul.mubr.f32.vlgmr.msra.gmra.mrb[32].mxu1 %v2922_v57 }
 0x762   :  { %3613 = vmatprep.mubr.msk.f32.mxu1 %vm6007_vm6, %v2929_v54  ;;  %vm6019_vm6 = vmmov %vm6013_vm15 }
 0x763   :  { %4105 = vmatpush1.bf16.msra.mxu0 %v5534_v61 }
 0x765   :  { %3006 = vmatmul.mubr.f32.gmra.mrb[34].mxu1 %v2927_v33 }
 0x766   :  { %2882 = vmatmul.mubr.f32.vlgmr.msra.gmra.mrb[32].mxu0 %v2667_v30 }
 0x767   :  { %3591 = vmatprep.mubr.msk.f32.mxu0 %vm6009_vm11, %v5626_v24  ;;  %vm6021_vm11 = vcmask 778944  }
 0x76a   :  { %2887 = vmatmul.mubr.f32.gmra.mrb[34].mxu0 %v5712_v50 }
 0x7e4   :  { %v2478_v3 = vpop.f32.mrb[24].mxu1 }
 0x7e5   :  { %v2480_v60 = vpop.f32.mrb[25].mxu1 }
 0x7e8   :  { %v2483_v11 = vpop.f32.mrb[26].mxu1 }
 0x7e9   :  { %v2398_v17 = vpop.f32.mrb[24].mxu0  ;;  %v2485_v23 = vpop.f32.mrb[27].mxu1 }
 0x7ea   :  { %v2479_v36 = vadd.f32 %v2478_v3, %v2398_v17  ;;  %v2400_v56 = vpop.f32.mrb[25].mxu0 }
 0x7ed   :  { %v2403_v61 = vpop.f32.mrb[26].mxu0 }
 0x7ee   :  { %v2484_v35 = vadd.f32 %v2483_v11, %v2403_v61  ;;  %v2405_v45 = vpop.f32.mrb[27].mxu0 }
 0x80c   :  { %v2803_v51 = vpop.f32.mrb[28].mxu1 }
 0x80d   :  { %v2805_v0 = vpop.f32.mrb[29].mxu1 }
 0x810   :  { %v2808_v16 = vpop.f32.mrb[30].mxu1 }
 0x811   :  { %v2598_v46 = vpop.f32.mrb[28].mxu0  ;;  %v2810_v18 = vpop.f32.mrb[31].mxu1 }
 0x812   :  { %v2607_v24 = vadd.f32 %v2598_v46, %v2479_v36  ;;  %v2600_v42 = vpop.f32.mrb[29].mxu0 }
 0x814   :  { %v2613_v21 = vadd.f32 %v3567_v2, %v2607_v24 }
 0x815   :  { %v2603_v40 = vpop.f32.mrb[30].mxu0 }
 0x816   :  { %v2608_v58 = vadd.f32 %v2603_v40, %v2484_v35  ;;  %v2605_v22 = vpop.f32.mrb[31].mxu0  ;;  %v5801_v47 = vmax.f32 %v2613_v21, 0.0 }
 0x818   :  { %v2614_v59 = vadd.f32 %v3567_v2, %v2608_v58  ;;  %v2628_v53 = vmul.f32 %v5801_v47, %v5801_v47 }
 0x81a   :  { %v5803_v27 = vmax.f32 %v2614_v59, 0.0 }
 0x81c   :  { %v2618_v50 = vadd.f32 %v5803_v27, %v5801_v47  ;;  %v2629_v43 = vmul.f32 %v5803_v27, %v5803_v27 }
 0x81e   :  { %v2619_v48 = vrot.slane %v2618_v50, 4  ;;  %v2630_v62 = vadd.f32 %v2629_v43, %v2628_v53 }
 0x820   :  { %v2620_v55 = vadd.f32 %v2619_v48, %v2618_v50  ;;  %v2631_v12 = vrot.slane %v2630_v62, 4 }
 0x822   :  { %v2621_v15 = vrot.slane %v2620_v55, 2  ;;  %v2632_v39 = vadd.f32 %v2631_v12, %v2630_v62 }
 0x824   :  { %v2622_v13 = vadd.f32 %v2621_v15, %v2620_v55  ;;  %v2633_v14 = vrot.slane %v2632_v39, 2 }
 0x826   :  { %v2623_v26 = vrot.slane %v2622_v13, 1  ;;  %v2634_v19 = vadd.f32 %v2633_v14, %v2632_v39 }
 0x828   :  { %v2624_v8 = vadd.f32 %v2623_v26, %v2622_v13  ;;  %v2635_v6 = vrot.slane %v2634_v19, 1 }
 0x82a   :  { %v2625_v38 = vadd.f32 %v2624_v8, %v2617_v29  ;;  %v2636_v7 = vadd.f32 %v2635_v6, %v2634_v19 }
 0x82c   :  { %2626 = vst [vmem:[#allocation5] sm:$0x1] %v2625_v38  ;;  %v2637_v44 = vadd.f32 %v2636_v7, %v2627_v1 }
 0x82e   :  { %2638 = vst [vmem:[#allocation6] sm:$0x1] %v2637_v44 }
 0x833   :  { %v3017_v46 = vld [vmem:[#allocation5] sm:$0x1] }
 0x834   :  { %v3002_v25 = vpop.f32.mrb[32].mxu1 }
 0x835   :  { %v3004_v31 = vpop.f32.mrb[33].mxu1  ;;  %v3027_v42 = vld [vmem:[#allocation6] sm:$0x1] }
 0x838   :  { %v3007_v37 = vpop.f32.mrb[34].mxu1 }
 0x839   :  { %v2883_v9 = vpop.f32.mrb[32].mxu0  ;;  %v3009_v34 = vpop.f32.mrb[35].mxu1 }
 0x83a   :  { %v2884_v63 = vadd.f32 %v2883_v9, %v2803_v51  ;;  %v2885_v32 = vpop.f32.mrb[33].mxu0 }
 0x83c   :  { %v3011_v41 = vadd.f32 %v3002_v25, %v2884_v63 }
 0x83d   :  { %v2888_v20 = vpop.f32.mrb[34].mxu0 }
 0x83e   :  { %v3013_v10 = vadd.f32 %v3567_v2, %v3011_v41  ;;  %v2889_v4 = vadd.f32 %v2888_v20, %v2808_v16  ;;  %v2890_v28 = vpop.f32.mrb[35].mxu0 }
 0x840   :  { %v3012_v52 = vadd.f32 %v3007_v37, %v2889_v4  ;;  %v5811_v57 = vmax.f32 %v3013_v10, 0.0 }
 0x842   :  { %v3014_v5 = vadd.f32 %v3567_v2, %v3012_v52  ;;  %v3028_v30 = vmul.f32 %v5811_v57, %v5811_v57 }
 0x844   :  { %v5813_v54 = vmax.f32 %v3014_v5, 0.0 }
 0x846   :  { %v3018_v33 = vadd.f32 %v5813_v54, %v5811_v57  ;;  %v3029_v3 = vmul.f32 %v5813_v54, %v5813_v54 }
 0x848   :  { %v3019_v60 = vrot.slane %v3018_v33, 4  ;;  %v3030_v17 = vadd.f32 %v3029_v3, %v3028_v30 }
 0x84a   :  { %v3020_v11 = vadd.f32 %v3019_v60, %v3018_v33  ;;  %v3031_v36 = vrot.slane %v3030_v17, 4 }
 0x84c   :  { %v3021_v56 = vrot.slane %v3020_v11, 2  ;;  %v3032_v23 = vadd.f32 %v3031_v36, %v3030_v17 }
 0x84e   :  { %v3022_v61 = vadd.f32 %v3021_v56, %v3020_v11  ;;  %v3033_v35 = vrot.slane %v3032_v23, 2 }
 0x850   :  { %v3023_v45 = vrot.slane %v3022_v61, 1  ;;  %v3034_v51 = vadd.f32 %v3033_v35, %v3032_v23 }
 0x852   :  { %v3024_v0 = vadd.f32 %v3023_v45, %v3022_v61  ;;  %v3035_v2 = vrot.slane %v3034_v51, 1 }
 0x854   :  { %v3025_v24 = vadd.f32 %v3024_v0, %v3017_v46  ;;  %v3036_v16 = vadd.f32 %v3035_v2, %v3034_v51 }
 0x856   :  { %3026 = vst [vmem:[#allocation5] sm:$0x1] %v3025_v24  ;;  %v3037_v18 = vadd.f32 %v3036_v16, %v3027_v42 }
 0x858   :  { %3038 = vst [vmem:[#allocation6] sm:$0x1] %v3037_v18 }
 0x85d   :  { %v3043_v21 = vld [vmem:[#allocation5] sm:$0x1] }
 0x85e   :  { %3048 = vrot.lane.b32.xlu0 %v3043_v21, %s4163_s26 }
 0x85f   :  { %v3044_v40 = vld [vmem:[#allocation6] sm:$0x1] }
 0x860   :  { %3053 = vrot.lane.b32.xlu1 %v3044_v40, %s4163_s26 }
 0x862   :  { %3057 = vrot.lane.b32.xlu0 %v3043_v21, %s4164_s27 }
 0x864   :  { %3061 = vrot.lane.b32.xlu1 %v3044_v40, %s4164_s27 }
 0x866   :  { %3065 = vrot.lane.b32.xlu0 %v3043_v21, %s4165_s28 }
 0x868   :  { %3069 = vrot.lane.b32.xlu1 %v3044_v40, %s4165_s28 }
 0x86a   :  { %3073 = vrot.lane.b32.xlu0 %v3043_v21, %s4166_s29 }
 0x86c   :  { %3077 = vrot.lane.b32.xlu1 %v3044_v40, %s4166_s29 }
 0x86e   :  { %3081 = vrot.lane.b32.xlu0 %v3043_v21, %s4167_s30 }
 0x870   :  { %3085 = vrot.lane.b32.xlu1 %v3044_v40, %s4167_s30 }
 0x872   :  { %3089 = vrot.lane.b32.xlu0 %v3043_v21, %s4168_s8 }
 0x874   :  { %3093 = vrot.lane.b32.xlu1 %v3044_v40, %s4168_s8 }
 0x876   :  { %3097 = vrot.lane.b32.xlu0 %v3043_v21, %s4169_s9 }
 0x878   :  { %3101 = vrot.lane.b32.xlu1 %v3044_v40, %s4169_s9 }
 0x87a   :  { %3105 = vrot.lane.b32.xlu0 %v3043_v21, %s4170_s10 }
 0x87c   :  { %3109 = vrot.lane.b32.xlu1 %v3044_v40, %s4170_s10 }
 0x87e   :  { %3113 = vrot.lane.b32.xlu0 %v3043_v21, %s4171_s11 }
 0x880   :  { %3117 = vrot.lane.b32.xlu1 %v3044_v40, %s4171_s11 }
 0x882   :  { %3121 = vrot.lane.b32.xlu0 %v3043_v21, %s4172_s12 }
 0x884   :  { %3125 = vrot.lane.b32.xlu1 %v3044_v40, %s4172_s12 }
 0x886   :  { %3129 = vrot.lane.b32.xlu0 %v3043_v21, %s4173_s13 }
 0x888   :  { %3133 = vrot.lane.b32.xlu1 %v3044_v40, %s4173_s13 }
 0x88a   :  { %3137 = vrot.lane.b32.xlu0 %v3043_v21, %s4174_s14 }
 0x88c   :  { %3141 = vrot.lane.b32.xlu1 %v3044_v40, %s4174_s14 }
 0x88e   :  { %3145 = vrot.lane.b32.xlu0 %v3043_v21, %s4175_s15 }
 0x890   :  { %3149 = vrot.lane.b32.xlu1 %v3044_v40, %s4175_s15 }
 0x892   :  { %3153 = vrot.lane.b32.xlu0 %v3043_v21, %s4176_s16 }
 0x894   :  { %3157 = vrot.lane.b32.xlu1 %v3044_v40, %s4176_s16 }
 0x896   :  { %3161 = vrot.lane.b32.xlu0 %v3043_v21, %s4162_s18 }
 0x898   :  { %3165 = vrot.lane.b32.xlu1 %v3044_v40, %s4162_s18 }
 0x8d0   :  { %v3049_v58 = vpop.permute.xlu0 %3048 }
 0x8d1   :  { %v3051_v19 = vadd.f32 %v3049_v58, %v3043_v21 }
 0x8d2   :  { %v3054_v22 = vpop.permute.xlu1 %3053 }
 0x8d3   :  { %v3056_v8 = vadd.f32 %v3054_v22, %v3044_v40 }
 0x8d4   :  { %v3058_v59 = vpop.permute.xlu0 %3057 }
 0x8d5   :  { %v3060_v6 = vadd.f32 %v3058_v59, %v3051_v19 }
 0x8d6   :  { %v3062_v53 = vpop.permute.xlu1 %3061 }
 0x8d7   :  { %v3064_v38 = vadd.f32 %v3062_v53, %v3056_v8 }
 0x8d8   :  { %v3066_v50 = vpop.permute.xlu0 %3065 }
 0x8d9   :  { %v3068_v7 = vadd.f32 %v3066_v50, %v3060_v6 }
 0x8da   :  { %v3070_v43 = vpop.permute.xlu1 %3069 }
 0x8db   :  { %v3072_v25 = vadd.f32 %v3070_v43, %v3064_v38 }
 0x8dc   :  { %v3074_v48 = vpop.permute.xlu0 %3073 }
 0x8dd   :  { %v3076_v31 = vadd.f32 %v3074_v48, %v3068_v7 }
 0x8de   :  { %v3078_v62 = vpop.permute.xlu1 %3077 }
 0x8df   :  { %v3080_v37 = vadd.f32 %v3078_v62, %v3072_v25 }
 0x8e0   :  { %v3082_v55 = vpop.permute.xlu0 %3081 }
 0x8e1   :  { %v3084_v63 = vadd.f32 %v3082_v55, %v3076_v31 }
 0x8e2   :  { %v3086_v12 = vpop.permute.xlu1 %3085 }
 0x8e3   :  { %v3088_v34 = vadd.f32 %v3086_v12, %v3080_v37 }
 0x8e4   :  { %v3090_v15 = vpop.permute.xlu0 %3089 }
 0x8e5   :  { %v3092_v41 = vadd.f32 %v3090_v15, %v3084_v63 }
 0x8e6   :  { %v3094_v39 = vpop.permute.xlu1 %3093 }
 0x8e7   :  { %v3096_v10 = vadd.f32 %v3094_v39, %v3088_v34 }
 0x8e8   :  { %v3098_v13 = vpop.permute.xlu0 %3097 }
 0x8e9   :  { %v3100_v4 = vadd.f32 %v3098_v13, %v3092_v41 }
 0x8ea   :  { %v3102_v14 = vpop.permute.xlu1 %3101 }
 0x8eb   :  { %v3104_v52 = vadd.f32 %v3102_v14, %v3096_v10 }
 0x8ec   :  { %v3106_v26 = vpop.permute.xlu0 %3105 }
 0x8ed   :  { %v3108_v5 = vadd.f32 %v3106_v26, %v3100_v4 }
 0x8ee   :  { %v3110_v29 = vpop.permute.xlu1 %3109 }
 0x8ef   :  { %v3112_v33 = vadd.f32 %v3110_v29, %v3104_v52 }
 0x8f0   :  { %v3114_v1 = vpop.permute.xlu0 %3113 }
 0x8f1   :  { %v3116_v3 = vadd.f32 %v3114_v1, %v3108_v5 }
 0x8f2   :  { %v3118_v44 = vpop.permute.xlu1 %3117 }
 0x8f3   :  { %v3120_v17 = vadd.f32 %v3118_v44, %v3112_v33 }
 0x8f4   :  { %v3122_v9 = vpop.permute.xlu0 %3121 }
 0x8f5   :  { %v3124_v11 = vadd.f32 %v3122_v9, %v3116_v3 }
 0x8f6   :  { %v3126_v32 = vpop.permute.xlu1 %3125 }
 0x8f7   :  { %v3128_v56 = vadd.f32 %v3126_v32, %v3120_v17 }
 0x8f8   :  { %v3130_v20 = vpop.permute.xlu0 %3129 }
 0x8f9   :  { %v3132_v23 = vadd.f32 %v3130_v20, %v3124_v11 }
 0x8fa   :  { %v3134_v28 = vpop.permute.xlu1 %3133 }
 0x8fb   :  { %v3136_v35 = vadd.f32 %v3134_v28, %v3128_v56  ;;  %v3042_v56 = vld [vmem:[%s5944_s6 + $0x2] sm:$0x1] }
 0x8fc   :  { %v3138_v30 = vpop.permute.xlu0 %3137 }
 0x8fd   :  { %v3140_v45 = vadd.f32 %v3138_v30, %v3132_v23 }
 0x8fe   :  { %v3142_v60 = vpop.permute.xlu1 %3141 }
 0x8ff   :  { %v3144_v0 = vadd.f32 %v3142_v60, %v3136_v35  ;;  %v3041_v60 = vld [vmem:[%s5943_s5 + $0x2] sm:$0x1] }
 0x900   :  { %v3146_v36 = vpop.permute.xlu0 %3145 }
 0x901   :  { %v3148_v2 = vadd.f32 %v3146_v36, %v3140_v45 }
 0x902   :  { %v3150_v61 = vpop.permute.xlu1 %3149 }
 0x903   :  { %v3152_v24 = vadd.f32 %v3150_v61, %v3144_v0 }
 0x904   :  { %v3154_v51 = vpop.permute.xlu0 %3153 }
 0x905   :  { %v3156_v16 = vadd.f32 %v3154_v51, %v3148_v2 }
 0x906   :  { %v3158_v46 = vpop.permute.xlu1 %3157 }
 0x907   :  { %v3160_v18 = vadd.f32 %v3158_v46, %v3152_v24 }
 0x908   :  { %v3162_v42 = vpop.permute.xlu0 %3161 }
 0x909   :  { %v3164_v21 = vadd.f32 %v3162_v42, %v3156_v16 }
 0x90a   :  { %v3166_v40 = vpop.permute.xlu1 %3165 }
 0x90b   :  { %v3169_v58 = vmul.f32 0.001953125, %v3164_v21  ;;  %v3168_v22 = vadd.f32 %v3166_v40, %v3160_v18 }
 0x90d   :  { %v3182_v59 = vrot.slane %v3169_v58, %v4688_v49  ;;  %3176 = vst.msk [vmem:[#allocation5] sm:$0x1] %vm6010_vm9, %v3169_v58  ;;  %v3170_v53 = vmul.f32 0.001953125, %v3168_v22  ;;  %v3171_v50 = vmul.f32 %v3169_v58, %v3169_v58  ;;  %vm6022_vm9 = vmmov %vm6015_vm5 }
 0x90f   :  { %v3172_v43 = vsub.f32 %v3170_v53, %v3171_v50  ;;  %3183 = vrot.lane.b32.xlu0 %v3182_v59, %s4162_s18 }
 0x911   :  { %v3173_v48 = vmax.f32 %v3172_v43, 0.0 }
 0x913   :  { %v3174_v62 = vadd.f32 1e-05, %v3173_v48  ;;  %3196 = vrot.lane.b32.xlu0 %v3182_v59, %s4176_s16 }
 0x915   :  { %4157 = vrsqrt.f32 %v3174_v62 }
 0x917   :  { %3204 = vrot.lane.b32.xlu0 %v3182_v59, %s4175_s15 }
 0x91b   :  { %3212 = vrot.lane.b32.xlu0 %v3182_v59, %s4174_s14 }
 0x91f   :  { %v4158_v55 = vpop.eup %4157  ;;  %3220 = vrot.lane.b32.xlu0 %v3182_v59, %s4173_s13 }
 0x920   :  { %v3191_v12 = vrot.slane %v4158_v55, %v4688_v49  ;;  %3177 = vst.msk [vmem:[#allocation6] sm:$0x1] %vm6011_vm10, %v4158_v55  ;;  %vm6023_vm10 = vmmov %vm6016_vm8 }
 0x922   :  { %3200 = vrot.lane.b32.xlu1 %v3191_v12, %s4176_s16 }
 0x923   :  { %3228 = vrot.lane.b32.xlu0 %v3182_v59, %s4172_s12 }
 0x926   :  { %3208 = vrot.lane.b32.xlu1 %v3191_v12, %s4175_s15 }
 0x927   :  { %3236 = vrot.lane.b32.xlu0 %v3182_v59, %s4171_s11 }
 0x92a   :  { %3216 = vrot.lane.b32.xlu1 %v3191_v12, %s4174_s14 }
 0x92b   :  { %3244 = vrot.lane.b32.xlu0 %v3182_v59, %s4170_s10 }
 0x92e   :  { %3224 = vrot.lane.b32.xlu1 %v3191_v12, %s4173_s13 }
 0x92f   :  { %3252 = vrot.lane.b32.xlu0 %v3182_v59, %s4169_s9 }
 0x932   :  { %3232 = vrot.lane.b32.xlu1 %v3191_v12, %s4172_s12 }
 0x933   :  { %3260 = vrot.lane.b32.xlu0 %v3182_v59, %s4168_s8 }
 0x936   :  { %3240 = vrot.lane.b32.xlu1 %v3191_v12, %s4171_s11 }
 0x937   :  { %3192 = vrot.lane.b32.xlu0 %v3191_v12, %s4162_s18 }
 0x93a   :  { %3248 = vrot.lane.b32.xlu1 %v3191_v12, %s4170_s10 }
 0x93b   :  { %3268 = vrot.lane.b32.xlu0 %v3182_v59, %s4167_s30 }
 0x93e   :  { %3256 = vrot.lane.b32.xlu1 %v3191_v12, %s4169_s9 }
 0x93f   :  { %3276 = vrot.lane.b32.xlu0 %v3182_v59, %s4166_s29 }
 0x942   :  { %3264 = vrot.lane.b32.xlu1 %v3191_v12, %s4168_s8 }
 0x943   :  { %3284 = vrot.lane.b32.xlu0 %v3182_v59, %s4165_s28 }
 0x946   :  { %3272 = vrot.lane.b32.xlu1 %v3191_v12, %s4167_s30 }
 0x947   :  { %3292 = vrot.lane.b32.xlu0 %v3182_v59, %s4164_s27 }
 0x94a   :  { %3280 = vrot.lane.b32.xlu1 %v3191_v12, %s4166_s29 }
 0x94e   :  { %3288 = vrot.lane.b32.xlu1 %v3191_v12, %s4165_s28 }
 0x952   :  { %3296 = vrot.lane.b32.xlu1 %v3191_v12, %s4164_s27 }
 0x956   :  { %3304 = vrot.lane.b32.xlu1 %v3191_v12, %s4163_s26 }
 0x95a   :  { %3300 = vrot.lane.b32.xlu1 %v3182_v59, %s4163_s26 }
 0x981   :  { %v3184_v15 = vpop.permute.xlu0 %3183 }
 0x982   :  { %3186 = vst.msk [vmem:[#allocation5] sm:$0x1] %vm987_vm12, %v3184_v15 }
 0x985   :  { %v3197_v39 = vpop.permute.xlu0 %3196 }
 0x986   :  { %3199 = vst.msk [vmem:[#allocation5] sm:$0x1] %vm1001_vm13, %v3197_v39 }
 0x989   :  { %v3205_v13 = vpop.permute.xlu0 %3204 }
 0x98a   :  { %3207 = vst.msk [vmem:[#allocation5] sm:$0x1] %vm6012_vm14, %v3205_v13  ;;  %vm6026_vm14 = vcmask 910144  }
 0x98d   :  { %v3213_v14 = vpop.permute.xlu0 %3212 }
 0x98e   :  { %3215 = vst.msk [vmem:[#allocation5] sm:$0x1] %vm6013_vm15, %v3213_v14  ;;  %vm6027_vm15 = vmmov %vm6021_vm11 }
 0x991   :  { %v3221_v26 = vpop.permute.xlu0 %3220 }
 0x992   :  { %3223 = vst.msk [vmem:[#allocation5] sm:$0x1] %vm6014_vm4, %v3221_v26 }
 0x994   :  { %v3201_v19 = vpop.permute.xlu1 %3200 }
 0x995   :  { %v3229_v29 = vpop.permute.xlu0 %3228 }
 0x996   :  { %3231 = vst.msk [vmem:[#allocation5] sm:$0x1] %vm1037_vm3, %v3229_v29 }
 0x998   :  { %v3209_v8 = vpop.permute.xlu1 %3208 }
 0x999   :  { %v3237_v6 = vpop.permute.xlu0 %3236 }
 0x99a   :  { %3239 = vst.msk [vmem:[#allocation5] sm:$0x1] %vm6015_vm5, %v3237_v6  ;;  %vm6030_vm5 = vmmov %vm6026_vm14 }
 0x99c   :  { %v3217_v1 = vpop.permute.xlu1 %3216 }
 0x99d   :  { %v3245_v38 = vpop.permute.xlu0 %3244 }
 0x99e   :  { %3247 = vst.msk [vmem:[#allocation5] sm:$0x1] %vm6016_vm8, %v3245_v38  ;;  %vm6032_vm8 = vcmask 1041344  }
 0x9a0   :  { %v3225_v7 = vpop.permute.xlu1 %3224 }
 0x9a1   :  { %v3253_v44 = vpop.permute.xlu0 %3252 }
 0x9a2   :  { %3255 = vst.msk [vmem:[#allocation5] sm:$0x1] %vm1064_vm7, %v3253_v44 }
 0x9a4   :  { %v3233_v25 = vpop.permute.xlu1 %3232 }
 0x9a5   :  { %v3261_v31 = vpop.permute.xlu0 %3260 }
 0x9a6   :  { %3263 = vst.msk [vmem:[#allocation5] sm:$0x1] %vm6017_vm1, %v3261_v31 }
 0x9a8   :  { %v3241_v9 = vpop.permute.xlu1 %3240 }
 0x9a9   :  { %v3193_v37 = vpop.permute.xlu0 %3192 }
 0x9aa   :  { %3195 = vst.msk [vmem:[#allocation6] sm:$0x1] %vm987_vm12, %v3193_v37  ;;  %vm6024_vm12 = vcmask 844544  }
 0x9ab   :  { %3203 = vst.msk [vmem:[#allocation6] sm:$0x1] %vm1001_vm13, %v3201_v19  ;;  %vm6025_vm13 = vmmov %vm6017_vm1 }
 0x9ac   :  { %3211 = vst.msk [vmem:[#allocation6] sm:$0x1] %vm6018_vm0, %v3209_v8  ;;  %v3249_v63 = vpop.permute.xlu1 %3248  ;;  %vm6029_vm4 = vmmov %vm6024_vm12 }
 0x9ad   :  { %3219 = vst.msk [vmem:[#allocation6] sm:$0x1] %vm6019_vm6, %v3217_v1  ;;  %v3269_v32 = vpop.permute.xlu0 %3268  ;;  %vm6033_vm1 = vmmov %vm6032_vm8 }
 0x9ae   :  { %3227 = vst.msk [vmem:[#allocation6] sm:$0x1] %vm6020_vm2, %v3225_v7 }
 0x9af   :  { %3271 = vst.msk [vmem:[#allocation5] sm:$0x1] %vm6021_vm11, %v3269_v32 }
 0x9b0   :  { %3235 = vst.msk [vmem:[#allocation6] sm:$0x1] %vm1037_vm3, %v3233_v25  ;;  %v3257_v34 = vpop.permute.xlu1 %3256  ;;  %vm6028_vm3 = vcmask 975744  }
 0x9b1   :  { %3243 = vst.msk [vmem:[#allocation6] sm:$0x1] %vm6022_vm9, %v3241_v9  ;;  %v3277_v41 = vpop.permute.xlu0 %3276 }
 0x9b2   :  { %3251 = vst.msk [vmem:[#allocation6] sm:$0x1] %vm6023_vm10, %v3249_v63 }
 0x9b3   :  { %3259 = vst.msk [vmem:[#allocation6] sm:$0x1] %vm1064_vm7, %v3257_v34  ;;  %vm6031_vm7 = vmmov %vm6028_vm3 }
 0x9b4   :  { %3279 = vst.msk [vmem:[#allocation5] sm:$0x1] %vm6024_vm12, %v3277_v41  ;;  %v3265_v20 = vpop.permute.xlu1 %3264 }
 0x9b5   :  { %3267 = vst.msk [vmem:[#allocation6] sm:$0x1] %vm6025_vm13, %v3265_v20  ;;  %v3285_v10 = vpop.permute.xlu0 %3284 }
 0x9b6   :  { %3287 = vst.msk [vmem:[#allocation5] sm:$0x1] %vm6026_vm14, %v3285_v10 }
 0x9b8   :  { %v3273_v4 = vpop.permute.xlu1 %3272 }
 0x9b9   :  { %3275 = vst.msk [vmem:[#allocation6] sm:$0x1] %vm6027_vm15, %v3273_v4  ;;  %v3293_v28 = vpop.permute.xlu0 %3292 }
 0x9ba   :  { %3295 = vst.msk [vmem:[#allocation5] sm:$0x1] %vm6028_vm3, %v3293_v28 }
 0x9bc   :  { %v3281_v52 = vpop.permute.xlu1 %3280 }
 0x9bd   :  { %3283 = vst.msk [vmem:[#allocation6] sm:$0x1] %vm6029_vm4, %v3281_v52 }
 0x9c0   :  { %v3289_v5 = vpop.permute.xlu1 %3288 }
 0x9c1   :  { %3291 = vst.msk [vmem:[#allocation6] sm:$0x1] %vm6030_vm5, %v3289_v5 }
 0x9c4   :  { %v3297_v30 = vpop.permute.xlu1 %3296 }
 0x9c5   :  { %3299 = vst.msk [vmem:[#allocation6] sm:$0x1] %vm6031_vm7, %v3297_v30 }
 0x9c8   :  { %v3305_v33 = vpop.permute.xlu1 %3304 }
 0x9c9   :  { %3307 = vst.msk [vmem:[#allocation6] sm:$0x1] %vm6032_vm8, %v3305_v33 }
 0x9cc   :  { %v3301_v3 = vpop.permute.xlu1 %3300 }
 0x9cd   :  { %3303 = vst.msk [vmem:[#allocation5] sm:$0x1] %vm6033_vm1, %v3301_v3 }
 0x9d0   :  { %v3308_v17 = vld [vmem:[#allocation6] sm:$0x1] }
 0x9d1   :  { %v3309_v11 = vmul.f32 %v3308_v17, %v3041_v60 }
 0x9d3   :  { %v3320_v23 = vrot.slane %v3309_v11, %v4688_v49 }
 0x9d4   :  { %v3310_v36 = vld [vmem:[#allocation5] sm:$0x1] }
 0x9d5   :  { %v3311_v61 = vmul.f32 %v3310_v36, %v3309_v11  ;;  %v3321_v45 = vmul.f32 %v3320_v23, %v5801_v47  ;;  %v3322_v51 = vmul.f32 %v3320_v23, %v5803_v27  ;;  %v3323_v0 = vmul.f32 %v3320_v23, %v5811_v57 }
 0x9d6   :  { %v3324_v2 = vmul.f32 %v3320_v23, %v5813_v54 }
 0x9d7   :  { %v3312_v35 = vsub.f32 %v3042_v56, %v3311_v61 }
 0x9d9   :  { %v3328_v46 = vrot.slane %v3312_v35, %v4688_v49 }
 0x9db   :  { %v3329_v24 = vadd.f32 %v3328_v46, %v3321_v45  ;;  %v3330_v16 = vadd.f32 %v3328_v46, %v3322_v51  ;;  %v3331_v42 = vadd.f32 %v3328_v46, %v3323_v0  ;;  %v3332_v18 = vadd.f32 %v3328_v46, %v3324_v2 }
 0x9dd   :  { %3333 = vst [vmem:[%s5946_s7] sm:$0xff] %v3329_v24  ;;  %3334 = vst [vmem:[%s5946_s7 + $0x8] sm:$0xff] %v3330_v16 }
 0x9de   :  { %3335 = vst [vmem:[%s5946_s7 + $0x10] sm:$0xff] %v3331_v42  ;;  %3336 = vst [vmem:[%s5946_s7 + $0x18] sm:$0xff] %v3332_v18 }

</bundles_post_ra>
